<compile_context>
chip_gen: v7x
topology: tpu7x:2x2x1
jax: 0.10.0
libtpu: 0.0.40
codegen_flags: <defaults>
</compile_context>

<pallas_src>
import functools

import jax
import jax.numpy as jnp
import numpy as np
from jax.experimental import pallas as pl
from jax.experimental.pallas import tpu as pltpu

KERNEL_SIZE = 5
STRIDE = 2
C1_PAD = 4       # conv1 input channels padded 3 -> 4 so K = W*C is a multiple of 8
HEAD_PAD = 128   # head output padded to one full 128-lane tile (dense store)


def conv2d_size_out(size, kernel_size=KERNEL_SIZE, stride=STRIDE):
    return (size - kernel_size) // stride + 1


# ---------------------------------------------------------------------------
# Fused Pallas kernel
# ---------------------------------------------------------------------------
def _dqn_fused_kernel(x_ref,
                      t1_ref, w1_ref, s1_ref, b1_ref,
                      t2_ref, w2_ref, s2_ref, b2_ref,
                      t3_ref, w3_ref, s3_ref, b3_ref,
                      wh_ref, bh_ref,
                      o_ref):
    def conv_bn_relu6(x_bf, t_ref, w_ref, s_ref, b_ref):
        # x_bf:  [N*H, W*C]      bf16 activation slab, rows = (n, h), cols = (w, c)
        # t_ref: [5, R, N*H]     bf16 0/1 row selection (stride-2 window in H)
        # w_ref: [5, W*C, OW*OC] bf16 block-Toeplitz conv weights (window in W)
        # s_ref, b_ref: [1, OW*OC] f32 folded BN scale / shift(+conv bias)
        acc = None
        for kh in range(t_ref.shape[0]):
            rows = jnp.dot(t_ref[kh], x_bf, preferred_element_type=jnp.float32)
            term = jnp.dot(rows.astype(jnp.bfloat16), w_ref[kh],
                           preferred_element_type=jnp.float32)
            acc = term if acc is None else acc + term
        y = acc * s_ref[...] + b_ref[...]
        return jnp.minimum(jnp.maximum(y, 0.0), 6.0)   # ReLU6 (f32)

    a1 = conv_bn_relu6(x_ref[...].astype(jnp.bfloat16), t1_ref, w1_ref, s1_ref, b1_ref)
    a2 = conv_bn_relu6(a1.astype(jnp.bfloat16), t2_ref, w2_ref, s2_ref, b2_ref)
    a3 = conv_bn_relu6(a2.astype(jnp.bfloat16), t3_ref, w3_ref, s3_ref, b3_ref)

    # conv3 output rows are ordered i-major (row = i*N + n), cols = (j, oc), so the
    # head only needs static contiguous row slices:
    #   out[n, :] = sum_i a3[i*N + n, :] @ Wh_i + bias
    # Wh is pre-permuted to match PyTorch's NCHW flatten order, padded to 128 lanes.
    n = o_ref.shape[0]
    acc = None
    for i in range(wh_ref.shape[0]):
        slab = a3[i * n:(i + 1) * n, :].astype(jnp.bfloat16)
        term = jnp.dot(slab, wh_ref[i], preferred_element_type=jnp.float32)
        acc = term if acc is None else acc + term
    o_ref[...] = acc + bh_ref[...]


def _fused_call(x2d, packed, batch):
    args = (x2d,
            packed["t1"], packed["w1"], packed["s1"], packed["b1"],
            packed["t2"], packed["w2"], packed["s2"], packed["b2"],
            packed["t3"], packed["w3"], packed["s3"], packed["b3"],
            packed["wh"], packed["bh"])
    vmem = pltpu.MemorySpace.VMEM
    return pl.pallas_call(
        _dqn_fused_kernel,
        out_shape=jax.ShapeDtypeStruct((batch, HEAD_PAD), jnp.float32),
        in_specs=[pl.BlockSpec(memory_space=vmem) for _ in args],
        out_specs=pl.BlockSpec(memory_space=vmem),
    )(*args)


@functools.partial(jax.jit, static_argnames=("outputs",))
def dqn_forward(packed, x_nchw, outputs):
    """x_nchw: [N, 3, H, W] float32 (PyTorch layout)."""
    batch, c, h, w = x_nchw.shape
    x = jnp.transpose(x_nchw, (0, 2, 3, 1))                      # NCHW -> NHWC glue
    x = jnp.pad(x, ((0, 0), (0, 0), (0, 0), (0, C1_PAD - c)))    # pad C 3 -> 4
    x2d = x.reshape(batch * h, w * C1_PAD)                       # rows=(n,h), cols=(w,c)
    out = _fused_call(x2d, packed, batch)
    return out[:, :outputs]


# ---------------------------------------------------------------------------
# One-time parameter packing (hoisted out of the forward pass)
# ---------------------------------------------------------------------------
def fold_bn(conv_b, gamma, beta, mean, var, eps=1e-5):
    inv = gamma / np.sqrt(var + eps)
    return inv, (conv_b - mean) * inv + beta


def _toeplitz_weight(conv_w, w_in, c_in_padded):
    """[OC, IC, KH, KW] -> [KH, w_in*c_in_padded, OW*OC] block-Toeplitz (W window)."""
    cw = np.asarray(conv_w, np.float32)
    oc, ic, kh_total, kw_total = cw.shape
    ow = conv2d_size_out(w_in)
    wt = np.zeros((kh_total, w_in * c_in_padded, ow * oc), np.float32)
    for kh in range(kh_total):
        for kw in range(kw_total):
            blk = cw[:, :, kh, kw].T                      # [IC, OC]
            for j in range(ow):
                wpos = STRIDE * j + kw
                wt[kh, wpos * c_in_padded:wpos * c_in_padded + ic,
                   j * oc:(j + 1) * oc] = blk
    return wt


def _row_select(batch, h_in, i_major=False):
    """0/1 matrices [KH, R, batch*h_in] selecting input rows 2*i + kh per sample."""
    oh = conv2d_size_out(h_in)
    t = np.zeros((KERNEL_SIZE, batch * oh, batch * h_in), np.float32)
    for kh in range(KERNEL_SIZE):
        for n in range(batch):
            for i in range(oh):
                r = i * batch + n if i_major else n * oh + i
                t[kh, r, n * h_in + STRIDE * i + kh] = 1.0
    return t


def prepare_params(params, h, w, outputs, batch):
    """BN fold, Toeplitz weights, row selectors, permuted/padded head weights."""
    h1, w1 = h, w
    h2, w2 = conv2d_size_out(h1), conv2d_size_out(w1)
    h3, w3 = conv2d_size_out(h2), conv2d_size_out(w2)
    oh3, ow3 = conv2d_size_out(h3), conv2d_size_out(w3)
    oc1, oc2, oc3 = 16, 32, 32
    ow1, ow2 = conv2d_size_out(w1), conv2d_size_out(w2)

    def np32(a):
        return np.asarray(a, np.float32)

    s1, sh1 = fold_bn(np32(params["conv1_b"]), *[np32(t) for t in params["bn1"]])
    s2, sh2 = fold_bn(np32(params["conv2_b"]), *[np32(t) for t in params["bn2"]])
    s3, sh3 = fold_bn(np32(params["conv3_b"]), *[np32(t) for t in params["bn3"]])

    packed_np = {
        "t1": _row_select(batch, h1),
        "w1": _toeplitz_weight(params["conv1_w"], w1, C1_PAD),
        "s1": np.tile(s1, ow1)[None, :], "b1": np.tile(sh1, ow1)[None, :],
        "t2": _row_select(batch, h2),
        "w2": _toeplitz_weight(params["conv2_w"], w2, oc1),
        "s2": np.tile(s2, ow2)[None, :], "b2": np.tile(sh2, ow2)[None, :],
        # conv3 output rows produced i-major so the head uses static row slices
        "t3": _row_select(batch, h3, i_major=True),
        "w3": _toeplitz_weight(params["conv3_w"], w3, oc2),
        "s3": np.tile(s3, ow3)[None, :], "b3": np.tile(sh3, ow3)[None, :],
    }

    # Head: permute rows from PyTorch NCHW flatten order (c, i, j) to our
    # (row = conv3 output row i, col = j*OC3 + c) order; pad output cols to 128.
    hw = np32(params["head_w"])                        # [outputs, oc3*oh3*ow3]
    wh = np.zeros((oh3, ow3 * oc3, HEAD_PAD), np.float32)
    for i in range(oh3):
        for j in range(ow3):
            for c in range(oc3):
                wh[i, j * oc3 + c, :outputs] = hw[:, c * oh3 * ow3 + i * ow3 + j]
    bh = np.zeros((1, HEAD_PAD), np.float32)
    bh[0, :outputs] = np32(params["head_b"])
    packed_np["wh"] = wh
    packed_np["bh"] = bh

    packed = {}
    for k, v in packed_np.items():
        if k[0] in ("t", "w"):
            packed[k] = jnp.asarray(v, jnp.bfloat16)   # MXU operands (0/1 T is exact)
        else:
            packed[k] = jnp.asarray(v, jnp.float32)    # scale/shift/bias stay f32
    return packed


# ---------------------------------------------------------------------------
# Random params (matching the PyTorch module's shapes) + pure-JAX reference
# ---------------------------------------------------------------------------
def init_params(key, h, w, outputs):
    convw = conv2d_size_out(conv2d_size_out(conv2d_size_out(w)))
    convh = conv2d_size_out(conv2d_size_out(conv2d_size_out(h)))
    lin_in = convw * convh * 32

    ks = jax.random.split(key, 20)
    p = {}
    p["conv1_w"] = 0.05 * jax.random.normal(ks[0], (16, 3, 5, 5), jnp.float32)
    p["conv1_b"] = 0.05 * jax.random.normal(ks[1], (16,), jnp.float32)
    p["bn1"] = (1.0 + 0.1 * jax.random.normal(ks[2], (16,), jnp.float32),
                0.1 * jax.random.normal(ks[3], (16,), jnp.float32),
                0.1 * jax.random.normal(ks[4], (16,), jnp.float32),
                0.5 + jnp.abs(jax.random.normal(ks[5], (16,), jnp.float32)))
    p["conv2_w"] = 0.05 * jax.random.normal(ks[6], (32, 16, 5, 5), jnp.float32)
    p["conv2_b"] = 0.05 * jax.random.normal(ks[7], (32,), jnp.float32)
    p["bn2"] = (1.0 + 0.1 * jax.random.normal(ks[8], (32,), jnp.float32),
                0.1 * jax.random.normal(ks[9], (32,), jnp.float32),
                0.1 * jax.random.normal(ks[10], (32,), jnp.float32),
                0.5 + jnp.abs(jax.random.normal(ks[11], (32,), jnp.float32)))
    p["conv3_w"] = 0.05 * jax.random.normal(ks[12], (32, 32, 5, 5), jnp.float32)
    p["conv3_b"] = 0.05 * jax.random.normal(ks[13], (32,), jnp.float32)
    p["bn3"] = (1.0 + 0.1 * jax.random.normal(ks[14], (32,), jnp.float32),
                0.1 * jax.random.normal(ks[15], (32,), jnp.float32),
                0.1 * jax.random.normal(ks[16], (32,), jnp.float32),
                0.5 + jnp.abs(jax.random.normal(ks[17], (32,), jnp.float32)))
    p["head_w"] = 0.05 * jax.random.normal(ks[18], (outputs, lin_in), jnp.float32)
    p["head_b"] = 0.05 * jax.random.normal(ks[19], (outputs,), jnp.float32)
    return p


def dqn_reference(params, x_nchw, eps=1e-5):
    def layer(x, w, b, bn):
        gamma, beta, mean, var = bn
        y = jax.lax.conv_general_dilated(
            x, w, window_strides=(STRIDE, STRIDE), padding="VALID",
            dimension_numbers=("NCHW", "OIHW", "NCHW"),
            precision=jax.lax.Precision.HIGHEST)
        y = y + b[None, :, None, None]
        inv = gamma / jnp.sqrt(var + eps)
        y = (y - mean[None, :, None, None]) * inv[None, :, None, None] \
            + beta[None, :, None, None]
        return jnp.clip(y, 0.0, 6.0)

    x = layer(x_nchw, params["conv1_w"], params["conv1_b"], params["bn1"])
    x = layer(x, params["conv2_w"], params["conv2_b"], params["bn2"])
    x = layer(x, params["conv3_w"], params["conv3_b"], params["bn3"])
    flat = x.reshape(x.shape[0], -1)                    # PyTorch x.view(N, -1)
    return jnp.dot(flat, params["head_w"].T,
                   precision=jax.lax.Precision.HIGHEST) + params["head_b"][None, :]


if __name__ == "__main__":
    H = W = 44          # -> 20 -> 8 -> 2 spatial, linear_input = 2*2*32 = 128
    BATCH = 2
    OUTPUTS = 4

    key = jax.random.PRNGKey(0)
    k_param, k_x = jax.random.split(key)
    params = init_params(k_param, H, W, OUTPUTS)
    x = jax.random.normal(k_x, (BATCH, 3, H, W), jnp.float32)   # NCHW like PyTorch

    packed = prepare_params(params, H, W, OUTPUTS, BATCH)       # one-time packing
    y = dqn_forward(packed, x, OUTPUTS)
    y = jax.block_until_ready(y)
    assert y.shape == (BATCH, OUTPUTS)

    y_ref = dqn_reference(params, x)
    assert jnp.allclose(y, y_ref, rtol=5e-2, atol=5e-2), (
        "mismatch vs reference: max abs err "
        f"{float(jnp.max(jnp.abs(y - y_ref)))}")
    print("KERNEL_OK")
</pallas_src>

<mosaic_0001>
module attributes {stable_mosaic.version = 11 : i64} {
  func.func @_dqn_fused_kernel(%arg0: memref<88x176xf32, #tpu.memory_space<vmem>>, %arg1: memref<5x40x88xbf16, #tpu.memory_space<vmem>>, %arg2: memref<5x176x320xbf16, #tpu.memory_space<vmem>>, %arg3: memref<1x320xf32, #tpu.memory_space<vmem>>, %arg4: memref<1x320xf32, #tpu.memory_space<vmem>>, %arg5: memref<5x16x40xbf16, #tpu.memory_space<vmem>>, %arg6: memref<5x320x256xbf16, #tpu.memory_space<vmem>>, %arg7: memref<1x256xf32, #tpu.memory_space<vmem>>, %arg8: memref<1x256xf32, #tpu.memory_space<vmem>>, %arg9: memref<5x4x16xbf16, #tpu.memory_space<vmem>>, %arg10: memref<5x256x64xbf16, #tpu.memory_space<vmem>>, %arg11: memref<1x64xf32, #tpu.memory_space<vmem>>, %arg12: memref<1x64xf32, #tpu.memory_space<vmem>>, %arg13: memref<2x64x128xbf16, #tpu.memory_space<vmem>>, %arg14: memref<1x128xf32, #tpu.memory_space<vmem>>, %arg15: memref<2x128xf32, #tpu.memory_space<vmem>>) attributes {dimension_semantics = [], scalar_prefetch = 0 : i64, scratch_operands = 0 : i64, tpu.core_type = #tpu.core_type<tc>} {
    %c0 = arith.constant 0 : index
    %c0_0 = arith.constant 0 : index
    %0 = vector.load %arg0[%c0, %c0_0] : memref<88x176xf32, #tpu.memory_space<vmem>>, vector<88x176xf32>
    %1 = arith.truncf %0 : vector<88x176xf32> to vector<88x176xbf16>
    %c0_1 = arith.constant 0 : index
    %c0_2 = arith.constant 0 : index
    %c0_3 = arith.constant 0 : index
    %2 = vector.load %arg1[%c0_1, %c0_2, %c0_3] : memref<5x40x88xbf16, #tpu.memory_space<vmem>>, vector<1x40x88xbf16>
    %3 = vector.shape_cast %2 : vector<1x40x88xbf16> to vector<40x88xbf16>
    %cst = arith.constant dense<0.000000e+00> : vector<40x176xf32>
    %4 = tpu.matmul %3, %1, %cst {dimension_numbers = #tpu.dot_dimension_numbers<[1], [0], [0], [1], [0, 0, 1, 1], [], []>} : vector<40x88xbf16>, vector<88x176xbf16>, vector<40x176xf32> -> vector<40x176xf32>
    %5 = arith.truncf %4 : vector<40x176xf32> to vector<40x176xbf16>
    %c0_4 = arith.constant 0 : index
    %c0_5 = arith.constant 0 : index
    %c0_6 = arith.constant 0 : index
    %6 = vector.load %arg2[%c0_4, %c0_5, %c0_6] : memref<5x176x320xbf16, #tpu.memory_space<vmem>>, vector<1x176x320xbf16>
    %7 = vector.shape_cast %6 : vector<1x176x320xbf16> to vector<176x320xbf16>
    %cst_7 = arith.constant dense<0.000000e+00> : vector<40x320xf32>
    %8 = tpu.matmul %5, %7, %cst_7 {dimension_numbers = #tpu.dot_dimension_numbers<[1], [0], [0], [1], [0, 0, 1, 1], [], []>} : vector<40x176xbf16>, vector<176x320xbf16>, vector<40x320xf32> -> vector<40x320xf32>
    %c1 = arith.constant 1 : index
    %c0_8 = arith.constant 0 : index
    %c0_9 = arith.constant 0 : index
    %9 = vector.load %arg1[%c1, %c0_8, %c0_9] : memref<5x40x88xbf16, #tpu.memory_space<vmem>>, vector<1x40x88xbf16>
    %10 = vector.shape_cast %9 : vector<1x40x88xbf16> to vector<40x88xbf16>
    %cst_10 = arith.constant dense<0.000000e+00> : vector<40x176xf32>
    %11 = tpu.matmul %10, %1, %cst_10 {dimension_numbers = #tpu.dot_dimension_numbers<[1], [0], [0], [1], [0, 0, 1, 1], [], []>} : vector<40x88xbf16>, vector<88x176xbf16>, vector<40x176xf32> -> vector<40x176xf32>
    %12 = arith.truncf %11 : vector<40x176xf32> to vector<40x176xbf16>
    %c1_11 = arith.constant 1 : index
    %c0_12 = arith.constant 0 : index
    %c0_13 = arith.constant 0 : index
    %13 = vector.load %arg2[%c1_11, %c0_12, %c0_13] : memref<5x176x320xbf16, #tpu.memory_space<vmem>>, vector<1x176x320xbf16>
    %14 = vector.shape_cast %13 : vector<1x176x320xbf16> to vector<176x320xbf16>
    %cst_14 = arith.constant dense<0.000000e+00> : vector<40x320xf32>
    %15 = tpu.matmul %12, %14, %cst_14 {dimension_numbers = #tpu.dot_dimension_numbers<[1], [0], [0], [1], [0, 0, 1, 1], [], []>} : vector<40x176xbf16>, vector<176x320xbf16>, vector<40x320xf32> -> vector<40x320xf32>
    %16 = arith.addf %8, %15 : vector<40x320xf32>
    %c2 = arith.constant 2 : index
    %c0_15 = arith.constant 0 : index
    %c0_16 = arith.constant 0 : index
    %17 = vector.load %arg1[%c2, %c0_15, %c0_16] : memref<5x40x88xbf16, #tpu.memory_space<vmem>>, vector<1x40x88xbf16>
    %18 = vector.shape_cast %17 : vector<1x40x88xbf16> to vector<40x88xbf16>
    %cst_17 = arith.constant dense<0.000000e+00> : vector<40x176xf32>
    %19 = tpu.matmul %18, %1, %cst_17 {dimension_numbers = #tpu.dot_dimension_numbers<[1], [0], [0], [1], [0, 0, 1, 1], [], []>} : vector<40x88xbf16>, vector<88x176xbf16>, vector<40x176xf32> -> vector<40x176xf32>
    %20 = arith.truncf %19 : vector<40x176xf32> to vector<40x176xbf16>
    %c2_18 = arith.constant 2 : index
    %c0_19 = arith.constant 0 : index
    %c0_20 = arith.constant 0 : index
    %21 = vector.load %arg2[%c2_18, %c0_19, %c0_20] : memref<5x176x320xbf16, #tpu.memory_space<vmem>>, vector<1x176x320xbf16>
    %22 = vector.shape_cast %21 : vector<1x176x320xbf16> to vector<176x320xbf16>
    %cst_21 = arith.constant dense<0.000000e+00> : vector<40x320xf32>
    %23 = tpu.matmul %20, %22, %cst_21 {dimension_numbers = #tpu.dot_dimension_numbers<[1], [0], [0], [1], [0, 0, 1, 1], [], []>} : vector<40x176xbf16>, vector<176x320xbf16>, vector<40x320xf32> -> vector<40x320xf32>
    %24 = arith.addf %16, %23 : vector<40x320xf32>
    %c3 = arith.constant 3 : index
    %c0_22 = arith.constant 0 : index
    %c0_23 = arith.constant 0 : index
    %25 = vector.load %arg1[%c3, %c0_22, %c0_23] : memref<5x40x88xbf16, #tpu.memory_space<vmem>>, vector<1x40x88xbf16>
    %26 = vector.shape_cast %25 : vector<1x40x88xbf16> to vector<40x88xbf16>
    %cst_24 = arith.constant dense<0.000000e+00> : vector<40x176xf32>
    %27 = tpu.matmul %26, %1, %cst_24 {dimension_numbers = #tpu.dot_dimension_numbers<[1], [0], [0], [1], [0, 0, 1, 1], [], []>} : vector<40x88xbf16>, vector<88x176xbf16>, vector<40x176xf32> -> vector<40x176xf32>
    %28 = arith.truncf %27 : vector<40x176xf32> to vector<40x176xbf16>
    %c3_25 = arith.constant 3 : index
    %c0_26 = arith.constant 0 : index
    %c0_27 = arith.constant 0 : index
    %29 = vector.load %arg2[%c3_25, %c0_26, %c0_27] : memref<5x176x320xbf16, #tpu.memory_space<vmem>>, vector<1x176x320xbf16>
    %30 = vector.shape_cast %29 : vector<1x176x320xbf16> to vector<176x320xbf16>
    %cst_28 = arith.constant dense<0.000000e+00> : vector<40x320xf32>
    %31 = tpu.matmul %28, %30, %cst_28 {dimension_numbers = #tpu.dot_dimension_numbers<[1], [0], [0], [1], [0, 0, 1, 1], [], []>} : vector<40x176xbf16>, vector<176x320xbf16>, vector<40x320xf32> -> vector<40x320xf32>
    %32 = arith.addf %24, %31 : vector<40x320xf32>
    %c4 = arith.constant 4 : index
    %c0_29 = arith.constant 0 : index
    %c0_30 = arith.constant 0 : index
    %33 = vector.load %arg1[%c4, %c0_29, %c0_30] : memref<5x40x88xbf16, #tpu.memory_space<vmem>>, vector<1x40x88xbf16>
    %34 = vector.shape_cast %33 : vector<1x40x88xbf16> to vector<40x88xbf16>
    %cst_31 = arith.constant dense<0.000000e+00> : vector<40x176xf32>
    %35 = tpu.matmul %34, %1, %cst_31 {dimension_numbers = #tpu.dot_dimension_numbers<[1], [0], [0], [1], [0, 0, 1, 1], [], []>} : vector<40x88xbf16>, vector<88x176xbf16>, vector<40x176xf32> -> vector<40x176xf32>
    %36 = arith.truncf %35 : vector<40x176xf32> to vector<40x176xbf16>
    %c4_32 = arith.constant 4 : index
    %c0_33 = arith.constant 0 : index
    %c0_34 = arith.constant 0 : index
    %37 = vector.load %arg2[%c4_32, %c0_33, %c0_34] : memref<5x176x320xbf16, #tpu.memory_space<vmem>>, vector<1x176x320xbf16>
    %38 = vector.shape_cast %37 : vector<1x176x320xbf16> to vector<176x320xbf16>
    %cst_35 = arith.constant dense<0.000000e+00> : vector<40x320xf32>
    %39 = tpu.matmul %36, %38, %cst_35 {dimension_numbers = #tpu.dot_dimension_numbers<[1], [0], [0], [1], [0, 0, 1, 1], [], []>} : vector<40x176xbf16>, vector<176x320xbf16>, vector<40x320xf32> -> vector<40x320xf32>
    %40 = arith.addf %32, %39 : vector<40x320xf32>
    %c0_36 = arith.constant 0 : index
    %c0_37 = arith.constant 0 : index
    %41 = vector.load %arg3[%c0_36, %c0_37] : memref<1x320xf32, #tpu.memory_space<vmem>>, vector<1x320xf32>
    %42 = vector.broadcast %41 : vector<1x320xf32> to vector<40x320xf32>
    %43 = arith.mulf %40, %42 : vector<40x320xf32>
    %c0_38 = arith.constant 0 : index
    %c0_39 = arith.constant 0 : index
    %44 = vector.load %arg4[%c0_38, %c0_39] : memref<1x320xf32, #tpu.memory_space<vmem>>, vector<1x320xf32>
    %45 = vector.broadcast %44 : vector<1x320xf32> to vector<40x320xf32>
    %46 = arith.addf %43, %45 : vector<40x320xf32>
    %cst_40 = arith.constant 0.000000e+00 : f32
    %47 = vector.broadcast %cst_40 : f32 to vector<40x320xf32>
    %48 = arith.maximumf %46, %47 : vector<40x320xf32>
    %cst_41 = arith.constant 6.000000e+00 : f32
    %49 = vector.broadcast %cst_41 : f32 to vector<40x320xf32>
    %50 = arith.minimumf %48, %49 : vector<40x320xf32>
    %51 = arith.truncf %50 : vector<40x320xf32> to vector<40x320xbf16>
    %c0_42 = arith.constant 0 : index
    %c0_43 = arith.constant 0 : index
    %c0_44 = arith.constant 0 : index
    %52 = vector.load %arg5[%c0_42, %c0_43, %c0_44] : memref<5x16x40xbf16, #tpu.memory_space<vmem>>, vector<1x16x40xbf16>
    %53 = vector.shape_cast %52 : vector<1x16x40xbf16> to vector<16x40xbf16>
    %cst_45 = arith.constant dense<0.000000e+00> : vector<16x320xf32>
    %54 = tpu.matmul %53, %51, %cst_45 {dimension_numbers = #tpu.dot_dimension_numbers<[1], [0], [0], [1], [0, 0, 1, 1], [], []>} : vector<16x40xbf16>, vector<40x320xbf16>, vector<16x320xf32> -> vector<16x320xf32>
    %55 = arith.truncf %54 : vector<16x320xf32> to vector<16x320xbf16>
    %c0_46 = arith.constant 0 : index
    %c0_47 = arith.constant 0 : index
    %c0_48 = arith.constant 0 : index
    %56 = vector.load %arg6[%c0_46, %c0_47, %c0_48] : memref<5x320x256xbf16, #tpu.memory_space<vmem>>, vector<1x320x256xbf16>
    %57 = vector.shape_cast %56 : vector<1x320x256xbf16> to vector<320x256xbf16>
    %cst_49 = arith.constant dense<0.000000e+00> : vector<16x256xf32>
    %58 = tpu.matmul %55, %57, %cst_49 {dimension_numbers = #tpu.dot_dimension_numbers<[1], [0], [0], [1], [0, 0, 1, 1], [], []>} : vector<16x320xbf16>, vector<320x256xbf16>, vector<16x256xf32> -> vector<16x256xf32>
    %c1_50 = arith.constant 1 : index
    %c0_51 = arith.constant 0 : index
    %c0_52 = arith.constant 0 : index
    %59 = vector.load %arg5[%c1_50, %c0_51, %c0_52] : memref<5x16x40xbf16, #tpu.memory_space<vmem>>, vector<1x16x40xbf16>
    %60 = vector.shape_cast %59 : vector<1x16x40xbf16> to vector<16x40xbf16>
    %cst_53 = arith.constant dense<0.000000e+00> : vector<16x320xf32>
    %61 = tpu.matmul %60, %51, %cst_53 {dimension_numbers = #tpu.dot_dimension_numbers<[1], [0], [0], [1], [0, 0, 1, 1], [], []>} : vector<16x40xbf16>, vector<40x320xbf16>, vector<16x320xf32> -> vector<16x320xf32>
    %62 = arith.truncf %61 : vector<16x320xf32> to vector<16x320xbf16>
    %c1_54 = arith.constant 1 : index
    %c0_55 = arith.constant 0 : index
    %c0_56 = arith.constant 0 : index
    %63 = vector.load %arg6[%c1_54, %c0_55, %c0_56] : memref<5x320x256xbf16, #tpu.memory_space<vmem>>, vector<1x320x256xbf16>
    %64 = vector.shape_cast %63 : vector<1x320x256xbf16> to vector<320x256xbf16>
    %cst_57 = arith.constant dense<0.000000e+00> : vector<16x256xf32>
    %65 = tpu.matmul %62, %64, %cst_57 {dimension_numbers = #tpu.dot_dimension_numbers<[1], [0], [0], [1], [0, 0, 1, 1], [], []>} : vector<16x320xbf16>, vector<320x256xbf16>, vector<16x256xf32> -> vector<16x256xf32>
    %66 = arith.addf %58, %65 : vector<16x256xf32>
    %c2_58 = arith.constant 2 : index
    %c0_59 = arith.constant 0 : index
    %c0_60 = arith.constant 0 : index
    %67 = vector.load %arg5[%c2_58, %c0_59, %c0_60] : memref<5x16x40xbf16, #tpu.memory_space<vmem>>, vector<1x16x40xbf16>
    %68 = vector.shape_cast %67 : vector<1x16x40xbf16> to vector<16x40xbf16>
    %cst_61 = arith.constant dense<0.000000e+00> : vector<16x320xf32>
    %69 = tpu.matmul %68, %51, %cst_61 {dimension_numbers = #tpu.dot_dimension_numbers<[1], [0], [0], [1], [0, 0, 1, 1], [], []>} : vector<16x40xbf16>, vector<40x320xbf16>, vector<16x320xf32> -> vector<16x320xf32>
    %70 = arith.truncf %69 : vector<16x320xf32> to vector<16x320xbf16>
    %c2_62 = arith.constant 2 : index
    %c0_63 = arith.constant 0 : index
    %c0_64 = arith.constant 0 : index
    %71 = vector.load %arg6[%c2_62, %c0_63, %c0_64] : memref<5x320x256xbf16, #tpu.memory_space<vmem>>, vector<1x320x256xbf16>
    %72 = vector.shape_cast %71 : vector<1x320x256xbf16> to vector<320x256xbf16>
    %cst_65 = arith.constant dense<0.000000e+00> : vector<16x256xf32>
    %73 = tpu.matmul %70, %72, %cst_65 {dimension_numbers = #tpu.dot_dimension_numbers<[1], [0], [0], [1], [0, 0, 1, 1], [], []>} : vector<16x320xbf16>, vector<320x256xbf16>, vector<16x256xf32> -> vector<16x256xf32>
    %74 = arith.addf %66, %73 : vector<16x256xf32>
    %c3_66 = arith.constant 3 : index
    %c0_67 = arith.constant 0 : index
    %c0_68 = arith.constant 0 : index
    %75 = vector.load %arg5[%c3_66, %c0_67, %c0_68] : memref<5x16x40xbf16, #tpu.memory_space<vmem>>, vector<1x16x40xbf16>
    %76 = vector.shape_cast %75 : vector<1x16x40xbf16> to vector<16x40xbf16>
    %cst_69 = arith.constant dense<0.000000e+00> : vector<16x320xf32>
    %77 = tpu.matmul %76, %51, %cst_69 {dimension_numbers = #tpu.dot_dimension_numbers<[1], [0], [0], [1], [0, 0, 1, 1], [], []>} : vector<16x40xbf16>, vector<40x320xbf16>, vector<16x320xf32> -> vector<16x320xf32>
    %78 = arith.truncf %77 : vector<16x320xf32> to vector<16x320xbf16>
    %c3_70 = arith.constant 3 : index
    %c0_71 = arith.constant 0 : index
    %c0_72 = arith.constant 0 : index
    %79 = vector.load %arg6[%c3_70, %c0_71, %c0_72] : memref<5x320x256xbf16, #tpu.memory_space<vmem>>, vector<1x320x256xbf16>
    %80 = vector.shape_cast %79 : vector<1x320x256xbf16> to vector<320x256xbf16>
    %cst_73 = arith.constant dense<0.000000e+00> : vector<16x256xf32>
    %81 = tpu.matmul %78, %80, %cst_73 {dimension_numbers = #tpu.dot_dimension_numbers<[1], [0], [0], [1], [0, 0, 1, 1], [], []>} : vector<16x320xbf16>, vector<320x256xbf16>, vector<16x256xf32> -> vector<16x256xf32>
    %82 = arith.addf %74, %81 : vector<16x256xf32>
    %c4_74 = arith.constant 4 : index
    %c0_75 = arith.constant 0 : index
    %c0_76 = arith.constant 0 : index
    %83 = vector.load %arg5[%c4_74, %c0_75, %c0_76] : memref<5x16x40xbf16, #tpu.memory_space<vmem>>, vector<1x16x40xbf16>
    %84 = vector.shape_cast %83 : vector<1x16x40xbf16> to vector<16x40xbf16>
    %cst_77 = arith.constant dense<0.000000e+00> : vector<16x320xf32>
    %85 = tpu.matmul %84, %51, %cst_77 {dimension_numbers = #tpu.dot_dimension_numbers<[1], [0], [0], [1], [0, 0, 1, 1], [], []>} : vector<16x40xbf16>, vector<40x320xbf16>, vector<16x320xf32> -> vector<16x320xf32>
    %86 = arith.truncf %85 : vector<16x320xf32> to vector<16x320xbf16>
    %c4_78 = arith.constant 4 : index
    %c0_79 = arith.constant 0 : index
    %c0_80 = arith.constant 0 : index
    %87 = vector.load %arg6[%c4_78, %c0_79, %c0_80] : memref<5x320x256xbf16, #tpu.memory_space<vmem>>, vector<1x320x256xbf16>
    %88 = vector.shape_cast %87 : vector<1x320x256xbf16> to vector<320x256xbf16>
    %cst_81 = arith.constant dense<0.000000e+00> : vector<16x256xf32>
    %89 = tpu.matmul %86, %88, %cst_81 {dimension_numbers = #tpu.dot_dimension_numbers<[1], [0], [0], [1], [0, 0, 1, 1], [], []>} : vector<16x320xbf16>, vector<320x256xbf16>, vector<16x256xf32> -> vector<16x256xf32>
    %90 = arith.addf %82, %89 : vector<16x256xf32>
    %c0_82 = arith.constant 0 : index
    %c0_83 = arith.constant 0 : index
    %91 = vector.load %arg7[%c0_82, %c0_83] : memref<1x256xf32, #tpu.memory_space<vmem>>, vector<1x256xf32>
    %92 = vector.broadcast %91 : vector<1x256xf32> to vector<16x256xf32>
    %93 = arith.mulf %90, %92 : vector<16x256xf32>
    %c0_84 = arith.constant 0 : index
    %c0_85 = arith.constant 0 : index
    %94 = vector.load %arg8[%c0_84, %c0_85] : memref<1x256xf32, #tpu.memory_space<vmem>>, vector<1x256xf32>
    %95 = vector.broadcast %94 : vector<1x256xf32> to vector<16x256xf32>
    %96 = arith.addf %93, %95 : vector<16x256xf32>
    %cst_86 = arith.constant 0.000000e+00 : f32
    %97 = vector.broadcast %cst_86 : f32 to vector<16x256xf32>
    %98 = arith.maximumf %96, %97 : vector<16x256xf32>
    %cst_87 = arith.constant 6.000000e+00 : f32
    %99 = vector.broadcast %cst_87 : f32 to vector<16x256xf32>
    %100 = arith.minimumf %98, %99 : vector<16x256xf32>
    %101 = arith.truncf %100 : vector<16x256xf32> to vector<16x256xbf16>
    %c0_88 = arith.constant 0 : index
    %c0_89 = arith.constant 0 : index
    %c0_90 = arith.constant 0 : index
    %102 = vector.load %arg9[%c0_88, %c0_89, %c0_90] : memref<5x4x16xbf16, #tpu.memory_space<vmem>>, vector<1x4x16xbf16>
    %103 = vector.shape_cast %102 : vector<1x4x16xbf16> to vector<4x16xbf16>
    %cst_91 = arith.constant dense<0.000000e+00> : vector<4x256xf32>
    %104 = tpu.matmul %103, %101, %cst_91 {dimension_numbers = #tpu.dot_dimension_numbers<[1], [0], [0], [1], [0, 0, 1, 1], [], []>} : vector<4x16xbf16>, vector<16x256xbf16>, vector<4x256xf32> -> vector<4x256xf32>
    %105 = arith.truncf %104 : vector<4x256xf32> to vector<4x256xbf16>
    %c0_92 = arith.constant 0 : index
    %c0_93 = arith.constant 0 : index
    %c0_94 = arith.constant 0 : index
    %106 = vector.load %arg10[%c0_92, %c0_93, %c0_94] : memref<5x256x64xbf16, #tpu.memory_space<vmem>>, vector<1x256x64xbf16>
    %107 = vector.shape_cast %106 : vector<1x256x64xbf16> to vector<256x64xbf16>
    %cst_95 = arith.constant dense<0.000000e+00> : vector<4x64xf32>
    %108 = tpu.matmul %105, %107, %cst_95 {dimension_numbers = #tpu.dot_dimension_numbers<[1], [0], [0], [1], [0, 0, 1, 1], [], []>} : vector<4x256xbf16>, vector<256x64xbf16>, vector<4x64xf32> -> vector<4x64xf32>
    %c1_96 = arith.constant 1 : index
    %c0_97 = arith.constant 0 : index
    %c0_98 = arith.constant 0 : index
    %109 = vector.load %arg9[%c1_96, %c0_97, %c0_98] : memref<5x4x16xbf16, #tpu.memory_space<vmem>>, vector<1x4x16xbf16>
    %110 = vector.shape_cast %109 : vector<1x4x16xbf16> to vector<4x16xbf16>
    %cst_99 = arith.constant dense<0.000000e+00> : vector<4x256xf32>
    %111 = tpu.matmul %110, %101, %cst_99 {dimension_numbers = #tpu.dot_dimension_numbers<[1], [0], [0], [1], [0, 0, 1, 1], [], []>} : vector<4x16xbf16>, vector<16x256xbf16>, vector<4x256xf32> -> vector<4x256xf32>
    %112 = arith.truncf %111 : vector<4x256xf32> to vector<4x256xbf16>
    %c1_100 = arith.constant 1 : index
    %c0_101 = arith.constant 0 : index
    %c0_102 = arith.constant 0 : index
    %113 = vector.load %arg10[%c1_100, %c0_101, %c0_102] : memref<5x256x64xbf16, #tpu.memory_space<vmem>>, vector<1x256x64xbf16>
    %114 = vector.shape_cast %113 : vector<1x256x64xbf16> to vector<256x64xbf16>
    %cst_103 = arith.constant dense<0.000000e+00> : vector<4x64xf32>
    %115 = tpu.matmul %112, %114, %cst_103 {dimension_numbers = #tpu.dot_dimension_numbers<[1], [0], [0], [1], [0, 0, 1, 1], [], []>} : vector<4x256xbf16>, vector<256x64xbf16>, vector<4x64xf32> -> vector<4x64xf32>
    %116 = arith.addf %108, %115 : vector<4x64xf32>
    %c2_104 = arith.constant 2 : index
    %c0_105 = arith.constant 0 : index
    %c0_106 = arith.constant 0 : index
    %117 = vector.load %arg9[%c2_104, %c0_105, %c0_106] : memref<5x4x16xbf16, #tpu.memory_space<vmem>>, vector<1x4x16xbf16>
    %118 = vector.shape_cast %117 : vector<1x4x16xbf16> to vector<4x16xbf16>
    %cst_107 = arith.constant dense<0.000000e+00> : vector<4x256xf32>
    %119 = tpu.matmul %118, %101, %cst_107 {dimension_numbers = #tpu.dot_dimension_numbers<[1], [0], [0], [1], [0, 0, 1, 1], [], []>} : vector<4x16xbf16>, vector<16x256xbf16>, vector<4x256xf32> -> vector<4x256xf32>
    %120 = arith.truncf %119 : vector<4x256xf32> to vector<4x256xbf16>
    %c2_108 = arith.constant 2 : index
    %c0_109 = arith.constant 0 : index
    %c0_110 = arith.constant 0 : index
    %121 = vector.load %arg10[%c2_108, %c0_109, %c0_110] : memref<5x256x64xbf16, #tpu.memory_space<vmem>>, vector<1x256x64xbf16>
    %122 = vector.shape_cast %121 : vector<1x256x64xbf16> to vector<256x64xbf16>
    %cst_111 = arith.constant dense<0.000000e+00> : vector<4x64xf32>
    %123 = tpu.matmul %120, %122, %cst_111 {dimension_numbers = #tpu.dot_dimension_numbers<[1], [0], [0], [1], [0, 0, 1, 1], [], []>} : vector<4x256xbf16>, vector<256x64xbf16>, vector<4x64xf32> -> vector<4x64xf32>
    %124 = arith.addf %116, %123 : vector<4x64xf32>
    %c3_112 = arith.constant 3 : index
    %c0_113 = arith.constant 0 : index
    %c0_114 = arith.constant 0 : index
    %125 = vector.load %arg9[%c3_112, %c0_113, %c0_114] : memref<5x4x16xbf16, #tpu.memory_space<vmem>>, vector<1x4x16xbf16>
    %126 = vector.shape_cast %125 : vector<1x4x16xbf16> to vector<4x16xbf16>
    %cst_115 = arith.constant dense<0.000000e+00> : vector<4x256xf32>
    %127 = tpu.matmul %126, %101, %cst_115 {dimension_numbers = #tpu.dot_dimension_numbers<[1], [0], [0], [1], [0, 0, 1, 1], [], []>} : vector<4x16xbf16>, vector<16x256xbf16>, vector<4x256xf32> -> vector<4x256xf32>
    %128 = arith.truncf %127 : vector<4x256xf32> to vector<4x256xbf16>
    %c3_116 = arith.constant 3 : index
    %c0_117 = arith.constant 0 : index
    %c0_118 = arith.constant 0 : index
    %129 = vector.load %arg10[%c3_116, %c0_117, %c0_118] : memref<5x256x64xbf16, #tpu.memory_space<vmem>>, vector<1x256x64xbf16>
    %130 = vector.shape_cast %129 : vector<1x256x64xbf16> to vector<256x64xbf16>
    %cst_119 = arith.constant dense<0.000000e+00> : vector<4x64xf32>
    %131 = tpu.matmul %128, %130, %cst_119 {dimension_numbers = #tpu.dot_dimension_numbers<[1], [0], [0], [1], [0, 0, 1, 1], [], []>} : vector<4x256xbf16>, vector<256x64xbf16>, vector<4x64xf32> -> vector<4x64xf32>
    %132 = arith.addf %124, %131 : vector<4x64xf32>
    %c4_120 = arith.constant 4 : index
    %c0_121 = arith.constant 0 : index
    %c0_122 = arith.constant 0 : index
    %133 = vector.load %arg9[%c4_120, %c0_121, %c0_122] : memref<5x4x16xbf16, #tpu.memory_space<vmem>>, vector<1x4x16xbf16>
    %134 = vector.shape_cast %133 : vector<1x4x16xbf16> to vector<4x16xbf16>
    %cst_123 = arith.constant dense<0.000000e+00> : vector<4x256xf32>
    %135 = tpu.matmul %134, %101, %cst_123 {dimension_numbers = #tpu.dot_dimension_numbers<[1], [0], [0], [1], [0, 0, 1, 1], [], []>} : vector<4x16xbf16>, vector<16x256xbf16>, vector<4x256xf32> -> vector<4x256xf32>
    %136 = arith.truncf %135 : vector<4x256xf32> to vector<4x256xbf16>
    %c4_124 = arith.constant 4 : index
    %c0_125 = arith.constant 0 : index
    %c0_126 = arith.constant 0 : index
    %137 = vector.load %arg10[%c4_124, %c0_125, %c0_126] : memref<5x256x64xbf16, #tpu.memory_space<vmem>>, vector<1x256x64xbf16>
    %138 = vector.shape_cast %137 : vector<1x256x64xbf16> to vector<256x64xbf16>
    %cst_127 = arith.constant dense<0.000000e+00> : vector<4x64xf32>
    %139 = tpu.matmul %136, %138, %cst_127 {dimension_numbers = #tpu.dot_dimension_numbers<[1], [0], [0], [1], [0, 0, 1, 1], [], []>} : vector<4x256xbf16>, vector<256x64xbf16>, vector<4x64xf32> -> vector<4x64xf32>
    %140 = arith.addf %132, %139 : vector<4x64xf32>
    %c0_128 = arith.constant 0 : index
    %c0_129 = arith.constant 0 : index
    %141 = vector.load %arg11[%c0_128, %c0_129] : memref<1x64xf32, #tpu.memory_space<vmem>>, vector<1x64xf32>
    %142 = vector.broadcast %141 : vector<1x64xf32> to vector<4x64xf32>
    %143 = arith.mulf %140, %142 : vector<4x64xf32>
    %c0_130 = arith.constant 0 : index
    %c0_131 = arith.constant 0 : index
    %144 = vector.load %arg12[%c0_130, %c0_131] : memref<1x64xf32, #tpu.memory_space<vmem>>, vector<1x64xf32>
    %145 = vector.broadcast %144 : vector<1x64xf32> to vector<4x64xf32>
    %146 = arith.addf %143, %145 : vector<4x64xf32>
    %cst_132 = arith.constant 0.000000e+00 : f32
    %147 = vector.broadcast %cst_132 : f32 to vector<4x64xf32>
    %148 = arith.maximumf %146, %147 : vector<4x64xf32>
    %cst_133 = arith.constant 6.000000e+00 : f32
    %149 = vector.broadcast %cst_133 : f32 to vector<4x64xf32>
    %150 = arith.minimumf %148, %149 : vector<4x64xf32>
    %151 = vector.extract_strided_slice %150 {offsets = [0, 0], sizes = [2, 64], strides = [1, 1]} : vector<4x64xf32> to vector<2x64xf32>
    %152 = arith.truncf %151 : vector<2x64xf32> to vector<2x64xbf16>
    %c0_134 = arith.constant 0 : index
    %c0_135 = arith.constant 0 : index
    %c0_136 = arith.constant 0 : index
    %153 = vector.load %arg13[%c0_134, %c0_135, %c0_136] : memref<2x64x128xbf16, #tpu.memory_space<vmem>>, vector<1x64x128xbf16>
    %154 = vector.shape_cast %153 : vector<1x64x128xbf16> to vector<64x128xbf16>
    %cst_137 = arith.constant dense<0.000000e+00> : vector<2x128xf32>
    %155 = tpu.matmul %152, %154, %cst_137 {dimension_numbers = #tpu.dot_dimension_numbers<[1], [0], [0], [1], [0, 0, 1, 1], [], []>} : vector<2x64xbf16>, vector<64x128xbf16>, vector<2x128xf32> -> vector<2x128xf32>
    %156 = vector.extract_strided_slice %150 {offsets = [2, 0], sizes = [2, 64], strides = [1, 1]} : vector<4x64xf32> to vector<2x64xf32>
    %157 = arith.truncf %156 : vector<2x64xf32> to vector<2x64xbf16>
    %c1_138 = arith.constant 1 : index
    %c0_139 = arith.constant 0 : index
    %c0_140 = arith.constant 0 : index
    %158 = vector.load %arg13[%c1_138, %c0_139, %c0_140] : memref<2x64x128xbf16, #tpu.memory_space<vmem>>, vector<1x64x128xbf16>
    %159 = vector.shape_cast %158 : vector<1x64x128xbf16> to vector<64x128xbf16>
    %cst_141 = arith.constant dense<0.000000e+00> : vector<2x128xf32>
    %160 = tpu.matmul %157, %159, %cst_141 {dimension_numbers = #tpu.dot_dimension_numbers<[1], [0], [0], [1], [0, 0, 1, 1], [], []>} : vector<2x64xbf16>, vector<64x128xbf16>, vector<2x128xf32> -> vector<2x128xf32>
    %161 = arith.addf %155, %160 : vector<2x128xf32>
    %c0_142 = arith.constant 0 : index
    %c0_143 = arith.constant 0 : index
    %162 = vector.load %arg14[%c0_142, %c0_143] : memref<1x128xf32, #tpu.memory_space<vmem>>, vector<1x128xf32>
    %163 = vector.broadcast %162 : vector<1x128xf32> to vector<2x128xf32>
    %164 = arith.addf %161, %163 : vector<2x128xf32>
    %c0_144 = arith.constant 0 : index
    %c0_145 = arith.constant 0 : index
    %165 = vector.load %arg15[%c0_144, %c0_145] : memref<2x128xf32, #tpu.memory_space<vmem>>, vector<2x128xf32>
    tpu.vector_store %arg15[%c0_144, %c0_145], %164 {strides = array<i32>} : memref<2x128xf32, #tpu.memory_space<vmem>>, vector<2x128xf32>,
    return
  }
}

</mosaic_0001>

<bundles_post_ra>
// kernel: dqn_forward.1
= control target key start
LH: loop header
LB: loop body
LE: loop exit
PB: predicated region body
PF: predicated region fallthrough
CT: control target
= control target key end

     0   :  { %20 = vsyncpa [#allocation3], 0  ;;  %s10585_s0 = inlined_call_operand.vmem [shape: f32[88,176], index: 0, kind: input, shape index: {}]   ;;  %s10586_s1 = inlined_call_operand.vmem [shape: bf16[5,40,88], index: 1, kind: input, shape index: {}]   ;;  %s10587_s2 = inlined_call_operand.vmem [shape: bf16[5,176,320], index: 2, kind: input, shape index: {}]   ;;  %s10588_s3 = inlined_call_operand.hbm [shape: f32[1,320], index: 3, kind: input, shape index: {}]   ;;  %s10589_s4 = inlined_call_operand.hbm [shape: f32[1,320], index: 4, kind: input, shape index: {}]   ;;  %s10590_s5 = inlined_call_operand.hbm [shape: bf16[5,16,40], index: 5, kind: input, shape index: {}]   ;;  %s10591_s6 = inlined_call_operand.vmem [shape: bf16[5,320,256], index: 6, kind: input, shape index: {}]   ;;  %s10592_s7 = inlined_call_operand.hbm [shape: f32[1,256], index: 7, kind: input, shape index: {}]   ;;  %s10593_s8 = inlined_call_operand.hbm [shape: f32[1,256], index: 8, kind: input, shape index: {}]   ;;  %s10594_s9 = inlined_call_operand.vmem [shape: bf16[5,4,16], index: 9, kind: input, shape index: {}]   ;;  %s10595_s10 = inlined_call_operand.vmem [shape: bf16[5,256,64], index: 10, kind: input, shape index: {}]   ;;  %s10596_s11 = inlined_call_operand.hbm [shape: f32[1,64], index: 11, kind: input, shape index: {}]   ;;  %s10597_s12 = inlined_call_operand.hbm [shape: f32[1,64], index: 12, kind: input, shape index: {}]   ;;  %s10598_s13 = inlined_call_operand.hbm [shape: bf16[2,64,128], index: 13, kind: input, shape index: {}]   ;;  %s10599_s14 = inlined_call_operand.hbm [shape: f32[1,128], index: 14, kind: input, shape index: {}]   ;;  %s10600_s15 = inlined_call_operand.hbm [shape: f32[2,128], index: 15, kind: output, shape index: {}]  }
   0x1   :  { %21 = vsyncpa [#allocation6], 0 }
   0x2   :  { %22 = vsyncpa [#allocation9], 0 }
   0x3   :  { %23 = vsyncpa [#allocation12], 0 }
   0x4   :  { %24 = vsyncpa [#allocation15], 0 }
   0x5   :  { %25 = vsyncpa [#allocation4], 0  ;;  %s8309_s18 = smov [#allocation5]   ;;  %s8310_s20 = smov [#allocation8]  }
   0x6   :  { %s48_s19 = sshll.u32 %s8309_s18, 4  ;;  %s72_s21 = sshll.u32 %s8310_s20, 4  ;;  %s49_s19 = int_to_ptr.vmem [resolvable:$true] %s48_s19  ;;  %s73_s21 = int_to_ptr.vmem [resolvable:$true] %s72_s21 }
   0x7   :  { %s8077_s24 = scalar_lea.hbm %s10589_s4, 48 }
   0x8   :  { %p8078_p0 = scmp.ne.s32.totalorder %s10589_s4, %s8077_s24  ;;  %p8081_p1 = scmp.lt.u32.totalorder %s8077_s24, %s10589_s4 }
   0xa   :  { %p8083_p2 = pnand %p8081_p1, %p8078_p0 }
   0xc   :  { %8086 = shalt.err (!%p8083_p2)
}
   0xd   :  { %s8087_s29 = scalar_lea.vmem %s49_s19, 48  ;;  %s8091_s30 = scalar_lea.vmem %s49_s19, 64 }
   0xe   :  { %p8088_p3 = scmp.ne.s32.totalorder %s49_s19, %s8087_s29  ;;  %p8092_p4 = scmp.lt.s32.totalorder %s49_s19, %s49_s19 }
   0xf   :  { %p8093_p5 = scmp.lt.s32.totalorder %s8091_s30, %s8087_s29 }
  0x11   :  { %p8094_p6 = por %p8093_p5, %p8092_p4 }
  0x13   :  { %p8095_p7 = pnand %p8094_p6, %p8088_p3 }
  0x15   :  { %8098 = shalt.err (!%p8095_p7)
}
  0x16   :  { %51 = dma.hbm_to_vmem [thread:$0]  %s10589_s4, 48, %s49_s19, [#allocation6]  }
  0x17   :  { %s8099_s22 = scalar_lea.hbm %s10592_s7, 32 }
  0x18   :  { %p8100_p8 = scmp.ne.s32.totalorder %s10592_s7, %s8099_s22  ;;  %p8103_p9 = scmp.lt.u32.totalorder %s8099_s22, %s10592_s7 }
  0x1a   :  { %p8105_p10 = pnand %p8103_p9, %p8100_p8 }
  0x1c   :  { %8108 = shalt.err (!%p8105_p10)
}
  0x1d   :  { %s8109_s27 = scalar_lea.vmem %s73_s21, 32  ;;  %p8114_p12 = scmp.lt.s32.totalorder %s73_s21, %s73_s21 }
  0x1e   :  { %p8110_p11 = scmp.ne.s32.totalorder %s73_s21, %s8109_s27  ;;  %p8115_p13 = scmp.lt.s32.totalorder %s8109_s27, %s8109_s27 }
  0x20   :  { %p8116_p0 = por %p8115_p13, %p8114_p12 }
  0x22   :  { %p8117_p1 = pnand %p8116_p0, %p8110_p11 }
  0x24   :  { %8120 = shalt.err (!%p8117_p1)
}
  0x25   :  { %75 = dma.hbm_to_vmem [thread:$0]  %s10592_s7, 32, %s73_s21, [#allocation9]  }
  0x26   :  { %s8311_s28 = smov [#allocation11]   ;;  %s8121_s17 = scalar_lea.hbm %s10596_s11, 16 }
  0x27   :  { %s96_s29 = sshll.u32 %s8311_s28, 4  ;;  %p8122_p2 = scmp.ne.s32.totalorder %s10596_s11, %s8121_s17  ;;  %s97_s29 = int_to_ptr.vmem [resolvable:$true] %s96_s29 }
  0x28   :  { %p8125_p3 = scmp.lt.u32.totalorder %s8121_s17, %s10596_s11 }
  0x2a   :  { %p8127_p4 = pnand %p8125_p3, %p8122_p2 }
  0x2c   :  { %8130 = shalt.err (!%p8127_p4)
}
  0x2d   :  { %s8131_s24 = scalar_lea.vmem %s97_s29, 16  ;;  %s8135_s7 = scalar_lea.vmem %s97_s29, 32 }
  0x2e   :  { %p8132_p5 = scmp.ne.s32.totalorder %s97_s29, %s8131_s24  ;;  %p8136_p6 = scmp.lt.s32.totalorder %s97_s29, %s97_s29 }
  0x2f   :  { %p8137_p7 = scmp.lt.s32.totalorder %s8135_s7, %s8131_s24 }
  0x31   :  { %p8138_p8 = por %p8137_p7, %p8136_p6 }
  0x33   :  { %p8139_p9 = pnand %p8138_p8, %p8132_p5 }
  0x35   :  { %8142 = shalt.err (!%p8139_p9)
}
  0x36   :  { %99 = dma.hbm_to_vmem [thread:$0]  %s10596_s11, 16, %s97_s29, [#allocation12]  }
  0x37   :  { %s8312_s26 = smov [#allocation14]   ;;  %s8313_s4 = smov [#allocation2]  }
  0x38   :  { %s115_s27 = sshll.u32 %s8312_s26, 4  ;;  %s38_s19 = sshll.u32 %s8313_s4, 4  ;;  %s116_s27 = int_to_ptr.vmem [resolvable:$true] %s115_s27  ;;  %s39_s19 = int_to_ptr.vmem [resolvable:$true] %s38_s19 }
  0x39   :  { %s8143_s16 = scalar_lea.hbm %s10598_s13, 1024 }
  0x3a   :  { %p8144_p10 = scmp.ne.s32.totalorder %s10598_s13, %s8143_s16  ;;  %p8147_p11 = scmp.lt.u32.totalorder %s8143_s16, %s10598_s13 }
  0x3c   :  { %p8149_p12 = pnand %p8147_p11, %p8144_p10 }
  0x3e   :  { %8152 = shalt.err (!%p8149_p12)
}
  0x3f   :  { %s8153_s11 = scalar_lea.vmem %s116_s27, 1024  ;;  %p8158_p0 = scmp.lt.s32.totalorder %s116_s27, %s116_s27 }
  0x40   :  { %p8154_p13 = scmp.ne.s32.totalorder %s116_s27, %s8153_s11  ;;  %p8159_p1 = scmp.lt.s32.totalorder %s8153_s11, %s8153_s11 }
  0x42   :  { %p8160_p2 = por %p8159_p1, %p8158_p0 }
  0x44   :  { %p8161_p3 = pnand %p8160_p2, %p8154_p13 }
  0x46   :  { %8164 = shalt.err (!%p8161_p3)
}
  0x47   :  { %s8314_s29 = smov 64   ;;  %s8315_s23 = smov 4  }
  0x48   :  { %121 = dma.hbm_to_vmem [thread:$0]  %s10598_s13, 1024, %s116_s27, [#allocation15], %s8314_s29, %s8314_s29, %s8315_s23  }
  0x49   :  { %s8165_s26 = scalar_lea.hbm %s10588_s3, 48 }
  0x4a   :  { %p8166_p4 = scmp.ne.s32.totalorder %s10588_s3, %s8165_s26  ;;  %p8169_p5 = scmp.lt.u32.totalorder %s8165_s26, %s10588_s3 }
  0x4c   :  { %p8171_p6 = pnand %p8169_p5, %p8166_p4 }
  0x4e   :  { %8174 = shalt.err (!%p8171_p6)
}
  0x4f   :  { %s8175_s17 = scalar_lea.vmem %s39_s19, 48  ;;  %s8179_s18 = scalar_lea.vmem %s39_s19, 64 }
  0x50   :  { %p8176_p7 = scmp.ne.s32.totalorder %s39_s19, %s8175_s17  ;;  %p8180_p8 = scmp.lt.s32.totalorder %s39_s19, %s39_s19 }
  0x51   :  { %p8181_p9 = scmp.lt.s32.totalorder %s8179_s18, %s8175_s17 }
  0x53   :  { %p8182_p10 = por %p8181_p9, %p8180_p8 }
  0x55   :  { %p8183_p11 = pnand %p8182_p10, %p8176_p7 }
  0x57   :  { %8186 = shalt.err (!%p8183_p11)
}
  0x58   :  { %41 = dma.hbm_to_vmem [thread:$0]  %s10588_s3, 48, %s39_s19, [#allocation3]  }
  0x59   :  { %s8316_s20 = smov [#allocation7]   ;;  %s8317_s11 = smov [#allocation10]  }
  0x5a   :  { %s57_s22 = sshll.u32 %s8316_s20, 4  ;;  %s82_s24 = sshll.u32 %s8317_s11, 4  ;;  %s58_s22 = int_to_ptr.vmem [resolvable:$true] %s57_s22  ;;  %s83_s24 = int_to_ptr.vmem [resolvable:$true] %s82_s24 }
  0x5b   :  { %s8187_s25 = scalar_lea.hbm %s10590_s5, 640 }
  0x5c   :  { %p8188_p12 = scmp.ne.s32.totalorder %s10590_s5, %s8187_s25  ;;  %p8191_p13 = scmp.lt.u32.totalorder %s8187_s25, %s10590_s5 }
  0x5e   :  { %p8193_p0 = pnand %p8191_p13, %p8188_p12 }
  0x60   :  { %8196 = shalt.err (!%p8193_p0)
}
  0x61   :  { %s8197_s3 = scalar_lea.vmem %s58_s22, 640  ;;  %p8202_p2 = scmp.lt.s32.totalorder %s58_s22, %s58_s22 }
  0x62   :  { %p8198_p1 = scmp.ne.s32.totalorder %s58_s22, %s8197_s3  ;;  %p8203_p3 = scmp.lt.s32.totalorder %s8197_s3, %s8197_s3 }
  0x64   :  { %p8204_p4 = por %p8203_p3, %p8202_p2 }
  0x66   :  { %p8205_p5 = pnand %p8204_p4, %p8198_p1 }
  0x68   :  { %8208 = shalt.err (!%p8205_p5)
}
  0x69   :  { %63 = dma.hbm_to_vmem [thread:$0]  %s10590_s5, 640, %s58_s22, [#allocation6], %s8314_s29, %s8314_s29, %s8315_s23  }
  0x6a   :  { %s8209_s13 = scalar_lea.hbm %s10593_s8, 32 }
  0x6b   :  { %p8210_p6 = scmp.ne.s32.totalorder %s10593_s8, %s8209_s13  ;;  %p8213_p7 = scmp.lt.u32.totalorder %s8209_s13, %s10593_s8 }
  0x6d   :  { %p8215_p8 = pnand %p8213_p7, %p8210_p6 }
  0x6f   :  { %8218 = shalt.err (!%p8215_p8)
}
  0x70   :  { %s8219_s21 = scalar_lea.vmem %s83_s24, 32  ;;  %p8224_p10 = scmp.lt.s32.totalorder %s83_s24, %s83_s24 }
  0x71   :  { %p8220_p9 = scmp.ne.s32.totalorder %s83_s24, %s8219_s21  ;;  %p8225_p11 = scmp.lt.s32.totalorder %s8219_s21, %s8219_s21 }
  0x73   :  { %p8226_p12 = por %p8225_p11, %p8224_p10 }
  0x75   :  { %p8227_p13 = pnand %p8226_p12, %p8220_p9 }
  0x77   :  { %8230 = shalt.err (!%p8227_p13)
}
  0x78   :  { %85 = dma.hbm_to_vmem [thread:$0]  %s10593_s8, 32, %s83_s24, [#allocation9]  }
  0x79   :  { %s8318_s23 = smov [#allocation13]   ;;  %s8319_s25 = smov [#allocation16]  }
  0x7a   :  { %s106_s22 = sshll.u32 %s8318_s23, 4  ;;  %s128_s26 = sshll.u32 %s8319_s25, 4  ;;  %s107_s22 = int_to_ptr.vmem [resolvable:$true] %s106_s22  ;;  %s129_s26 = int_to_ptr.vmem [resolvable:$true] %s128_s26 }
  0x7b   :  { %s8231_s30 = scalar_lea.hbm %s10597_s12, 16 }
  0x7c   :  { %p8232_p0 = scmp.ne.s32.totalorder %s10597_s12, %s8231_s30  ;;  %p8235_p1 = scmp.lt.u32.totalorder %s8231_s30, %s10597_s12 }
  0x7e   :  { %p8237_p2 = pnand %p8235_p1, %p8232_p0 }
  0x80   :  { %8240 = shalt.err (!%p8237_p2)
}
  0x81   :  { %s8241_s8 = scalar_lea.vmem %s107_s22, 16  ;;  %s8245_s24 = scalar_lea.vmem %s107_s22, 32 }
  0x82   :  { %p8242_p3 = scmp.ne.s32.totalorder %s107_s22, %s8241_s8  ;;  %p8246_p4 = scmp.lt.s32.totalorder %s107_s22, %s107_s22 }
  0x83   :  { %p8247_p5 = scmp.lt.s32.totalorder %s8245_s24, %s8241_s8 }
  0x85   :  { %p8248_p6 = por %p8247_p5, %p8246_p4 }
  0x87   :  { %p8249_p7 = pnand %p8248_p6, %p8242_p3 }
  0x89   :  { %8252 = shalt.err (!%p8249_p7)
}
  0x8a   :  { %109 = dma.hbm_to_vmem [thread:$0]  %s10597_s12, 16, %s107_s22, [#allocation12]  }
  0x8b   :  { %s8253_s11 = scalar_lea.hbm %s10599_s14, 16 }
  0x8c   :  { %p8254_p8 = scmp.ne.s32.totalorder %s10599_s14, %s8253_s11  ;;  %p8257_p9 = scmp.lt.u32.totalorder %s8253_s11, %s10599_s14 }
  0x8e   :  { %p8259_p10 = pnand %p8257_p9, %p8254_p8 }
  0x90   :  { %8262 = shalt.err (!%p8259_p10)
}
  0x91   :  { %s8263_s23 = scalar_lea.vmem %s129_s26, 16  ;;  %s8267_s25 = scalar_lea.vmem %s129_s26, 32 }
  0x92   :  { %p8264_p11 = scmp.ne.s32.totalorder %s129_s26, %s8263_s23  ;;  %p8268_p12 = scmp.lt.s32.totalorder %s129_s26, %s129_s26 }
  0x93   :  { %p8269_p13 = scmp.lt.s32.totalorder %s8267_s25, %s8263_s23 }
  0x95   :  { %p8270_p0 = por %p8269_p13, %p8268_p12 }
  0x97   :  { %p8271_p1 = pnand %p8270_p0, %p8264_p11 }
  0x99   :  { %8274 = shalt.err (!%p8271_p1)
}
  0x9a   :  { %131 = dma.hbm_to_vmem [thread:$0]  %s10599_s14, 16, %s129_s26, [#allocation15]  }
  0x9b   :  { %8297 = dma.done.wait [#allocation3], 48  }
  0x9c   :  { %8298 = vsyncadd [#allocation3], 4294967248 }
  0x9d   :  { %8299 = dma.done.wait [#allocation6], 688  }
  0x9e   :  { %8300 = vsyncadd [#allocation6], 4294966608 }
  0x9f   :  { %8301 = dma.done.wait [#allocation9], 64  }
  0xa0   :  { %8302 = vsyncadd [#allocation9], 4294967232 }
  0xa1   :  { %8303 = dma.done.wait [#allocation12], 32  }
  0xa2   :  { %8304 = vsyncadd [#allocation12], 4294967264 }
  0xa3   :  { %8305 = dma.done.wait [#allocation15], 1040  }
  0xa4   :  { %8306 = vsyncadd [#allocation15], 4294966256  ;;  %v8320_v0 = vmov 0   ;;  %v161_v1 = vld [vmem:[%s10585_s0 + $0x8] sm:$0xff]  ;;  %v163_v2 = vld [vmem:[%s10585_s0 + $0x18] sm:$0xff]  ;;  %vm222_vm0 = vcmask 1043456  }
  0xa5   :  { %261 = vmatprep.mubr.bf16.mxu0 %v8320_v0  ;;  %400 = vmatprep.mubr.bf16.mxu1 %v8320_v0  ;;  %v160_v3 = vld [vmem:[%s10585_s0] sm:$0xff]  ;;  %v8529_v4 = vpack.c.bf16 %v163_v2, %v161_v1  ;;  %v162_v5 = vld [vmem:[%s10585_s0 + $0x10] sm:$0xff]  ;;  %v165_v6 = vld [vmem:[%s10585_s0 + $0x28] sm:$0xff]  ;;  %vm212_vm1 = vcmask 719872   ;;  %vm656_vm2 = vcmask 392192   ;;  %vm2566_vm3 = vcmask 326656  }
  0xa6   :  { %v167_v7 = vld [vmem:[%s10585_s0 + $0x38] sm:$0xff]  ;;  %v8540_v8 = vpack.c.bf16 %v162_v5, %v160_v3  ;;  %v164_v10 = vld [vmem:[%s10585_s0 + $0x20] sm:$0xff]  ;;  %v166_v11 = vld [vmem:[%s10585_s0 + $0x30] sm:$0xff]  ;;  %vm8322_vm4 = vmmov 0   ;;  %vm3045_vm5 = vcmask 523264   ;;  %vm4763_vm6 = vcmask 130048  }
  0xa7   :  { %v8542_v9 = vpack.c.bf16 %v167_v7, %v165_v6  ;;  %v169_v12 = vld [vmem:[%s10585_s0 + $0x48] sm:$0xff]  ;;  %229 = vmatprep.subr.bf16.mxu0 %v8529_v4  ;;  %368 = vmatprep.subr.bf16.mxu1 %v8529_v4  ;;  %v171_v13 = vld [vmem:[%s10585_s0 + $0x58] sm:$0xff]  ;;  %v8560_v14 = vpack.c.bf16 %v166_v11, %v164_v10  ;;  %v168_v16 = vld [vmem:[%s10585_s0 + $0x40] sm:$0xff] }
  0xa8   :  { %230 = vmatpush1.bf16.msra.mxu0 %v8540_v8  ;;  %369 = vmatpush1.bf16.msra.mxu1 %v8540_v8  ;;  %v8564_v15 = vpack.c.bf16 %v171_v13, %v169_v12  ;;  %v170_v17 = vld [vmem:[%s10585_s0 + $0x50] sm:$0xff]  ;;  %v173_v18 = vld [vmem:[%s10585_s0 + $0x68] sm:$0xff]  ;;  %v175_v19 = vld [vmem:[%s10585_s0 + $0x78] sm:$0xff] }
  0xa9   :  { %231 = vmatprep.subr.bf16.mxu0 %v8542_v9  ;;  %370 = vmatprep.subr.bf16.mxu1 %v8542_v9  ;;  %v8580_v20 = vpack.c.bf16 %v170_v17, %v168_v16  ;;  %v172_v21 = vld [vmem:[%s10585_s0 + $0x60] sm:$0xff]  ;;  %v8587_v22 = vpack.c.bf16 %v175_v19, %v173_v18  ;;  %v174_v23 = vld [vmem:[%s10585_s0 + $0x70] sm:$0xff]  ;;  %v177_v24 = vld [vmem:[%s10585_s0 + $0x88] sm:$0xff] }
  0xaa   :  { %v179_v25 = vld [vmem:[%s10585_s0 + $0x98] sm:$0xff]  ;;  %v8600_v26 = vpack.c.bf16 %v174_v23, %v172_v21  ;;  %v176_v27 = vld [vmem:[%s10585_s0 + $0x80] sm:$0xff]  ;;  %v178_v29 = vld [vmem:[%s10585_s0 + $0x90] sm:$0xff] }
  0xab   :  { %v8607_v28 = vpack.c.bf16 %v179_v25, %v177_v24  ;;  %v181_v30 = vld [vmem:[%s10585_s0 + $0xa8] sm:$0xff]  ;;  %v180_v31 = vld [vmem:[%s10585_s0 + $0xa0] sm:$0xff]  ;;  %v8620_v32 = vpack.c.bf16 %v178_v29, %v176_v27  ;;  %v7450_v39 = vld [vmem:[%s10586_s1 + $0x14] sm:$0xff]  }
  0xac   :  { %232 = vmatpush1.bf16.msra.mxu0 %v8560_v14  ;;  %371 = vmatpush1.bf16.msra.mxu1 %v8560_v14  ;;  %v8624_v33 = vpack.c.bf16 %v181_v30, %v181_v30  ;;  %v192_v34 = vpack.c.bf16 %v180_v31, %v180_v31  ;;  %v7457_v36 = vld [vmem:[%s10587_s2 + $0x10c] ss:$12 sps:$4 sm:$0xff]   ;;  %v7460_v37 = vld [vmem:[%s10587_s2 + $0x4] ss:$12 sps:$4 sm:$0xff]   ;;  %v7455_v40 = vld [vmem:[%s10587_s2 + $0x108] ss:$12 sps:$4 sm:$0xff]  }
  0xad   :  { %233 = vmatprep.subr.bf16.mxu0 %v8564_v15  ;;  %372 = vmatprep.subr.bf16.mxu1 %v8564_v15  ;;  %v7449_v38 = vld [vmem:[%s10586_s1] sm:$0xff]   ;;  %v7466_v43 = vld [vmem:[%s10587_s2 + $0x1c] ss:$12 sps:$4 sm:$0xff]   ;;  %v7478_v53 = vld [vmem:[%s10587_s2 + $0x4c] ss:$12 sps:$4 sm:$0xff]  }
  0xae   :  { %v8633_v35 = vsel %vm222_vm0, %v192_v34, 0  ;;  %v7458_v41 = vld [vmem:[%s10587_s2] ss:$12 sps:$4 sm:$0xff]   ;;  %v7463_v42 = vld [vmem:[%s10587_s2 + $0x124] ss:$12 sps:$4 sm:$0xff]  }
  0xaf   :  { %v7461_v44 = vld [vmem:[%s10587_s2 + $0x120] ss:$12 sps:$4 sm:$0xff]   ;;  %v7464_v46 = vld [vmem:[%s10587_s2 + $0x18] ss:$12 sps:$4 sm:$0xff]   ;;  %v7469_v47 = vld [vmem:[%s10587_s2 + $0x13c] ss:$12 sps:$4 sm:$0xff]  }
  0xb0   :  { %234 = vmatpush1.bf16.msra.mxu0 %v8580_v20  ;;  %373 = vmatpush1.bf16.msra.mxu1 %v8580_v20  ;;  %v7451_v45 = vld [vmem:[%s10586_s1 + $0x8] sm:$0xff]   ;;  %v7472_v48 = vld [vmem:[%s10587_s2 + $0x34] ss:$12 sps:$4 sm:$0xff]   ;;  %v7467_v50 = vld [vmem:[%s10587_s2 + $0x138] ss:$12 sps:$4 sm:$0xff]  }
  0xb1   :  { %235 = vmatprep.subr.bf16.mxu0 %v8587_v22  ;;  %374 = vmatprep.subr.bf16.mxu1 %v8587_v22  ;;  %v7453_v49 = vld [vmem:[%s10586_s1 + $0x1c] sm:$0xff]   ;;  %v7452_v55 = vld [vmem:[%s10586_s1 + $0x10] ss:$0 sps:$4 sm:$0xff]   ;;  %v7454_v56 = vld [vmem:[%s10586_s1 + $0x24] ss:$0 sps:$4 sm:$0xff]  }
  0xb2   :  { %v7470_v51 = vld [vmem:[%s10587_s2 + $0x30] ss:$12 sps:$4 sm:$0xff]   ;;  %v7475_v52 = vld [vmem:[%s10587_s2 + $0x154] ss:$12 sps:$4 sm:$0xff]   ;;  %v7481_v58 = vld [vmem:[%s10587_s2 + $0x16c] ss:$12 sps:$4 sm:$0xff]  }
  0xb3   :  { %v7473_v54 = vld [vmem:[%s10587_s2 + $0x150] ss:$12 sps:$4 sm:$0xff]   ;;  %v7476_v57 = vld [vmem:[%s10587_s2 + $0x48] ss:$12 sps:$4 sm:$0xff]   ;;  %v7482_v61 = vld [vmem:[%s10587_s2 + $0x60] ss:$12 sps:$4 sm:$0xff]  }
  0xb4   :  { %236 = vmatpush1.bf16.msra.mxu0 %v8600_v26  ;;  %375 = vmatpush1.bf16.msra.mxu1 %v8600_v26  ;;  %v7484_v59 = vld [vmem:[%s10587_s2 + $0x64] ss:$12 sps:$4 sm:$0xff]   ;;  %v7479_v60 = vld [vmem:[%s10587_s2 + $0x168] ss:$12 sps:$4 sm:$0xff]   ;;  %v7485_v1 = vld [vmem:[%s10587_s2 + $0x180] ss:$12 sps:$4 sm:$0xff]  }
  0xb5   :  { %237 = vmatprep.subr.bf16.mxu0 %v8607_v28  ;;  %376 = vmatprep.subr.bf16.mxu1 %v8607_v28  ;;  %v7487_v62 = vld [vmem:[%s10587_s2 + $0x184] ss:$12 sps:$4 sm:$0xff]   ;;  %v7490_v63 = vld [vmem:[%s10587_s2 + $0x7c] ss:$12 sps:$4 sm:$0xff]   ;;  %v7496_v5 = vld [vmem:[%s10587_s2 + $0x94] ss:$12 sps:$4 sm:$0xff]  }
  0xb6   :  { %v7488_v2 = vld [vmem:[%s10587_s2 + $0x78] ss:$12 sps:$4 sm:$0xff]   ;;  %v7493_v3 = vld [vmem:[%s10587_s2 + $0x19c] ss:$12 sps:$4 sm:$0xff]   ;;  %v7499_v10 = vld [vmem:[%s10587_s2 + $0x1b4] ss:$12 sps:$4 sm:$0xff]  }
  0xb7   :  { %v7491_v6 = vld [vmem:[%s10587_s2 + $0x198] ss:$12 sps:$4 sm:$0xff]   ;;  %v7494_v7 = vld [vmem:[%s10587_s2 + $0x90] ss:$12 sps:$4 sm:$0xff]   ;;  %v7500_v13 = vld [vmem:[%s10587_s2 + $0xa8] ss:$12 sps:$4 sm:$0xff]  }
  0xb8   :  { %238 = vmatpush1.bf16.msra.mxu0 %v8620_v32  ;;  %377 = vmatpush1.bf16.msra.mxu1 %v8620_v32  ;;  %v7502_v11 = vld [vmem:[%s10587_s2 + $0xac] ss:$12 sps:$4 sm:$0xff]   ;;  %v7497_v12 = vld [vmem:[%s10587_s2 + $0x1b0] ss:$12 sps:$4 sm:$0xff]   ;;  %v7503_v18 = vld [vmem:[%s10587_s2 + $0x1c8] ss:$12 sps:$4 sm:$0xff]  }
  0xb9   :  { %6052 = vmatprep.subr.msk.bf16.mxu0 %vm222_vm0, %v8624_v33  ;;  %6064 = vmatprep.subr.msk.bf16.mxu1 %vm222_vm0, %v8624_v33  ;;  %v7505_v16 = vld [vmem:[%s10587_s2 + $0x1cc] ss:$12 sps:$4 sm:$0xff]   ;;  %v7508_v17 = vld [vmem:[%s10587_s2 + $0xc4] ss:$12 sps:$4 sm:$0xff]   ;;  %v7514_v23 = vld [vmem:[%s10587_s2 + $0xdc] ss:$12 sps:$4 sm:$0xff]  }
  0xba   :  { %v7506_v19 = vld [vmem:[%s10587_s2 + $0xc0] ss:$12 sps:$4 sm:$0xff]   ;;  %v7511_v21 = vld [vmem:[%s10587_s2 + $0x1e4] ss:$12 sps:$4 sm:$0xff]   ;;  %v7517_v27 = vld [vmem:[%s10587_s2 + $0x1fc] ss:$12 sps:$4 sm:$0xff]  }
  0xbb   :  { %v7509_v24 = vld [vmem:[%s10587_s2 + $0x1e0] ss:$12 sps:$4 sm:$0xff]   ;;  %v7512_v25 = vld [vmem:[%s10587_s2 + $0xd8] ss:$12 sps:$4 sm:$0xff]   ;;  %v7518_v31 = vld [vmem:[%s10587_s2 + $0xf0] ss:$12 sps:$4 sm:$0xff]  }
  0xbc   :  { %240 = vmatpush1.bf16.msra.mxu0 %v8633_v35  ;;  %379 = vmatpush1.bf16.msra.mxu1 %v8633_v35  ;;  %v7515_v29 = vld [vmem:[%s10587_s2 + $0x1f8] ss:$12 sps:$4 sm:$0xff]   ;;  %v7520_v30 = vld [vmem:[%s10587_s2 + $0xf4] ss:$12 sps:$4 sm:$0xff]  }
  0xbd   :  { %666 = vmatprep.subr.bf16.mxu1 %v7457_v36  ;;  %968 = vmatprep.subr.bf16.mxu0 %v7460_v37 }
  0xbf   :  { %6053 = vmatmul.mubr.msk.bf16.vlgmr.msra.gmra.mrb[0].mxu0 %vm212_vm1, %v7449_v38  ;;  %6065 = vmatmul.mubr.msk.bf16.vlgmr.msra.gmra.mrb[0].mxu1 %vm212_vm1, %v7450_v39 }
  0xc0   :  { %271 = vmatprep.mubr.bf16.mxu0 %v8320_v0  ;;  %410 = vmatprep.mubr.bf16.mxu1 %v8320_v0 }
  0xc1   :  { %667 = vmatpush1.bf16.msra.mxu1 %v7455_v40  ;;  %969 = vmatpush1.bf16.msra.mxu0 %v7458_v41  ;;  %v7521_v41 = vld [vmem:[%s10587_s2 + $0x110] ss:$12 sps:$4 sm:$0xff]  }
  0xc2   :  { %668 = vmatprep.subr.bf16.mxu1 %v7463_v42  ;;  %970 = vmatprep.subr.bf16.mxu0 %v7466_v43 }
  0xc5   :  { %669 = vmatpush1.bf16.msra.mxu1 %v7461_v44  ;;  %971 = vmatpush1.bf16.msra.mxu0 %v7464_v46 }
  0xc6   :  { %670 = vmatprep.subr.bf16.mxu1 %v7469_v47  ;;  %972 = vmatprep.subr.bf16.mxu0 %v7472_v48  ;;  %v7522_v48 = vld [vmem:[%s10587_s2 + $0x128] ss:$12 sps:$4 sm:$0xff]  }
  0xc7   :  { %6054 = vmatmul.mubr.msk.bf16.gmra.mrb[4].mxu0 %vm212_vm1, %v7451_v45  ;;  %6066 = vmatmul.mubr.msk.bf16.gmra.mrb[4].mxu1 %vm212_vm1, %v7453_v49 }
  0xc8   :  { %281 = vmatprep.mubr.bf16.mxu0 %v8320_v0  ;;  %420 = vmatprep.mubr.bf16.mxu1 %v8320_v0 }
  0xc9   :  { %671 = vmatpush1.bf16.msra.mxu1 %v7467_v50  ;;  %973 = vmatpush1.bf16.msra.mxu0 %v7470_v51 }
  0xca   :  { %672 = vmatprep.subr.bf16.mxu1 %v7475_v52  ;;  %974 = vmatprep.subr.bf16.mxu0 %v7478_v53 }
  0xcd   :  { %673 = vmatpush1.bf16.msra.mxu1 %v7473_v54  ;;  %975 = vmatpush1.bf16.msra.mxu0 %v7476_v57  ;;  %v7523_v54 = vld [vmem:[%s10587_s2 + $0x140] ss:$12 sps:$4 sm:$0xff]  }
  0xce   :  { %674 = vmatprep.subr.bf16.mxu1 %v7481_v58  ;;  %976 = vmatprep.subr.bf16.mxu0 %v7484_v59 }
  0xcf   :  { %6055 = vmatmul.mubr.msk.bf16.gmra.mrb[8].mxu0 %vm212_vm1, %v7452_v55  ;;  %6067 = vmatmul.mubr.msk.bf16.gmra.mrb[8].mxu1 %vm212_vm1, %v7454_v56 }
  0xd1   :  { %675 = vmatpush1.bf16.msra.mxu1 %v7479_v60  ;;  %977 = vmatpush1.bf16.msra.mxu0 %v7482_v61 }
  0xd2   :  { %676 = vmatprep.subr.bf16.mxu1 %v7487_v62  ;;  %978 = vmatprep.subr.bf16.mxu0 %v7490_v63  ;;  %v7524_v62 = vld [vmem:[%s10587_s2 + $0x158] ss:$12 sps:$4 sm:$0xff]  }
  0xd5   :  { %677 = vmatpush1.bf16.msra.mxu1 %v7485_v1  ;;  %979 = vmatpush1.bf16.msra.mxu0 %v7488_v2 }
  0xd6   :  { %678 = vmatprep.subr.bf16.mxu1 %v7493_v3  ;;  %980 = vmatprep.subr.bf16.mxu0 %v7496_v5 }
  0xd9   :  { %679 = vmatpush1.bf16.msra.mxu1 %v7491_v6  ;;  %981 = vmatpush1.bf16.msra.mxu0 %v7494_v7 }
  0xda   :  { %680 = vmatprep.subr.bf16.mxu1 %v7499_v10  ;;  %982 = vmatprep.subr.bf16.mxu0 %v7502_v11 }
  0xdd   :  { %681 = vmatpush1.bf16.msra.mxu1 %v7497_v12  ;;  %983 = vmatpush1.bf16.msra.mxu0 %v7500_v13 }
  0xde   :  { %682 = vmatprep.subr.bf16.mxu1 %v7505_v16  ;;  %984 = vmatprep.subr.bf16.mxu0 %v7508_v17  ;;  %v7525_v16 = vld [vmem:[%s10587_s2 + $0x170] ss:$12 sps:$4 sm:$0xff]  }
  0xe1   :  { %683 = vmatpush1.bf16.msra.mxu1 %v7503_v18  ;;  %985 = vmatpush1.bf16.msra.mxu0 %v7506_v19  ;;  %v7526_v18 = vld [vmem:[%s10587_s2 + $0x188] ss:$12 sps:$4 sm:$0xff]  }
  0xe2   :  { %684 = vmatprep.subr.bf16.mxu1 %v7511_v21  ;;  %986 = vmatprep.subr.bf16.mxu0 %v7514_v23  ;;  %v7548_v19 = vld [vmem:[%s10587_s2 + $0x214] ss:$12 sps:$4 sm:$0xff]   ;;  %v7528_v21 = vld [vmem:[%s10586_s1 + $0x28] sm:$0xff]  }
  0xe3   :  { %v7527_v23 = vld [vmem:[%s10587_s2 + $0x1a0] ss:$12 sps:$4 sm:$0xff]  }
  0xe5   :  { %685 = vmatpush1.bf16.msra.mxu1 %v7509_v24  ;;  %987 = vmatpush1.bf16.msra.mxu0 %v7512_v25  ;;  %v7546_v24 = vld [vmem:[%s10587_s2 + $0x210] ss:$12 sps:$4 sm:$0xff]   ;;  %v7552_v25 = vld [vmem:[%s10587_s2 + $0x22c] ss:$12 sps:$4 sm:$0xff]  }
  0xe6   :  { %686 = vmatprep.subr.bf16.mxu1 %v7517_v27  ;;  %988 = vmatprep.subr.bf16.mxu0 %v7520_v30  ;;  %v7529_v27 = vld [vmem:[%s10587_s2 + $0x1b8] ss:$12 sps:$4 sm:$0xff]  }
  0xe7   :  { %v7556_v30 = vld [vmem:[%s10587_s2 + $0x244] ss:$12 sps:$4 sm:$0xff]  }
  0xe9   :  { %687 = vmatpush1.bf16.msra.mxu1 %v7515_v29  ;;  %989 = vmatpush1.bf16.msra.mxu0 %v7518_v31  ;;  %v7550_v29 = vld [vmem:[%s10587_s2 + $0x228] ss:$12 sps:$4 sm:$0xff]  }
  0xea   :  { %727 = vmatprep.subr.bf16.mxu1 %v8320_v0  ;;  %1113 = vmatprep.subr.bf16.mxu0 %v8529_v4  ;;  %v7531_v31 = vld [vmem:[%s10586_s1 + $0x30] sm:$0xff]  }
 0x192   :  { %v263_v34 = vpop.f32.mrb[0].mxu0  ;;  %v402_v36 = vpop.f32.mrb[0].mxu1 }
 0x193   :  { %v265_v37 = vpop.f32.mrb[1].mxu0  ;;  %v404_v38 = vpop.f32.mrb[1].mxu1 }
 0x194   :  { %v267_v39 = vpop.f32.mrb[2].mxu0  ;;  %v406_v40 = vpop.f32.mrb[2].mxu1 }
 0x195   :  { %v8802_v42 = vpack.c.bf16 %v267_v39, %v263_v34  ;;  %v8804_v43 = vpack.c.bf16 %v406_v40, %v402_v36  ;;  %v269_v44 = vpop.f32.mrb[3].mxu0  ;;  %v408_v45 = vpop.f32.mrb[3].mxu1  ;;  %v7530_v34 = vld [vmem:[%s10587_s2 + $0x1d0] ss:$12 sps:$4 sm:$0xff]   ;;  %v7554_v36 = vld [vmem:[%s10587_s2 + $0x240] ss:$12 sps:$4 sm:$0xff]  }
 0x196   :  { %v8806_v46 = vpack.c.bf16 %v269_v44, %v265_v37  ;;  %v8808_v47 = vpack.c.bf16 %v408_v45, %v404_v38  ;;  %v7560_v37 = vld [vmem:[%s10587_s2 + $0x25c] ss:$12 sps:$4 sm:$0xff]   ;;  %v7558_v39 = vld [vmem:[%s10587_s2 + $0x258] ss:$12 sps:$4 sm:$0xff]   ;;  %v7564_v40 = vld [vmem:[%s10587_s2 + $0x274] ss:$12 sps:$4 sm:$0xff]  }
 0x197   :  { %v7532_v38 = vld [vmem:[%s10587_s2 + $0x1e8] ss:$12 sps:$4 sm:$0xff]   ;;  %v7533_v44 = vld [vmem:[%s10587_s2 + $0x200] ss:$12 sps:$4 sm:$0xff]   ;;  %v7562_v45 = vld [vmem:[%s10587_s2 + $0x270] ss:$12 sps:$4 sm:$0xff]  }
 0x198   :  { %6145 = vmatprep.mubr.msk.bf16.mxu1 %vm656_vm2, %v8808_v47  ;;  %6184 = vmatprep.mubr.msk.bf16.mxu0 %vm656_vm2, %v8806_v46 }
 0x199   :  { %699 = vmatmul.mubr.bf16.vlgmr.msra.gmra.mrb[12].mxu1 %v8804_v43  ;;  %1001 = vmatmul.mubr.bf16.vlgmr.msra.gmra.mrb[12].mxu0 %v8802_v42 }
 0x19a   :  { %728 = vmatpush1.bf16.msra.mxu1 %v7521_v41  ;;  %v273_v49 = vpop.f32.mrb[4].mxu0  ;;  %1114 = vmatpush1.bf16.msra.mxu0 %v8540_v8  ;;  %v412_v50 = vpop.f32.mrb[4].mxu1  ;;  %v7534_v41 = vld [vmem:[%s10586_s1 + $0x38] ss:$0 sps:$4 sm:$0xff]  }
 0x19b   :  { %v275_v51 = vpop.f32.mrb[5].mxu0  ;;  %729 = vmatprep.subr.bf16.mxu1 %v8320_v0  ;;  %1115 = vmatprep.subr.bf16.mxu0 %v8542_v9  ;;  %v414_v52 = vpop.f32.mrb[5].mxu1 }
 0x19c   :  { %v277_v53 = vpop.f32.mrb[6].mxu0  ;;  %v416_v55 = vpop.f32.mrb[6].mxu1 }
 0x19d   :  { %v8825_v56 = vpack.c.bf16 %v277_v53, %v273_v49  ;;  %v279_v57 = vpop.f32.mrb[7].mxu0  ;;  %v8827_v58 = vpack.c.bf16 %v416_v55, %v412_v50  ;;  %v418_v59 = vpop.f32.mrb[7].mxu1  ;;  %v7566_v49 = vld [vmem:[%s10587_s2 + $0x288] ss:$12 sps:$4 sm:$0xff]   ;;  %v7572_v50 = vld [vmem:[%s10587_s2 + $0x2a4] ss:$12 sps:$4 sm:$0xff]  }
 0x19e   :  { %v8829_v60 = vpack.c.bf16 %v279_v57, %v275_v51  ;;  %730 = vmatpush1.bf16.msra.mxu1 %v7522_v48  ;;  %1116 = vmatpush1.bf16.msra.mxu0 %v8560_v14  ;;  %v8832_v61 = vpack.c.bf16 %v418_v59, %v414_v52  ;;  %v7535_v48 = vld [vmem:[%s10587_s2 + $0x8] ss:$12 sps:$4 sm:$0xff]   ;;  %v7536_v51 = vld [vmem:[%s10587_s2 + $0x20] ss:$12 sps:$4 sm:$0xff]   ;;  %v7537_v53 = vld [vmem:[%s10587_s2 + $0x38] ss:$12 sps:$4 sm:$0xff]  }
 0x19f   :  { %731 = vmatprep.subr.bf16.mxu1 %v8320_v0  ;;  %1117 = vmatprep.subr.bf16.mxu0 %v8564_v15  ;;  %v7570_v52 = vld [vmem:[%s10587_s2 + $0x2a0] ss:$12 sps:$4 sm:$0xff]   ;;  %v7538_v57 = vld [vmem:[%s10587_s2 + $0x50] ss:$12 sps:$4 sm:$0xff]  }
 0x1a0   :  { %6185 = vmatprep.mubr.msk.bf16.mxu0 %vm656_vm2, %v8829_v60  ;;  %6146 = vmatprep.mubr.msk.bf16.mxu1 %vm656_vm2, %v8832_v61  ;;  %v7580_v55 = vld [vmem:[%s10587_s2 + $0x2d4] ss:$12 sps:$4 sm:$0xff]   ;;  %v7578_v59 = vld [vmem:[%s10587_s2 + $0x2d0] ss:$12 sps:$4 sm:$0xff]  }
 0x1a1   :  { %1011 = vmatmul.mubr.bf16.gmra.mrb[16].mxu0 %v8825_v56  ;;  %709 = vmatmul.mubr.bf16.gmra.mrb[16].mxu1 %v8827_v58 }
 0x1a2   :  { %732 = vmatpush1.bf16.msra.mxu1 %v7523_v54  ;;  %v283_v63 = vpop.f32.mrb[8].mxu0  ;;  %1118 = vmatpush1.bf16.msra.mxu0 %v8580_v20  ;;  %v422_v1 = vpop.f32.mrb[8].mxu1  ;;  %v7574_v54 = vld [vmem:[%s10587_s2 + $0x2b8] ss:$12 sps:$4 sm:$0xff]  }
 0x1a3   :  { %v285_v2 = vpop.f32.mrb[9].mxu0  ;;  %733 = vmatprep.subr.bf16.mxu1 %v8320_v0  ;;  %1119 = vmatprep.subr.bf16.mxu0 %v8587_v22  ;;  %v424_v3 = vpop.f32.mrb[9].mxu1  ;;  %v8852_v12 = vpack.c.bf16 %v422_v1, %v422_v1  ;;  %v8858_v17 = vpack.c.bf16 %v283_v63, %v283_v63  ;;  %v7540_v63 = vld [vmem:[%s10587_s2 + $0x80] ss:$12 sps:$4 sm:$0xff]   ;;  %v7541_v1 = vld [vmem:[%s10587_s2 + $0x98] ss:$12 sps:$4 sm:$0xff]  }
 0x1a4   :  { %v8848_v5 = vpack.c.bf16 %v285_v2, %v285_v2  ;;  %v287_v6 = vpop.f32.mrb[10].mxu0  ;;  %v8850_v7 = vpack.c.bf16 %v424_v3, %v424_v3  ;;  %v426_v10 = vpop.f32.mrb[10].mxu1  ;;  %v7542_v2 = vld [vmem:[%s10587_s2 + $0xb0] ss:$12 sps:$4 sm:$0xff]   ;;  %v7544_v3 = vld [vmem:[%s10587_s2 + $0xe0] ss:$12 sps:$4 sm:$0xff]  }
 0x1a5   :  { %v288_v11 = vpop.f32.mrb[11].mxu0  ;;  %v427_v13 = vpop.f32.mrb[11].mxu1  ;;  %v7545_v6 = vld [vmem:[%s10587_s2 + $0xf8] ss:$12 sps:$4 sm:$0xff]   ;;  %v7553_v10 = vld [vmem:[%s10587_s2 + $0x230] ss:$12 sps:$4 sm:$0xff]  }
 0x1a6   :  { %734 = vmatpush1.bf16.msra.mxu1 %v7524_v62  ;;  %1120 = vmatpush1.bf16.msra.mxu0 %v8600_v26  ;;  %v7582_v62 = vld [vmem:[%s10587_s2 + $0x2e8] ss:$12 sps:$4 sm:$0xff]   ;;  %v7586_v13 = vld [vmem:[%s10587_s2 + $0x300] ss:$12 sps:$4 sm:$0xff]  }
 0x1a7   :  { %6186 = vmatprep.mubr.msk.bf16.mxu0 %vm656_vm2, %v8848_v5  ;;  %735 = vmatprep.subr.bf16.mxu1 %v8320_v0  ;;  %v7557_v11 = vld [vmem:[%s10587_s2 + $0x248] ss:$12 sps:$4 sm:$0xff]  }
 0x1a8   :  { %1121 = vmatprep.subr.bf16.mxu0 %v8607_v28  ;;  %6147 = vmatprep.mubr.msk.bf16.mxu1 %vm656_vm2, %v8850_v7 }
 0x1a9   :  { %1021 = vmatmul.mubr.bf16.gmra.mrb[20].mxu0 %v8858_v17  ;;  %719 = vmatmul.mubr.bf16.gmra.mrb[20].mxu1 %v8852_v12 }
 0x1aa   :  { %736 = vmatpush1.bf16.msra.mxu1 %v7525_v16  ;;  %1122 = vmatpush1.bf16.msra.mxu0 %v8620_v32  ;;  %v7577_v16 = vld [vmem:[%s10587_s2 + $0x2c0] ss:$12 sps:$4 sm:$0xff]  }
 0x1ab   :  { %737 = vmatprep.subr.bf16.mxu1 %v8320_v0  ;;  %6198 = vmatprep.subr.msk.bf16.mxu0 %vm222_vm0, %v8624_v33 }
 0x1ac   :  { %1145 = vmatprep.mubr.bf16.mxu0 %v8320_v0  ;;  %6148 = vmatprep.mubr.msk.bf16.mxu1 %vm656_vm2, %v8808_v47  ;;  %v7568_v47 = vld [vmem:[%s10587_s2 + $0x28c] ss:$12 sps:$4 sm:$0xff]  }
 0x1ae   :  { %738 = vmatpush1.bf16.msra.mxu1 %v7526_v18  ;;  %1124 = vmatpush1.bf16.msra.mxu0 %v8633_v35  ;;  %v7585_v18 = vld [vmem:[%s10587_s2 + $0x2f0] ss:$12 sps:$4 sm:$0xff]  }
 0x1af   :  { %739 = vmatprep.subr.bf16.mxu1 %v8320_v0  ;;  %1410 = vmatprep.subr.bf16.mxu0 %v7548_v19  ;;  %v7589_v19 = vld [vmem:[%s10587_s2 + $0x308] ss:$12 sps:$4 sm:$0xff]  }
 0x1b1   :  { %6199 = vmatmul.mubr.msk.bf16.vlgmr.msra.gmra.mrb[24].mxu0 %vm212_vm1, %v7528_v21  ;;  %v7595_v21 = vld [vmem:[%s10587_s2 + $0x31c] ss:$12 sps:$4 sm:$0xff]  }
 0x1b2   :  { %740 = vmatpush1.bf16.msra.mxu1 %v7527_v23  ;;  %1155 = vmatprep.mubr.bf16.mxu0 %v8320_v0 }
 0x1b3   :  { %741 = vmatprep.subr.bf16.mxu1 %v8320_v0  ;;  %1411 = vmatpush1.bf16.msra.mxu0 %v7546_v24 }
 0x1b4   :  { %1412 = vmatprep.subr.bf16.mxu0 %v7552_v25 }
 0x1b6   :  { %742 = vmatpush1.bf16.msra.mxu1 %v7529_v27 }
 0x1b7   :  { %743 = vmatprep.subr.bf16.mxu1 %v8320_v0  ;;  %1413 = vmatpush1.bf16.msra.mxu0 %v7550_v29 }
 0x1b8   :  { %1414 = vmatprep.subr.bf16.mxu0 %v7556_v30 }
 0x1b9   :  { %6200 = vmatmul.mubr.msk.bf16.gmra.mrb[28].mxu0 %vm212_vm1, %v7531_v31 }
 0x1ba   :  { %744 = vmatpush1.bf16.msra.mxu1 %v7530_v34  ;;  %1165 = vmatprep.mubr.bf16.mxu0 %v8320_v0 }
 0x1bb   :  { %745 = vmatprep.subr.bf16.mxu1 %v8320_v0  ;;  %1415 = vmatpush1.bf16.msra.mxu0 %v7554_v36 }
 0x1bc   :  { %1416 = vmatprep.subr.bf16.mxu0 %v7560_v37 }
 0x1be   :  { %746 = vmatpush1.bf16.msra.mxu1 %v7532_v38 }
 0x1bf   :  { %747 = vmatprep.subr.bf16.mxu1 %v8320_v0  ;;  %1417 = vmatpush1.bf16.msra.mxu0 %v7558_v39 }
 0x1c0   :  { %1418 = vmatprep.subr.bf16.mxu0 %v7564_v40 }
 0x1c1   :  { %6201 = vmatmul.mubr.msk.bf16.gmra.mrb[32].mxu0 %vm212_vm1, %v7534_v41 }
 0x1c2   :  { %748 = vmatpush1.bf16.msra.mxu1 %v7533_v44 }
 0x1c3   :  { %1029 = vmatprep.subr.bf16.mxu1 %v8320_v0  ;;  %1419 = vmatpush1.bf16.msra.mxu0 %v7562_v45 }
 0x1c4   :  { %1420 = vmatprep.subr.bf16.mxu0 %v7568_v47 }
 0x1c5   :  { %760 = vmatmul.mubr.bf16.vlgmr.msra.gmra.mrb[24].mxu1 %v8804_v43  ;;  %v7576_v43 = vld [vmem:[%s10587_s2 + $0x2bc] ss:$12 sps:$4 sm:$0xff]  }
 0x1c6   :  { %1030 = vmatpush1.bf16.msra.mxu1 %v7535_v48  ;;  %6149 = vmatprep.mubr.msk.bf16.mxu1 %vm656_vm2, %v8832_v61  ;;  %v7539_v61 = vld [vmem:[%s10587_s2 + $0x68] ss:$12 sps:$4 sm:$0xff]  }
 0x1c7   :  { %1031 = vmatprep.subr.bf16.mxu1 %v8320_v0  ;;  %1421 = vmatpush1.bf16.msra.mxu0 %v7566_v49  ;;  %v7593_v49 = vld [vmem:[%s10587_s2 + $0x318] ss:$12 sps:$4 sm:$0xff]  }
 0x1c8   :  { %1422 = vmatprep.subr.bf16.mxu0 %v7572_v50  ;;  %v7599_v50 = vld [vmem:[%s10587_s2 + $0x334] ss:$12 sps:$4 sm:$0xff]  }
 0x1ca   :  { %1032 = vmatpush1.bf16.msra.mxu1 %v7536_v51 }
 0x1cb   :  { %1033 = vmatprep.subr.bf16.mxu1 %v8320_v0  ;;  %1423 = vmatpush1.bf16.msra.mxu0 %v7570_v52  ;;  %v7597_v52 = vld [vmem:[%s10587_s2 + $0x330] ss:$12 sps:$4 sm:$0xff]  }
 0x1cc   :  { %1424 = vmatprep.subr.bf16.mxu0 %v7576_v43 }
 0x1cd   :  { %768 = vmatmul.mubr.bf16.gmra.mrb[28].mxu1 %v8827_v58  ;;  %v7584_v58 = vld [vmem:[%s10587_s2 + $0x2ec] ss:$12 sps:$4 sm:$0xff]  }
 0x1ce   :  { %1034 = vmatpush1.bf16.msra.mxu1 %v7537_v53  ;;  %6150 = vmatprep.mubr.msk.bf16.mxu1 %vm656_vm2, %v8850_v7  ;;  %v7549_v7 = vld [vmem:[%s10587_s2 + $0x218] ss:$12 sps:$4 sm:$0xff]  }
 0x1cf   :  { %1035 = vmatprep.subr.bf16.mxu1 %v8320_v0  ;;  %1425 = vmatpush1.bf16.msra.mxu0 %v7574_v54  ;;  %v7603_v53 = vld [vmem:[%s10587_s2 + $0x34c] ss:$12 sps:$4 sm:$0xff]  }
 0x1d0   :  { %1426 = vmatprep.subr.bf16.mxu0 %v7580_v55 }
 0x1d2   :  { %1036 = vmatpush1.bf16.msra.mxu1 %v7538_v57 }
 0x1d3   :  { %1037 = vmatprep.subr.bf16.mxu1 %v8320_v0  ;;  %1427 = vmatpush1.bf16.msra.mxu0 %v7578_v59 }
 0x1d4   :  { %1428 = vmatprep.subr.bf16.mxu0 %v7584_v58  ;;  %v7601_v58 = vld [vmem:[%s10587_s2 + $0x348] ss:$12 sps:$4 sm:$0xff]  }
 0x1d5   :  { %776 = vmatmul.mubr.bf16.gmra.mrb[32].mxu1 %v8852_v12  ;;  %v7588_v12 = vld [vmem:[%s10587_s2 + $0x304] ss:$12 sps:$4 sm:$0xff]  }
 0x1d6   :  { %1038 = vmatpush1.bf16.msra.mxu1 %v7539_v61  ;;  %6187 = vmatprep.mubr.msk.bf16.mxu1 %vm656_vm2, %v8806_v46  ;;  %v7543_v46 = vld [vmem:[%s10587_s2 + $0xc8] ss:$12 sps:$4 sm:$0xff]   ;;  %v7607_v61 = vld [vmem:[%s10587_s2 + $0x364] ss:$12 sps:$4 sm:$0xff]  }
 0x1d7   :  { %1039 = vmatprep.subr.bf16.mxu1 %v8320_v0  ;;  %1429 = vmatpush1.bf16.msra.mxu0 %v7582_v62 }
 0x1d8   :  { %1430 = vmatprep.subr.bf16.mxu0 %v7588_v12  ;;  %v7617_v12 = vld [vmem:[%s10587_s2 + $0x3a8] ss:$12 sps:$4 sm:$0xff]  }
 0x1da   :  { %1040 = vmatpush1.bf16.msra.mxu1 %v7540_v63 }
 0x1db   :  { %1041 = vmatprep.subr.bf16.mxu1 %v8320_v0  ;;  %1431 = vmatpush1.bf16.msra.mxu0 %v7586_v13  ;;  %v7623_v13 = vld [vmem:[%s10587_s2 + $0x3c4] ss:$12 sps:$4 sm:$0xff]  }
 0x1dc   :  { %1867 = vmatprep.subr.bf16.mxu0 %v7595_v21  ;;  %v7604_v21 = vld [vmem:[%s10587_s2 + $0x350] ss:$12 sps:$4 sm:$0xff]  }
 0x1de   :  { %1042 = vmatpush1.bf16.msra.mxu1 %v7541_v1 }
 0x1df   :  { %1043 = vmatprep.subr.bf16.mxu1 %v8320_v0 }
 0x1e2   :  { %1044 = vmatpush1.bf16.msra.mxu1 %v7542_v2 }
 0x1e3   :  { %1045 = vmatprep.subr.bf16.mxu1 %v8320_v0 }
 0x1e6   :  { %1046 = vmatpush1.bf16.msra.mxu1 %v7543_v46  ;;  %v7605_v46 = vld [vmem:[%s10587_s2 + $0x360] ss:$12 sps:$4 sm:$0xff]  }
 0x1e7   :  { %1047 = vmatprep.subr.bf16.mxu1 %v8320_v0 }
 0x1ea   :  { %1048 = vmatpush1.bf16.msra.mxu1 %v7544_v3 }
 0x1eb   :  { %1049 = vmatprep.subr.bf16.mxu1 %v8320_v0 }
 0x1ee   :  { %1050 = vmatpush1.bf16.msra.mxu1 %v7545_v6 }
 0x1ef   :  { %1471 = vmatprep.subr.bf16.mxu1 %v8320_v0 }
 0x1f1   :  { %1062 = vmatmul.mubr.bf16.vlgmr.msra.gmra.mrb[24].mxu1 %v8802_v42  ;;  %v7561_v42 = vld [vmem:[%s10587_s2 + $0x260] ss:$12 sps:$4 sm:$0xff]  }
 0x1f2   :  { %6188 = vmatprep.mubr.msk.bf16.mxu1 %vm656_vm2, %v8829_v60  ;;  %1472 = vmatpush1.bf16.msra.mxu1 %v7549_v7  ;;  %v7565_v60 = vld [vmem:[%s10587_s2 + $0x278] ss:$12 sps:$4 sm:$0xff]   ;;  %v7611_v7 = vld [vmem:[%s10587_s2 + $0x37c] ss:$12 sps:$4 sm:$0xff]  }
 0x1f3   :  { %1473 = vmatprep.subr.bf16.mxu1 %v8320_v0 }
 0x1f6   :  { %1474 = vmatpush1.bf16.msra.mxu1 %v7553_v10  ;;  %v7609_v10 = vld [vmem:[%s10587_s2 + $0x378] ss:$12 sps:$4 sm:$0xff]  }
 0x1f7   :  { %1475 = vmatprep.subr.bf16.mxu1 %v8320_v0 }
 0x1f9   :  { %1070 = vmatmul.mubr.bf16.gmra.mrb[28].mxu1 %v8825_v56  ;;  %v7569_v56 = vld [vmem:[%s10587_s2 + $0x290] ss:$12 sps:$4 sm:$0xff]  }
 0x1fa   :  { %6189 = vmatprep.mubr.msk.bf16.mxu1 %vm656_vm2, %v8848_v5  ;;  %1476 = vmatpush1.bf16.msra.mxu1 %v7557_v11  ;;  %v7573_v5 = vld [vmem:[%s10587_s2 + $0x2a8] ss:$12 sps:$4 sm:$0xff]  }
 0x1fb   :  { %1477 = vmatprep.subr.bf16.mxu1 %v8320_v0  ;;  %v7615_v11 = vld [vmem:[%s10587_s2 + $0x394] ss:$12 sps:$4 sm:$0xff]  }
 0x1fe   :  { %1478 = vmatpush1.bf16.msra.mxu1 %v7561_v42  ;;  %v7613_v42 = vld [vmem:[%s10587_s2 + $0x390] ss:$12 sps:$4 sm:$0xff]  }
 0x1ff   :  { %1479 = vmatprep.subr.bf16.mxu1 %v8320_v0 }
 0x201   :  { %1078 = vmatmul.mubr.bf16.gmra.mrb[32].mxu1 %v8858_v17  ;;  %v7581_v17 = vld [vmem:[%s10587_s2 + $0x2d8] ss:$12 sps:$4 sm:$0xff]  }
 0x202   :  { %1480 = vmatpush1.bf16.msra.mxu1 %v7565_v60  ;;  %v7590_v60 = vld [vmem:[%s10586_s1 + $0x3c] sm:$0xff]  }
 0x203   :  { %1481 = vmatprep.subr.bf16.mxu1 %v8320_v0 }
 0x206   :  { %1482 = vmatpush1.bf16.msra.mxu1 %v7569_v56  ;;  %v7619_v56 = vld [vmem:[%s10587_s2 + $0x3ac] ss:$12 sps:$4 sm:$0xff]  }
 0x207   :  { %1483 = vmatprep.subr.bf16.mxu1 %v8320_v0 }
 0x20a   :  { %1484 = vmatpush1.bf16.msra.mxu1 %v7573_v5  ;;  %v7596_v5 = vld [vmem:[%s10587_s2 + $0x320] ss:$12 sps:$4 sm:$0xff]  }
 0x20b   :  { %1485 = vmatprep.subr.bf16.mxu1 %v8320_v0 }
 0x20e   :  { %1486 = vmatpush1.bf16.msra.mxu1 %v7577_v16  ;;  %v7600_v16 = vld [vmem:[%s10587_s2 + $0x338] ss:$12 sps:$4 sm:$0xff]  }
 0x20f   :  { %1487 = vmatprep.subr.bf16.mxu1 %v8320_v0 }
 0x212   :  { %1488 = vmatpush1.bf16.msra.mxu1 %v7581_v17  ;;  %v7621_v17 = vld [vmem:[%s10587_s2 + $0x3c0] ss:$12 sps:$4 sm:$0xff]  }
 0x213   :  { %1489 = vmatprep.subr.bf16.mxu1 %v8320_v0 }
 0x216   :  { %1490 = vmatpush1.bf16.msra.mxu1 %v7585_v18  ;;  %v7591_v18 = vld [vmem:[%s10586_s1 + $0x44] sm:$0xff]  }
 0x217   :  { %1491 = vmatprep.subr.bf16.mxu1 %v8320_v0 }
 0x21a   :  { %1492 = vmatpush1.bf16.msra.mxu1 %v7589_v19  ;;  %v7627_v19 = vld [vmem:[%s10587_s2 + $0x3dc] ss:$12 sps:$4 sm:$0xff]  }
 0x21b   :  { %1570 = vmatprep.subr.bf16.mxu1 %v8529_v4 }
 0x26c   :  { %v9087_v23 = vpop.f32.mrb[12].mxu1 }
 0x26d   :  { %v9089_v24 = vpop.f32.mrb[13].mxu1 }
 0x26e   :  { %v9091_v25 = vpop.f32.mrb[14].mxu1 }
 0x26f   :  { %v9093_v27 = vpop.f32.mrb[15].mxu1 }
 0x274   :  { %v9095_v29 = vpop.f32.mrb[16].mxu1 }
 0x275   :  { %v9097_v30 = vpop.f32.mrb[17].mxu1 }
 0x276   :  { %v9099_v31 = vpop.f32.mrb[18].mxu1 }
 0x277   :  { %v9101_v34 = vpop.f32.mrb[19].mxu1 }
 0x27c   :  { %v9103_v36 = vpop.f32.mrb[20].mxu1 }
 0x27d   :  { %v9105_v37 = vpop.f32.mrb[21].mxu1 }
 0x27e   :  { %v724_v38 = vpop.f32.mrb[22].mxu1 }
 0x27f   :  { %v725_v39 = vpop.f32.mrb[23].mxu1  ;;  %v7625_v38 = vld [vmem:[%s10587_s2 + $0x3d8] ss:$12 sps:$4 sm:$0xff]  }
 0x280   :  { %v7631_v39 = vld [vmem:[%s10587_s2 + $0x3f4] ss:$12 sps:$4 sm:$0xff]  }
 0x284   :  { %v1147_v40 = vpop.f32.mrb[24].mxu0 }
 0x285   :  { %v1149_v41 = vpop.f32.mrb[25].mxu0 }
 0x286   :  { %v1151_v44 = vpop.f32.mrb[26].mxu0 }
 0x287   :  { %v1174_v45 = vpack.c.bf16 %v1151_v44, %v1147_v40  ;;  %v1153_v47 = vpop.f32.mrb[27].mxu0  ;;  %v7608_v40 = vld [vmem:[%s10587_s2 + $0x368] ss:$12 sps:$4 sm:$0xff]   ;;  %v7592_v44 = vld [vmem:[%s10586_s1 + $0x4c] ss:$0 sps:$4 sm:$0xff]  }
 0x288   :  { %v1175_v48 = vpack.c.bf16 %v1153_v47, %v1149_v41  ;;  %v7629_v41 = vld [vmem:[%s10587_s2 + $0x3f0] ss:$12 sps:$4 sm:$0xff]   ;;  %v7616_v47 = vld [vmem:[%s10587_s2 + $0x398] ss:$12 sps:$4 sm:$0xff]  }
 0x28a   :  { %6279 = vmatprep.mubr.msk.bf16.mxu0 %vm656_vm2, %v1175_v48  ;;  %6282 = vmatprep.mubr.msk.bf16.mxu1 %vm656_vm2, %v1175_v48  ;;  %v7620_v48 = vld [vmem:[%s10587_s2 + $0x3b0] ss:$12 sps:$4 sm:$0xff]  }
 0x28b   :  { %1443 = vmatmul.mubr.bf16.vlgmr.msra.gmra.mrb[12].mxu0 %v1174_v45  ;;  %1504 = vmatmul.mubr.bf16.vlgmr.msra.gmra.mrb[24].mxu1 %v1174_v45  ;;  %v7612_v45 = vld [vmem:[%s10587_s2 + $0x380] ss:$12 sps:$4 sm:$0xff]  }
 0x28c   :  { %v1157_v51 = vpop.f32.mrb[28].mxu0  ;;  %1571 = vmatpush1.bf16.msra.mxu1 %v8540_v8  ;;  %1868 = vmatpush1.bf16.msra.mxu0 %v7593_v49  ;;  %v7624_v49 = vld [vmem:[%s10587_s2 + $0x3c8] ss:$12 sps:$4 sm:$0xff]  }
 0x28d   :  { %v1159_v43 = vpop.f32.mrb[29].mxu0  ;;  %1572 = vmatprep.subr.bf16.mxu1 %v8542_v9  ;;  %1869 = vmatprep.subr.bf16.mxu0 %v7599_v50  ;;  %v7628_v50 = vld [vmem:[%s10587_s2 + $0x3e0] ss:$12 sps:$4 sm:$0xff]  }
 0x28e   :  { %v1161_v54 = vpop.f32.mrb[30].mxu0 }
 0x28f   :  { %v1176_v55 = vpack.c.bf16 %v1161_v54, %v1157_v51  ;;  %v1163_v57 = vpop.f32.mrb[31].mxu0  ;;  %v7632_v51 = vld [vmem:[%s10587_s2 + $0x3f8] ss:$12 sps:$4 sm:$0xff]  }
 0x290   :  { %v1177_v59 = vpack.c.bf16 %v1163_v57, %v1159_v43  ;;  %1573 = vmatpush1.bf16.msra.mxu1 %v8560_v14  ;;  %1870 = vmatpush1.bf16.msra.mxu0 %v7597_v52  ;;  %v7635_v52 = vld [vmem:[%s10587_s2 + $0x40c] ss:$12 sps:$4 sm:$0xff]   ;;  %v7633_v43 = vld [vmem:[%s10587_s2 + $0x408] ss:$12 sps:$4 sm:$0xff]  }
 0x291   :  { %1574 = vmatprep.subr.bf16.mxu1 %v8564_v15  ;;  %1871 = vmatprep.subr.bf16.mxu0 %v7603_v53  ;;  %v7636_v53 = vld [vmem:[%s10587_s2 + $0x410] ss:$12 sps:$4 sm:$0xff]  }
 0x292   :  { %6280 = vmatprep.mubr.msk.bf16.mxu0 %vm656_vm2, %v1177_v59  ;;  %6283 = vmatprep.mubr.msk.bf16.mxu1 %vm656_vm2, %v1177_v59 }
 0x293   :  { %1453 = vmatmul.mubr.bf16.gmra.mrb[16].mxu0 %v1176_v55  ;;  %1512 = vmatmul.mubr.bf16.gmra.mrb[28].mxu1 %v1176_v55 }
 0x294   :  { %v1167_v62 = vpop.f32.mrb[32].mxu0  ;;  %1575 = vmatpush1.bf16.msra.mxu1 %v8580_v20  ;;  %1872 = vmatpush1.bf16.msra.mxu0 %v7601_v58 }
 0x295   :  { %v1169_v63 = vpop.f32.mrb[33].mxu0  ;;  %1576 = vmatprep.subr.bf16.mxu1 %v8587_v22  ;;  %1873 = vmatprep.subr.bf16.mxu0 %v7607_v61  ;;  %v1178_v6 = vpack.c.bf16 %v1167_v62, %v1167_v62  ;;  %v7643_v62 = vld [vmem:[%s10587_s2 + $0x428] ss:$12 sps:$4 sm:$0xff]  }
 0x296   :  { %v1179_v1 = vpack.c.bf16 %v1169_v63, %v1169_v63  ;;  %v1171_v2 = vpop.f32.mrb[34].mxu0 }
 0x297   :  { %v1172_v3 = vpop.f32.mrb[35].mxu0 }
 0x298   :  { %1577 = vmatpush1.bf16.msra.mxu1 %v8600_v26  ;;  %6281 = vmatprep.mubr.msk.bf16.mxu0 %vm656_vm2, %v1179_v1 }
 0x299   :  { %6284 = vmatprep.mubr.msk.bf16.mxu1 %vm656_vm2, %v1179_v1  ;;  %1578 = vmatprep.subr.bf16.mxu1 %v8607_v28 }
 0x29a   :  { %1874 = vmatpush1.bf16.msra.mxu0 %v7605_v46 }
 0x29b   :  { %1463 = vmatmul.mubr.bf16.gmra.mrb[20].mxu0 %v1178_v6  ;;  %1520 = vmatmul.mubr.bf16.gmra.mrb[32].mxu1 %v1178_v6 }
 0x29c   :  { %1579 = vmatpush1.bf16.msra.mxu1 %v8620_v32  ;;  %1602 = vmatprep.mubr.bf16.mxu1 %v8320_v0 }
 0x29d   :  { %6293 = vmatprep.subr.msk.bf16.mxu1 %vm222_vm0, %v8624_v33  ;;  %1875 = vmatprep.subr.bf16.mxu0 %v7611_v7 }
 0x29e   :  { %1876 = vmatpush1.bf16.msra.mxu0 %v7609_v10 }
 0x29f   :  { %1877 = vmatprep.subr.bf16.mxu0 %v7615_v11 }
 0x2a0   :  { %1581 = vmatpush1.bf16.msra.mxu1 %v8633_v35 }
 0x2a1   :  { %1928 = vmatprep.subr.bf16.mxu1 %v8320_v0 }
 0x2a2   :  { %1878 = vmatpush1.bf16.msra.mxu0 %v7613_v42 }
 0x2a3   :  { %6294 = vmatmul.mubr.msk.bf16.vlgmr.msra.gmra.mrb[36].mxu1 %vm212_vm1, %v7590_v60  ;;  %1879 = vmatprep.subr.bf16.mxu0 %v7619_v56  ;;  %v7667_v60 = vld [vmem:[%s10587_s2 + $0x4b8] ss:$12 sps:$4 sm:$0xff]   ;;  %v7650_v56 = vld [vmem:[%s10587_s2 + $0x454] ss:$12 sps:$4 sm:$0xff]  }
 0x2a4   :  { %1612 = vmatprep.mubr.bf16.mxu1 %v8320_v0  ;;  %1929 = vmatpush1.bf16.msra.mxu1 %v7596_v5  ;;  %v7671_v5 = vld [vmem:[%s10587_s2 + $0x4d0] ss:$12 sps:$4 sm:$0xff]  }
 0x2a5   :  { %1930 = vmatprep.subr.bf16.mxu1 %v8320_v0 }
 0x2a6   :  { %1880 = vmatpush1.bf16.msra.mxu0 %v7617_v12  ;;  %v7638_v12 = vld [vmem:[%s10586_s1 + $0x58] sm:$0xff]  }
 0x2a7   :  { %1881 = vmatprep.subr.bf16.mxu0 %v7623_v13  ;;  %v7648_v13 = vld [vmem:[%s10587_s2 + $0x450] ss:$12 sps:$4 sm:$0xff]  }
 0x2a8   :  { %1931 = vmatpush1.bf16.msra.mxu1 %v7600_v16  ;;  %v7654_v16 = vld [vmem:[%s10587_s2 + $0x46c] ss:$12 sps:$4 sm:$0xff]  }
 0x2a9   :  { %1932 = vmatprep.subr.bf16.mxu1 %v8320_v0 }
 0x2aa   :  { %1882 = vmatpush1.bf16.msra.mxu0 %v7621_v17  ;;  %v7675_v17 = vld [vmem:[%s10587_s2 + $0x4e8] ss:$12 sps:$4 sm:$0xff]  }
 0x2ab   :  { %6295 = vmatmul.mubr.msk.bf16.gmra.mrb[40].mxu1 %vm212_vm1, %v7591_v18  ;;  %1883 = vmatprep.subr.bf16.mxu0 %v7627_v19  ;;  %v7652_v18 = vld [vmem:[%s10587_s2 + $0x468] ss:$12 sps:$4 sm:$0xff]   ;;  %v7658_v19 = vld [vmem:[%s10587_s2 + $0x484] ss:$12 sps:$4 sm:$0xff]  }
 0x2ac   :  { %1622 = vmatprep.mubr.bf16.mxu1 %v8320_v0  ;;  %1933 = vmatpush1.bf16.msra.mxu1 %v7604_v21  ;;  %v7639_v21 = vld [vmem:[%s10586_s1 + $0x60] ss:$0 sps:$4 sm:$0xff]  }
 0x2ad   :  { %1934 = vmatprep.subr.bf16.mxu1 %v8320_v0 }
 0x2ae   :  { %1884 = vmatpush1.bf16.msra.mxu0 %v7625_v38  ;;  %v7656_v38 = vld [vmem:[%s10587_s2 + $0x480] ss:$12 sps:$4 sm:$0xff]  }
 0x2af   :  { %1885 = vmatprep.subr.bf16.mxu0 %v7631_v39  ;;  %v7662_v39 = vld [vmem:[%s10587_s2 + $0x49c] ss:$12 sps:$4 sm:$0xff]  }
 0x2b0   :  { %1935 = vmatpush1.bf16.msra.mxu1 %v7608_v40  ;;  %v7660_v40 = vld [vmem:[%s10587_s2 + $0x498] ss:$12 sps:$4 sm:$0xff]  }
 0x2b1   :  { %1936 = vmatprep.subr.bf16.mxu1 %v8320_v0 }
 0x2b2   :  { %1886 = vmatpush1.bf16.msra.mxu0 %v7629_v41  ;;  %v7666_v41 = vld [vmem:[%s10587_s2 + $0x4b4] ss:$12 sps:$4 sm:$0xff]  }
 0x2b3   :  { %6296 = vmatmul.mubr.msk.bf16.gmra.mrb[44].mxu1 %vm212_vm1, %v7592_v44  ;;  %1887 = vmatprep.subr.bf16.mxu0 %v7635_v52  ;;  %v7664_v44 = vld [vmem:[%s10587_s2 + $0x4b0] ss:$12 sps:$4 sm:$0xff]   ;;  %v7679_v52 = vld [vmem:[%s10587_s2 + $0x500] ss:$12 sps:$4 sm:$0xff]  }
 0x2b4   :  { %1937 = vmatpush1.bf16.msra.mxu1 %v7612_v45  ;;  %v7670_v45 = vld [vmem:[%s10587_s2 + $0x4cc] ss:$12 sps:$4 sm:$0xff]  }
 0x2b5   :  { %1938 = vmatprep.subr.bf16.mxu1 %v8320_v0 }
 0x2b6   :  { %1888 = vmatpush1.bf16.msra.mxu0 %v7633_v43  ;;  %v7682_v43 = vld [vmem:[%s10587_s2 + $0x514] ss:$12 sps:$4 sm:$0xff]  }
 0x2b7   :  { %2027 = vmatprep.subr.bf16.mxu0 %v8529_v4  ;;  %v7647_v4 = vld [vmem:[%s10587_s2 + $0x440] ss:$12 sps:$4 sm:$0xff]  }
 0x2b8   :  { %1939 = vmatpush1.bf16.msra.mxu1 %v7616_v47  ;;  %v7668_v47 = vld [vmem:[%s10587_s2 + $0x4c8] ss:$12 sps:$4 sm:$0xff]  }
 0x2b9   :  { %1940 = vmatprep.subr.bf16.mxu1 %v8320_v0 }
 0x2bc   :  { %1941 = vmatpush1.bf16.msra.mxu1 %v7620_v48  ;;  %v7674_v48 = vld [vmem:[%s10587_s2 + $0x4e4] ss:$12 sps:$4 sm:$0xff]  }
 0x2bd   :  { %1942 = vmatprep.subr.bf16.mxu1 %v8320_v0 }
 0x2c0   :  { %1943 = vmatpush1.bf16.msra.mxu1 %v7624_v49  ;;  %v7672_v49 = vld [vmem:[%s10587_s2 + $0x4e0] ss:$12 sps:$4 sm:$0xff]  }
 0x2c1   :  { %1944 = vmatprep.subr.bf16.mxu1 %v8320_v0 }
 0x2c4   :  { %1945 = vmatpush1.bf16.msra.mxu1 %v7628_v50  ;;  %v7678_v50 = vld [vmem:[%s10587_s2 + $0x4fc] ss:$12 sps:$4 sm:$0xff]  }
 0x2c5   :  { %1946 = vmatprep.subr.bf16.mxu1 %v8320_v0 }
 0x2c8   :  { %1947 = vmatpush1.bf16.msra.mxu1 %v7632_v51  ;;  %v7676_v51 = vld [vmem:[%s10587_s2 + $0x4f8] ss:$12 sps:$4 sm:$0xff]  }
 0x2c9   :  { %1948 = vmatprep.subr.bf16.mxu1 %v8320_v0 }
 0x2cc   :  { %1949 = vmatpush1.bf16.msra.mxu1 %v7636_v53  ;;  %v7680_v53 = vld [vmem:[%s10587_s2 + $0x510] ss:$12 sps:$4 sm:$0xff]  }
 0x2cd   :  { %2385 = vmatprep.subr.bf16.mxu1 %v8320_v0 }
 0x376   :  { %v1604_v54 = vpop.f32.mrb[36].mxu1 }
 0x377   :  { %v1606_v55 = vpop.f32.mrb[37].mxu1 }
 0x378   :  { %v1608_v57 = vpop.f32.mrb[38].mxu1 }
 0x379   :  { %v1631_v59 = vpack.c.bf16 %v1608_v57, %v1604_v54  ;;  %v1610_v58 = vpop.f32.mrb[39].mxu1  ;;  %v7683_v54 = vld [vmem:[%s10587_s2 + $0x518] ss:$12 sps:$4 sm:$0xff]  }
 0x37a   :  { %v1632_v61 = vpack.c.bf16 %v1610_v58, %v1606_v55 }
 0x37c   :  { %6374 = vmatprep.mubr.msk.bf16.mxu0 %vm656_vm2, %v1632_v61  ;;  %6377 = vmatprep.mubr.msk.bf16.mxu1 %vm656_vm2, %v1632_v61 }
 0x37d   :  { %1900 = vmatmul.mubr.bf16.vlgmr.msra.gmra.mrb[12].mxu0 %v1631_v59  ;;  %1961 = vmatmul.mubr.bf16.vlgmr.msra.gmra.mrb[24].mxu1 %v1631_v59 }
 0x37e   :  { %v1614_v63 = vpop.f32.mrb[40].mxu1  ;;  %2028 = vmatpush1.bf16.msra.mxu0 %v8540_v8  ;;  %2386 = vmatpush1.bf16.msra.mxu1 %v7643_v62  ;;  %v7651_v8 = vld [vmem:[%s10587_s2 + $0x458] ss:$12 sps:$4 sm:$0xff]  }
 0x37f   :  { %v1616_v1 = vpop.f32.mrb[41].mxu1  ;;  %2029 = vmatprep.subr.bf16.mxu0 %v8542_v9  ;;  %2387 = vmatprep.subr.bf16.mxu1 %v8320_v0 }
 0x380   :  { %v1618_v2 = vpop.f32.mrb[42].mxu1 }
 0x381   :  { %v1633_v46 = vpack.c.bf16 %v1618_v2, %v1614_v63  ;;  %v1620_v3 = vpop.f32.mrb[43].mxu1 }
 0x382   :  { %v1634_v6 = vpack.c.bf16 %v1620_v3, %v1616_v1  ;;  %2030 = vmatpush1.bf16.msra.mxu0 %v8560_v14  ;;  %2388 = vmatpush1.bf16.msra.mxu1 %v7647_v4 }
 0x383   :  { %2031 = vmatprep.subr.bf16.mxu0 %v8564_v15  ;;  %2389 = vmatprep.subr.bf16.mxu1 %v8320_v0  ;;  %v7655_v15 = vld [vmem:[%s10587_s2 + $0x470] ss:$12 sps:$4 sm:$0xff]  }
 0x384   :  { %6375 = vmatprep.mubr.msk.bf16.mxu0 %vm656_vm2, %v1634_v6  ;;  %6378 = vmatprep.mubr.msk.bf16.mxu1 %vm656_vm2, %v1634_v6 }
 0x385   :  { %1910 = vmatmul.mubr.bf16.gmra.mrb[16].mxu0 %v1633_v46  ;;  %1969 = vmatmul.mubr.bf16.gmra.mrb[28].mxu1 %v1633_v46 }
 0x386   :  { %v1624_v9 = vpop.f32.mrb[44].mxu1  ;;  %2032 = vmatpush1.bf16.msra.mxu0 %v8580_v20  ;;  %2390 = vmatpush1.bf16.msra.mxu1 %v7651_v8  ;;  %v7659_v20 = vld [vmem:[%s10587_s2 + $0x488] ss:$12 sps:$4 sm:$0xff]  }
 0x387   :  { %v1626_v14 = vpop.f32.mrb[45].mxu1  ;;  %2033 = vmatprep.subr.bf16.mxu0 %v8587_v22  ;;  %2391 = vmatprep.subr.bf16.mxu1 %v8320_v0  ;;  %v1635_v42 = vpack.c.bf16 %v1624_v9, %v1624_v9  ;;  %v7642_v22 = vld [vmem:[%s10587_s2 + $0x424] ss:$12 sps:$4 sm:$0xff]  }
 0x388   :  { %v1636_v7 = vpack.c.bf16 %v1626_v14, %v1626_v14  ;;  %v1628_v10 = vpop.f32.mrb[46].mxu1 }
 0x389   :  { %v1629_v11 = vpop.f32.mrb[47].mxu1 }
 0x38a   :  { %2034 = vmatpush1.bf16.msra.mxu0 %v8600_v26  ;;  %6376 = vmatprep.mubr.msk.bf16.mxu0 %vm656_vm2, %v1636_v7  ;;  %v7663_v26 = vld [vmem:[%s10587_s2 + $0x4a0] ss:$12 sps:$4 sm:$0xff]  }
 0x38b   :  { %6379 = vmatprep.mubr.msk.bf16.mxu1 %vm656_vm2, %v1636_v7  ;;  %2035 = vmatprep.subr.bf16.mxu0 %v8607_v28  ;;  %v7637_v28 = vld [vmem:[%s10586_s1 + $0x50] sm:$0xff]  }
 0x38c   :  { %2392 = vmatpush1.bf16.msra.mxu1 %v7655_v15  ;;  %v2458_v15 = vlaneseq }
 0x38d   :  { %1920 = vmatmul.mubr.bf16.gmra.mrb[20].mxu0 %v1635_v42  ;;  %1977 = vmatmul.mubr.bf16.gmra.mrb[32].mxu1 %v1635_v42 }
 0x38e   :  { %2036 = vmatpush1.bf16.msra.mxu0 %v8620_v32  ;;  %2059 = vmatprep.mubr.bf16.mxu0 %v8320_v0  ;;  %v7640_v32 = vld [vmem:[%s10587_s2 + $0x420] ss:$12 sps:$4 sm:$0xff]   ;;  %v2459_v11 = vshrl.u32 %v2458_v15, 7 }
 0x38f   :  { %6388 = vmatprep.subr.msk.bf16.mxu0 %vm222_vm0, %v8624_v33  ;;  %2393 = vmatprep.subr.bf16.mxu1 %v8320_v0  ;;  %v7646_v33 = vld [vmem:[%s10587_s2 + $0x43c] ss:$12 sps:$4 sm:$0xff]  }
 0x390   :  { %2394 = vmatpush1.bf16.msra.mxu1 %v7659_v20  ;;  %v2468_v42 = vsub.s32 2, %v2459_v11  ;;  %v2456_v20 = vld [vmem:[#allocation2] sm:$0x7] }
 0x391   :  { %2395 = vmatprep.subr.bf16.mxu1 %v8320_v0 }
 0x392   :  { %2038 = vmatpush1.bf16.msra.mxu0 %v8633_v35  ;;  %v7644_v35 = vld [vmem:[%s10587_s2 + $0x438] ss:$12 sps:$4 sm:$0xff]  }
 0x393   :  { %2324 = vmatprep.subr.bf16.mxu0 %v7642_v22  ;;  %v9399_v22 = vsub.s32 0, %v2459_v11 }
 0x394   :  { %2396 = vmatpush1.bf16.msra.mxu1 %v7663_v26  ;;  %v2488_v26 = vld [vmem:[#allocation5] sm:$0x7] }
 0x395   :  { %6389 = vmatmul.mubr.msk.bf16.vlgmr.msra.gmra.mrb[36].mxu0 %vm212_vm1, %v7637_v28  ;;  %2397 = vmatprep.subr.bf16.mxu1 %v8320_v0  ;;  %v9401_v28 = vsub.s32 1, %v2459_v11 }
 0x396   :  { %2069 = vmatprep.mubr.bf16.mxu0 %v8320_v0  ;;  %2325 = vmatpush1.bf16.msra.mxu0 %v7640_v32  ;;  %v9403_v32 = vrot.slane %v2456_v20, %v2468_v42 }
 0x397   :  { %2326 = vmatprep.subr.bf16.mxu0 %v7646_v33  ;;  %v9406_v33 = vrot.slane %v2456_v20, %v9399_v22 }
 0x398   :  { %2398 = vmatpush1.bf16.msra.mxu1 %v7667_v60  ;;  %v9408_v60 = vrot.slane %v2488_v26, %v2468_v42 }
 0x399   :  { %2399 = vmatprep.subr.bf16.mxu1 %v8320_v0 }
 0x39a   :  { %2327 = vmatpush1.bf16.msra.mxu0 %v7644_v35 }
 0x39b   :  { %2328 = vmatprep.subr.bf16.mxu0 %v7650_v56 }
 0x39c   :  { %2400 = vmatpush1.bf16.msra.mxu1 %v7671_v5  ;;  %v9411_v5 = vrot.slane %v2456_v20, %v9401_v28 }
 0x39d   :  { %6390 = vmatmul.mubr.msk.bf16.gmra.mrb[40].mxu0 %vm212_vm1, %v7638_v12  ;;  %2401 = vmatprep.subr.bf16.mxu1 %v8320_v0 }
 0x39e   :  { %2079 = vmatprep.mubr.bf16.mxu0 %v8320_v0  ;;  %2329 = vmatpush1.bf16.msra.mxu0 %v7648_v13  ;;  %v9415_v13 = vrot.slane %v2488_v26, %v9399_v22 }
 0x39f   :  { %2330 = vmatprep.subr.bf16.mxu0 %v7654_v16 }
 0x3a0   :  { %2402 = vmatpush1.bf16.msra.mxu1 %v7675_v17 }
 0x3a1   :  { %2403 = vmatprep.subr.bf16.mxu1 %v8320_v0 }
 0x3a2   :  { %2331 = vmatpush1.bf16.msra.mxu0 %v7652_v18 }
 0x3a3   :  { %2332 = vmatprep.subr.bf16.mxu0 %v7658_v19 }
 0x3a4   :  { %2404 = vmatpush1.bf16.msra.mxu1 %v7679_v52 }
 0x3a5   :  { %6391 = vmatmul.mubr.msk.bf16.gmra.mrb[44].mxu0 %vm212_vm1, %v7639_v21  ;;  %2405 = vmatprep.subr.bf16.mxu1 %v8320_v0  ;;  %v9420_v21 = vrot.slane %v2488_v26, %v9401_v28 }
 0x3a6   :  { %2333 = vmatpush1.bf16.msra.mxu0 %v7656_v38 }
 0x3a7   :  { %2334 = vmatprep.subr.bf16.mxu0 %v7662_v39 }
 0x3a8   :  { %2406 = vmatpush1.bf16.msra.mxu1 %v7683_v54 }
 0x3aa   :  { %2335 = vmatpush1.bf16.msra.mxu0 %v7660_v40 }
 0x3ab   :  { %2336 = vmatprep.subr.bf16.mxu0 %v7666_v41 }
 0x3ae   :  { %2337 = vmatpush1.bf16.msra.mxu0 %v7664_v44 }
 0x3af   :  { %2338 = vmatprep.subr.bf16.mxu0 %v7670_v45 }
 0x3b2   :  { %2339 = vmatpush1.bf16.msra.mxu0 %v7668_v47 }
 0x3b3   :  { %2340 = vmatprep.subr.bf16.mxu0 %v7674_v48 }
 0x3b6   :  { %2341 = vmatpush1.bf16.msra.mxu0 %v7672_v49 }
 0x3b7   :  { %2342 = vmatprep.subr.bf16.mxu0 %v7678_v50 }
 0x3ba   :  { %2343 = vmatpush1.bf16.msra.mxu0 %v7676_v51 }
 0x3bb   :  { %2344 = vmatprep.subr.bf16.mxu0 %v7682_v43 }
 0x3be   :  { %2345 = vmatpush1.bf16.msra.mxu0 %v7680_v53 }
 0x468   :  { %v2061_v55 = vpop.f32.mrb[36].mxu0 }
 0x469   :  { %v2063_v57 = vpop.f32.mrb[37].mxu0 }
 0x46a   :  { %v2065_v59 = vpop.f32.mrb[38].mxu0 }
 0x46b   :  { %v2088_v58 = vpack.c.bf16 %v2065_v59, %v2061_v55  ;;  %v2067_v61 = vpop.f32.mrb[39].mxu0 }
 0x46c   :  { %v2089_v62 = vpack.c.bf16 %v2067_v61, %v2063_v57 }
 0x46e   :  { %6469 = vmatprep.mubr.msk.bf16.mxu0 %vm656_vm2, %v2089_v62  ;;  %6472 = vmatprep.mubr.msk.bf16.mxu1 %vm656_vm2, %v2089_v62 }
 0x46f   :  { %2357 = vmatmul.mubr.bf16.vlgmr.msra.gmra.mrb[12].mxu0 %v2088_v58  ;;  %2418 = vmatmul.mubr.bf16.vlgmr.msra.gmra.mrb[24].mxu1 %v2088_v58 }
 0x470   :  { %v2071_v63 = vpop.f32.mrb[40].mxu0 }
 0x471   :  { %v2073_v4 = vpop.f32.mrb[41].mxu0 }
 0x472   :  { %v2075_v1 = vpop.f32.mrb[42].mxu0 }
 0x473   :  { %v2090_v2 = vpack.c.bf16 %v2075_v1, %v2071_v63  ;;  %v2077_v46 = vpop.f32.mrb[43].mxu0 }
 0x474   :  { %v2091_v3 = vpack.c.bf16 %v2077_v46, %v2073_v4 }
 0x476   :  { %6470 = vmatprep.mubr.msk.bf16.mxu0 %vm656_vm2, %v2091_v3  ;;  %6473 = vmatprep.mubr.msk.bf16.mxu1 %vm656_vm2, %v2091_v3 }
 0x477   :  { %2367 = vmatmul.mubr.bf16.gmra.mrb[16].mxu0 %v2090_v2  ;;  %2426 = vmatmul.mubr.bf16.gmra.mrb[28].mxu1 %v2090_v2 }
 0x478   :  { %v2081_v6 = vpop.f32.mrb[44].mxu0 }
 0x479   :  { %v2083_v8 = vpop.f32.mrb[45].mxu0  ;;  %v2092_v10 = vpack.c.bf16 %v2081_v6, %v2081_v6 }
 0x47a   :  { %v2093_v9 = vpack.c.bf16 %v2083_v8, %v2083_v8  ;;  %v2085_v14 = vpop.f32.mrb[46].mxu0 }
 0x47b   :  { %v2086_v7 = vpop.f32.mrb[47].mxu0 }
 0x47c   :  { %6471 = vmatprep.mubr.msk.bf16.mxu0 %vm656_vm2, %v2093_v9  ;;  %6474 = vmatprep.mubr.msk.bf16.mxu1 %vm656_vm2, %v2093_v9 }
 0x47f   :  { %2377 = vmatmul.mubr.bf16.gmra.mrb[20].mxu0 %v2092_v10  ;;  %2434 = vmatmul.mubr.bf16.gmra.mrb[32].mxu1 %v2092_v10 }
 0x480   :  { %2611 = vmatprep.mubr.bf16.mxu1 %v8320_v0  ;;  %2749 = vmatprep.mubr.bf16.mxu0 %v8320_v0 }
 0x542   :  { %v2358_v35 = vpop.f32.mrb[12].mxu0  ;;  %v2419_v56 = vpop.f32.mrb[24].mxu1 }
 0x543   :  { %v7304_v12 = vadd.f32 %v2358_v35, %v9087_v23  ;;  %v2475_v16 = vmul.f32 %v9403_v32, %v2419_v56  ;;  %v2360_v17 = vpop.f32.mrb[13].mxu0  ;;  %v2421_v18 = vpop.f32.mrb[25].mxu1 }
 0x544   :  { %v7305_v19 = vadd.f32 %v2360_v17, %v9089_v24  ;;  %v2362_v38 = vpop.f32.mrb[14].mxu0  ;;  %v2422_v39 = vpop.f32.mrb[26].mxu1 }
 0x545   :  { %v2473_v40 = vmul.f32 %v7304_v12, %v9406_v33  ;;  %v2507_v41 = vadd.f32 %v9408_v60, %v2475_v16  ;;  %v7306_v23 = vadd.f32 %v2362_v38, %v9091_v25  ;;  %v2478_v44 = vmul.f32 %v9403_v32, %v2422_v39  ;;  %v2364_v45 = vpop.f32.mrb[15].mxu0  ;;  %v2424_v47 = vpop.f32.mrb[27].mxu1 }
 0x546   :  { %v2474_v48 = vmul.f32 %v7305_v19, %v9411_v5  ;;  %v7307_v49 = vadd.f32 %v2364_v45, %v9093_v27 }
 0x547   :  { %v2505_v24 = vadd.f32 %v9415_v13, %v2473_v40  ;;  %v2522_v50 = vmax.f32 %v2507_v41, 0.0  ;;  %v2476_v51 = vmul.f32 %v7306_v23, %v9406_v33  ;;  %v2510_v52 = vadd.f32 %v9408_v60, %v2478_v44 }
 0x548   :  { %v2506_v43 = vadd.f32 %v9420_v21, %v2474_v48  ;;  %v2477_v53 = vmul.f32 %v7307_v49, %v9411_v5 }
 0x549   :  { %v2520_v25 = vmax.f32 %v2505_v24, 0.0  ;;  %v2508_v54 = vadd.f32 %v9415_v13, %v2476_v51  ;;  %v2525_v55 = vmax.f32 %v2510_v52, 0.0  ;;  %v2537_v57 = vmin.f32 %v2522_v50, 6.0 }
 0x54a   :  { %v2521_v59 = vmax.f32 %v2506_v43, 0.0  ;;  %v2509_v58 = vadd.f32 %v9420_v21, %v2477_v53  ;;  %v2368_v27 = vpop.f32.mrb[16].mxu0  ;;  %v2427_v61 = vpop.f32.mrb[28].mxu1 }
 0x54b   :  { %v2535_v62 = vmin.f32 %v2520_v25, 6.0  ;;  %v2523_v63 = vmax.f32 %v2508_v54, 0.0  ;;  %v2540_v4 = vmin.f32 %v2525_v55, 6.0  ;;  %v7308_v1 = vadd.f32 %v2368_v27, %v9095_v29  ;;  %v2370_v2 = vpop.f32.mrb[17].mxu0  ;;  %v2429_v46 = vpop.f32.mrb[29].mxu1 }
 0x54c   :  { %v2536_v3 = vmin.f32 %v2521_v59, 6.0  ;;  %v2524_v6 = vmax.f32 %v2509_v58, 0.0  ;;  %v2481_v8 = vmul.f32 %v9403_v32, %v2427_v61  ;;  %v7309_v9 = vadd.f32 %v2370_v2, %v9097_v30  ;;  %v2372_v14 = vpop.f32.mrb[18].mxu0  ;;  %v2430_v7 = vpop.f32.mrb[30].mxu1 }
 0x54d   :  { %v2538_v10 = vmin.f32 %v2523_v63, 6.0  ;;  %v9438_v15 = vpack.c.bf16 %v2540_v4, %v2537_v57  ;;  %v2479_v11 = vmul.f32 %v7308_v1, %v9406_v33  ;;  %v7310_v42 = vadd.f32 %v2372_v14, %v9099_v31  ;;  %v2374_v20 = vpop.f32.mrb[19].mxu0  ;;  %v2432_v26 = vpop.f32.mrb[31].mxu1 }
 0x54e   :  { %v2539_v29 = vmin.f32 %v2524_v6, 6.0  ;;  %v2513_v35 = vadd.f32 %v9408_v60, %v2481_v8  ;;  %v2480_v56 = vmul.f32 %v7309_v9, %v9411_v5  ;;  %v2484_v12 = vmul.f32 %v9403_v32, %v2430_v7 }
 0x54f   :  { %v9445_v16 = vpack.c.bf16 %v2538_v10, %v2535_v62  ;;  %v2511_v30 = vadd.f32 %v9415_v13, %v2479_v11  ;;  %v2482_v17 = vmul.f32 %v7310_v42, %v9406_v33  ;;  %v7311_v18 = vadd.f32 %v2374_v20, %v9101_v34  ;;  %v7685_v10 = vld [vmem:[#allocation7 + $0x8] sm:$0xff]   ;;  %v7689_v42 = vld [vmem:[%s10591_s6 + $0x140] ss:$8 sps:$4 sm:$0xff]  }
 0x550   :  { %v9450_v19 = vpack.c.bf16 %v2539_v29, %v2536_v3  ;;  %v2528_v31 = vmax.f32 %v2513_v35, 0.0  ;;  %v2512_v38 = vadd.f32 %v9420_v21, %v2480_v56  ;;  %v2516_v39 = vadd.f32 %v9408_v60, %v2484_v12  ;;  %v7694_v20 = vld [vmem:[%s10591_s6 + $0x154] ss:$8 sps:$4 sm:$0xff]   ;;  %v7692_v29 = vld [vmem:[%s10591_s6 + $0x150] ss:$8 sps:$4 sm:$0xff]  }
 0x551   :  { %v2526_v40 = vmax.f32 %v2511_v30, 0.0  ;;  %v2514_v41 = vadd.f32 %v9415_v13, %v2482_v17  ;;  %v2483_v23 = vmul.f32 %v7311_v18, %v9411_v5  ;;  %v8321_v11 = vmov 0.0   ;;  %v7697_v35 = vld [vmem:[%s10591_s6 + $0x164] ss:$8 sps:$4 sm:$0xff]   ;;  %v7695_v12 = vld [vmem:[%s10591_s6 + $0x160] ss:$8 sps:$4 sm:$0xff]  }
 0x552   :  { %v2531_v44 = vmax.f32 %v2516_v39, 0.0  ;;  %v2378_v45 = vpop.f32.mrb[20].mxu0  ;;  %v2435_v47 = vpop.f32.mrb[32].mxu1  ;;  %2579 = vmatprep.subr.bf16.mxu1 %v9450_v19  ;;  %2717 = vmatprep.subr.bf16.mxu0 %v9450_v19  ;;  %v2527_v34 = vmax.f32 %v2512_v38, 0.0  ;;  %v2543_v52 = vmin.f32 %v2528_v31, 6.0 }
 0x553   :  { %v2529_v48 = vmax.f32 %v2514_v41, 0.0  ;;  %v2515_v49 = vadd.f32 %v9420_v21, %v2483_v23  ;;  %v7312_v24 = vadd.f32 %v2378_v45, %v9103_v36  ;;  %v2380_v50 = vpop.f32.mrb[21].mxu0  ;;  %v2437_v51 = vpop.f32.mrb[33].mxu1  ;;  %2580 = vmatpush1.bf16.msra.mxu1 %v9445_v16  ;;  %2718 = vmatpush1.bf16.msra.mxu0 %v9445_v16  ;;  %v2541_v55 = vmin.f32 %v2526_v40, 6.0  ;;  %v7700_v30 = vld [vmem:[%s10591_s6 + $0x174] ss:$8 sps:$4 sm:$0xff]  }
 0x554   :  { %v2546_v43 = vmin.f32 %v2531_v44, 6.0  ;;  %v7313_v53 = vadd.f32 %v2380_v50, %v9105_v37  ;;  %v2382_v25 = vpop.f32.mrb[22].mxu0  ;;  %v2438_v54 = vpop.f32.mrb[34].mxu1  ;;  %v2542_v63 = vmin.f32 %v2527_v34, 6.0  ;;  %v2487_v37 = vmul.f32 %v9403_v32, %v2435_v47  ;;  %v7698_v18 = vld [vmem:[%s10591_s6 + $0x170] ss:$8 sps:$4 sm:$0xff]  }
 0x555   :  { %v2544_v57 = vmin.f32 %v2529_v48, 6.0  ;;  %v2530_v59 = vmax.f32 %v2515_v49, 0.0  ;;  %v2485_v58 = vmul.f32 %v7312_v24, %v9406_v33  ;;  %v2383_v27 = vpop.f32.mrb[23].mxu0  ;;  %v2439_v61 = vpop.f32.mrb[35].mxu1  ;;  %v7703_v31 = vld [vmem:[%s10591_s6 + $0x184] ss:$8 sps:$4 sm:$0xff]  }
 0x556   :  { %v9464_v36 = vpack.c.bf16 %v2546_v43, %v2543_v52  ;;  %v2486_v62 = vmul.f32 %v7313_v53, %v9411_v5  ;;  %v2519_v5 = vadd.f32 %v9408_v60, %v2487_v37  ;;  %v7684_v60 = vld [vmem:[#allocation7] sm:$0xff]   ;;  %v7706_v39 = vld [vmem:[%s10591_s6 + $0x194] ss:$8 sps:$4 sm:$0xff]   ;;  %v7704_v40 = vld [vmem:[%s10591_s6 + $0x190] ss:$8 sps:$4 sm:$0xff]  }
 0x557   :  { %v9467_v4 = vpack.c.bf16 %v2544_v57, %v2541_v55  ;;  %v2545_v1 = vmin.f32 %v2530_v59, 6.0  ;;  %v2517_v2 = vadd.f32 %v9415_v13, %v2485_v58  ;;  %v7701_v38 = vld [vmem:[%s10591_s6 + $0x180] ss:$8 sps:$4 sm:$0xff]   ;;  %v7709_v41 = vld [vmem:[%s10591_s6 + $0x1a4] ss:$8 sps:$4 sm:$0xff]   ;;  %v7686_v49 = vld [vmem:[#allocation7 + $0x10] sm:$0xff]  }
 0x558   :  { %v2518_v46 = vadd.f32 %v9420_v21, %v2486_v62  ;;  %v7691_v21 = vld [vmem:[%s10591_s6 + $0x144] ss:$8 sps:$4 sm:$0xff]   ;;  %v2534_v7 = vmax.f32 %v2519_v5, 0.0  ;;  %v7707_v23 = vld [vmem:[%s10591_s6 + $0x1a0] ss:$8 sps:$4 sm:$0xff]  }
 0x559   :  { %v9472_v3 = vpack.c.bf16 %v2545_v1, %v2542_v63  ;;  %v2532_v6 = vmax.f32 %v2517_v2, 0.0  ;;  %v7712_v44 = vld [vmem:[%s10591_s6 + $0x1b4] ss:$8 sps:$4 sm:$0xff]   ;;  %v7710_v45 = vld [vmem:[%s10591_s6 + $0x1b0] ss:$8 sps:$4 sm:$0xff]   ;;  %v7687_v57 = vld [vmem:[#allocation7 + $0x18] sm:$0xff]  }
 0x55a   :  { %v2533_v33 = vmax.f32 %v2518_v46, 0.0  ;;  %v2549_v26 = vmin.f32 %v2534_v7, 6.0  ;;  %v7715_v47 = vld [vmem:[%s10591_s6 + $0x1c4] ss:$8 sps:$4 sm:$0xff]   ;;  %v7713_v34 = vld [vmem:[%s10591_s6 + $0x1c0] ss:$8 sps:$4 sm:$0xff]  }
 0x55b   :  { %v2547_v8 = vmin.f32 %v2532_v6, 6.0  ;;  %2581 = vmatprep.subr.bf16.mxu1 %v9472_v3  ;;  %2719 = vmatprep.subr.bf16.mxu0 %v9472_v3  ;;  %v7718_v48 = vld [vmem:[%s10591_s6 + $0x1d4] ss:$8 sps:$4 sm:$0xff]   ;;  %v7716_v24 = vld [vmem:[%s10591_s6 + $0x1d0] ss:$8 sps:$4 sm:$0xff]   ;;  %v7688_v59 = vld [vmem:[#allocation7 + $0x20] sm:$0xff]  }
 0x55c   :  { %v2548_v9 = vmin.f32 %v2533_v33, 6.0  ;;  %2582 = vmatpush1.bf16.msra.mxu1 %v9467_v4  ;;  %2720 = vmatpush1.bf16.msra.mxu0 %v9467_v4  ;;  %v2558_v56 = vpack.c.bf16 %v2549_v26, %v2549_v26  ;;  %v7721_v50 = vld [vmem:[%s10591_s6 + $0x1e4] ss:$8 sps:$4 sm:$0xff]   ;;  %v7719_v51 = vld [vmem:[%s10591_s6 + $0x1e0] ss:$8 sps:$4 sm:$0xff]  }
 0x55d   :  { %v2556_v13 = vpack.c.bf16 %v2547_v8, %v2547_v8  ;;  %v7724_v52 = vld [vmem:[%s10591_s6 + $0x1f4] ss:$8 sps:$4 sm:$0xff]   ;;  %v7722_v43 = vld [vmem:[%s10591_s6 + $0x1f0] ss:$8 sps:$4 sm:$0xff]   ;;  %v7727_v53 = vld [vmem:[%s10591_s6 + $0x204] ss:$8 sps:$4 sm:$0xff]  }
 0x55e   :  { %v9479_v32 = vpack.c.bf16 %v2548_v9, %v2548_v9  ;;  %v9521_v17 = vsel %vm222_vm0, %v2558_v56, 0  ;;  %v7725_v25 = vld [vmem:[%s10591_s6 + $0x200] ss:$8 sps:$4 sm:$0xff]   ;;  %v7730_v54 = vld [vmem:[%s10591_s6 + $0x214] ss:$8 sps:$4 sm:$0xff]  }
 0x55f   :  { %v9485_v14 = vsel %vm222_vm0, %v2556_v13, 0  ;;  %v7728_v55 = vld [vmem:[%s10591_s6 + $0x210] ss:$8 sps:$4 sm:$0xff]   ;;  %v7736_v27 = vld [vmem:[%s10591_s6 + $0x234] ss:$8 sps:$4 sm:$0xff]  }
 0x560   :  { %6476 = vmatprep.subr.msk.bf16.mxu1 %vm222_vm0, %v9479_v32  ;;  %6480 = vmatprep.subr.msk.bf16.mxu0 %vm222_vm0, %v9479_v32  ;;  %v7734_v58 = vld [vmem:[%s10591_s6 + $0x230] ss:$8 sps:$4 sm:$0xff]   ;;  %v7737_v8 = vld [vmem:[%s10591_s6 + $0x240] ss:$8 sps:$4 sm:$0xff]   ;;  %v7742_v5 = vld [vmem:[%s10591_s6 + $0x254] ss:$8 sps:$4 sm:$0xff]  }
 0x561   :  { %2584 = vmatpush1.bf16.msra.mxu1 %v9485_v14  ;;  %2722 = vmatpush1.bf16.msra.mxu0 %v9485_v14  ;;  %v7740_v9 = vld [vmem:[%s10591_s6 + $0x250] ss:$8 sps:$4 sm:$0xff]   ;;  %v7745_v13 = vld [vmem:[%s10591_s6 + $0x264] ss:$8 sps:$4 sm:$0xff]   ;;  %v7748_v7 = vld [vmem:[%s10591_s6 + $0x274] ss:$8 sps:$4 sm:$0xff]  }
 0x562   :  { %7230 = vmatprep.subr.bf16.mxu1 %v8321_v11  ;;  %3049 = vmatprep.subr.bf16.mxu0 %v7691_v21  ;;  %v7743_v21 = vld [vmem:[%s10591_s6 + $0x260] ss:$8 sps:$4 sm:$0xff]   ;;  %v7751_v26 = vld [vmem:[%s10591_s6 + $0x4] ss:$8 sps:$4 sm:$0xff]  }
 0x564   :  { %6477 = vmatmul.mubr.msk.bf16.vlgmr.msra.gmra.mrb[48].mxu1 %vm2566_vm3, %v7684_v60  ;;  %6481 = vmatmul.mubr.msk.bf16.vlgmr.msra.gmra.mrb[48].mxu0 %vm2566_vm3, %v7685_v10 }
 0x565   :  { %7231 = vmatpush3.bf16.msra.mxu1 %v9438_v15  ;;  %7236 = vmatprep.mubr.msk.bf16.mxu1 %vm8322_vm4, %v8321_v11 }
 0x566   :  { %7232 = vmatprep.subr.bf16.mxu1 %v8321_v11  ;;  %3050 = vmatpush1.bf16.msra.mxu0 %v7689_v42 }
 0x567   :  { %3051 = vmatprep.subr.bf16.mxu0 %v7694_v20  ;;  %v7746_v20 = vld [vmem:[%s10591_s6 + $0x270] ss:$8 sps:$4 sm:$0xff]  }
 0x569   :  { %7233 = vmatpush3.bf16.msra.mxu1 %v9464_v36 }
 0x56a   :  { %7234 = vmatprep.subr.bf16.mxu1 %v8321_v11  ;;  %3052 = vmatpush1.bf16.msra.mxu0 %v7692_v29 }
 0x56b   :  { %3053 = vmatprep.subr.bf16.mxu0 %v7697_v35 }
 0x56d   :  { %7235 = vmatpush3.bf16.msra.mxu1 %v9521_v17 }
 0x56e   :  { %7240 = vmatprep.subr.bf16.mxu1 %v8321_v11  ;;  %3054 = vmatpush1.bf16.msra.mxu0 %v7695_v12  ;;  %v7749_v12 = vld [vmem:[%s10591_s6] ss:$8 sps:$4 sm:$0xff]  }
 0x56f   :  { %3055 = vmatprep.subr.bf16.mxu0 %v7700_v30 }
 0x570   :  { %7237 = vmatmul.mubr.msk.bf16.vlgmr.msra.gmra.mrb[52].mxu1 %vm2566_vm3, %v7684_v60 }
 0x571   :  { %7241 = vmatpush3.bf16.msra.mxu1 %v9438_v15  ;;  %7246 = vmatprep.mubr.msk.bf16.mxu1 %vm8322_vm4, %v8321_v11 }
 0x572   :  { %7242 = vmatprep.subr.bf16.mxu1 %v8321_v11  ;;  %3056 = vmatpush1.bf16.msra.mxu0 %v7698_v18  ;;  %v7754_v18 = vld [vmem:[%s10591_s6 + $0x14] ss:$8 sps:$4 sm:$0xff]  }
 0x573   :  { %3057 = vmatprep.subr.bf16.mxu0 %v7703_v31  ;;  %v7752_v31 = vld [vmem:[%s10591_s6 + $0x10] ss:$8 sps:$4 sm:$0xff]  }
 0x575   :  { %7243 = vmatpush3.bf16.msra.mxu1 %v9464_v36 }
 0x576   :  { %7244 = vmatprep.subr.bf16.mxu1 %v8321_v11  ;;  %3058 = vmatpush1.bf16.msra.mxu0 %v7701_v38  ;;  %v7757_v38 = vld [vmem:[%s10591_s6 + $0x24] ss:$8 sps:$4 sm:$0xff]  }
 0x577   :  { %3059 = vmatprep.subr.bf16.mxu0 %v7706_v39  ;;  %v7755_v39 = vld [vmem:[%s10591_s6 + $0x20] ss:$8 sps:$4 sm:$0xff]  }
 0x579   :  { %7245 = vmatpush3.bf16.msra.mxu1 %v9521_v17 }
 0x57a   :  { %3435 = vmatprep.subr.bf16.mxu1 %v9450_v19  ;;  %3060 = vmatpush1.bf16.msra.mxu0 %v7704_v40  ;;  %v7760_v40 = vld [vmem:[%s10591_s6 + $0x34] ss:$8 sps:$4 sm:$0xff]  }
 0x57b   :  { %3061 = vmatprep.subr.bf16.mxu0 %v7709_v41 }
 0x57c   :  { %7247 = vmatmul.mubr.msk.bf16.vlgmr.msra.gmra.mrb[56].mxu1 %vm2566_vm3, %v7685_v10 }
 0x57d   :  { %3436 = vmatpush1.bf16.msra.mxu1 %v9445_v16  ;;  %3467 = vmatprep.mubr.bf16.mxu1 %v8320_v0 }
 0x57e   :  { %3437 = vmatprep.subr.bf16.mxu1 %v9472_v3  ;;  %3062 = vmatpush1.bf16.msra.mxu0 %v7707_v23 }
 0x57f   :  { %3063 = vmatprep.subr.bf16.mxu0 %v7712_v44  ;;  %v7758_v44 = vld [vmem:[%s10591_s6 + $0x30] ss:$8 sps:$4 sm:$0xff]  }
 0x581   :  { %3438 = vmatpush1.bf16.msra.mxu1 %v9467_v4 }
 0x582   :  { %6606 = vmatprep.subr.msk.bf16.mxu1 %vm222_vm0, %v9479_v32  ;;  %3064 = vmatpush1.bf16.msra.mxu0 %v7710_v45 }
 0x583   :  { %3065 = vmatprep.subr.bf16.mxu0 %v7715_v47  ;;  %v7763_v47 = vld [vmem:[%s10591_s6 + $0x44] ss:$8 sps:$4 sm:$0xff]  }
 0x585   :  { %3440 = vmatpush1.bf16.msra.mxu1 %v9485_v14 }
 0x586   :  { %7250 = vmatprep.subr.bf16.mxu1 %v8321_v11  ;;  %3066 = vmatpush1.bf16.msra.mxu0 %v7713_v34 }
 0x587   :  { %3067 = vmatprep.subr.bf16.mxu0 %v7718_v48 }
 0x588   :  { %6607 = vmatmul.mubr.msk.bf16.vlgmr.msra.gmra.mrb[60].mxu1 %vm2566_vm3, %v7686_v49 }
 0x589   :  { %7251 = vmatpush3.bf16.msra.mxu1 %v9438_v15  ;;  %7256 = vmatprep.mubr.msk.bf16.mxu1 %vm8322_vm4, %v8321_v11 }
 0x58a   :  { %7252 = vmatprep.subr.bf16.mxu1 %v8321_v11  ;;  %3068 = vmatpush1.bf16.msra.mxu0 %v7716_v24  ;;  %v7761_v24 = vld [vmem:[%s10591_s6 + $0x40] ss:$8 sps:$4 sm:$0xff]  }
 0x58b   :  { %3069 = vmatprep.subr.bf16.mxu0 %v7721_v50  ;;  %v7766_v50 = vld [vmem:[%s10591_s6 + $0x54] ss:$8 sps:$4 sm:$0xff]  }
 0x58d   :  { %7253 = vmatpush3.bf16.msra.mxu1 %v9464_v36 }
 0x58e   :  { %7254 = vmatprep.subr.bf16.mxu1 %v8321_v11  ;;  %3070 = vmatpush1.bf16.msra.mxu0 %v7719_v51  ;;  %v7764_v51 = vld [vmem:[%s10591_s6 + $0x50] ss:$8 sps:$4 sm:$0xff]  }
 0x58f   :  { %3071 = vmatprep.subr.bf16.mxu0 %v7724_v52  ;;  %v7769_v52 = vld [vmem:[%s10591_s6 + $0x64] ss:$8 sps:$4 sm:$0xff]  }
 0x591   :  { %7255 = vmatpush3.bf16.msra.mxu1 %v9521_v17 }
 0x592   :  { %3867 = vmatprep.subr.bf16.mxu1 %v9450_v19  ;;  %3072 = vmatpush1.bf16.msra.mxu0 %v7722_v43  ;;  %v7767_v43 = vld [vmem:[%s10591_s6 + $0x60] ss:$8 sps:$4 sm:$0xff]  }
 0x593   :  { %3073 = vmatprep.subr.bf16.mxu0 %v7727_v53  ;;  %v7772_v53 = vld [vmem:[%s10591_s6 + $0x74] ss:$8 sps:$4 sm:$0xff]  }
 0x594   :  { %7257 = vmatmul.mubr.msk.bf16.vlgmr.msra.gmra.mrb[64].mxu1 %vm2566_vm3, %v7686_v49 }
 0x595   :  { %3868 = vmatpush1.bf16.msra.mxu1 %v9445_v16  ;;  %3899 = vmatprep.mubr.bf16.mxu1 %v8320_v0 }
 0x596   :  { %3869 = vmatprep.subr.bf16.mxu1 %v9472_v3  ;;  %3074 = vmatpush1.bf16.msra.mxu0 %v7725_v25  ;;  %v7770_v25 = vld [vmem:[%s10591_s6 + $0x70] ss:$8 sps:$4 sm:$0xff]  }
 0x597   :  { %3075 = vmatprep.subr.bf16.mxu0 %v7730_v54 }
 0x599   :  { %3870 = vmatpush1.bf16.msra.mxu1 %v9467_v4 }
 0x59a   :  { %6691 = vmatprep.subr.msk.bf16.mxu1 %vm222_vm0, %v9479_v32  ;;  %3076 = vmatpush1.bf16.msra.mxu0 %v7728_v55  ;;  %v7775_v55 = vld [vmem:[%s10591_s6 + $0x84] ss:$8 sps:$4 sm:$0xff]  }
 0x59d   :  { %3872 = vmatpush1.bf16.msra.mxu1 %v9485_v14 }
 0x59e   :  { %7260 = vmatprep.subr.bf16.mxu1 %v8321_v11 }
 0x5a0   :  { %6692 = vmatmul.mubr.msk.bf16.vlgmr.msra.gmra.mrb[68].mxu1 %vm2566_vm3, %v7687_v57 }
 0x5a1   :  { %7261 = vmatpush3.bf16.msra.mxu1 %v9438_v15  ;;  %7266 = vmatprep.mubr.msk.bf16.mxu1 %vm8322_vm4, %v8321_v11 }
 0x5a2   :  { %7262 = vmatprep.subr.bf16.mxu1 %v8321_v11 }
 0x5a5   :  { %7263 = vmatpush3.bf16.msra.mxu1 %v9464_v36 }
 0x5a6   :  { %7264 = vmatprep.subr.bf16.mxu1 %v8321_v11 }
 0x5a9   :  { %7265 = vmatpush3.bf16.msra.mxu1 %v9521_v17 }
 0x5aa   :  { %4299 = vmatprep.subr.bf16.mxu1 %v9450_v19  ;;  %v7733_v19 = vld [vmem:[%s10591_s6 + $0x224] ss:$8 sps:$4 sm:$0xff]  }
 0x5ab   :  { %3077 = vmatprep.subr.bf16.mxu0 %v7733_v19 }
 0x5ac   :  { %7267 = vmatmul.mubr.msk.bf16.vlgmr.msra.gmra.mrb[72].mxu1 %vm2566_vm3, %v7687_v57 }
 0x5ad   :  { %4300 = vmatpush1.bf16.msra.mxu1 %v9445_v16  ;;  %4331 = vmatprep.mubr.bf16.mxu1 %v8320_v0  ;;  %v7731_v16 = vld [vmem:[%s10591_s6 + $0x220] ss:$8 sps:$4 sm:$0xff]  }
 0x5ae   :  { %4301 = vmatprep.subr.bf16.mxu1 %v9472_v3  ;;  %3078 = vmatpush1.bf16.msra.mxu0 %v7731_v16 }
 0x5af   :  { %3079 = vmatprep.subr.bf16.mxu0 %v7736_v27  ;;  %v7778_v27 = vld [vmem:[%s10591_s6 + $0x94] ss:$8 sps:$4 sm:$0xff]  }
 0x5b1   :  { %4302 = vmatpush1.bf16.msra.mxu1 %v9467_v4 }
 0x5b2   :  { %6776 = vmatprep.subr.msk.bf16.mxu1 %vm222_vm0, %v9479_v32  ;;  %3080 = vmatpush1.bf16.msra.mxu0 %v7734_v58  ;;  %v7773_v58 = vld [vmem:[%s10591_s6 + $0x80] ss:$8 sps:$4 sm:$0xff]  }
 0x5b5   :  { %4304 = vmatpush1.bf16.msra.mxu1 %v9485_v14 }
 0x5b6   :  { %7270 = vmatprep.subr.bf16.mxu1 %v8321_v11 }
 0x5b8   :  { %6777 = vmatmul.mubr.msk.bf16.vlgmr.msra.gmra.mrb[76].mxu1 %vm2566_vm3, %v7688_v59 }
 0x5b9   :  { %7271 = vmatpush3.bf16.msra.mxu1 %v9438_v15  ;;  %7276 = vmatprep.mubr.msk.bf16.mxu1 %vm8322_vm4, %v8321_v11  ;;  %v7739_v15 = vld [vmem:[%s10591_s6 + $0x244] ss:$8 sps:$4 sm:$0xff]  }
 0x5ba   :  { %7272 = vmatprep.subr.bf16.mxu1 %v8321_v11  ;;  %3092 = vmatprep.subr.bf16.mxu0 %v7739_v15  ;;  %v7776_v15 = vld [vmem:[%s10591_s6 + $0x90] ss:$8 sps:$4 sm:$0xff]  }
 0x5bd   :  { %7273 = vmatpush3.bf16.msra.mxu1 %v9464_v36 }
 0x5be   :  { %7274 = vmatprep.subr.bf16.mxu1 %v8321_v11 }
 0x5c1   :  { %7275 = vmatpush3.bf16.msra.mxu1 %v9521_v17 }
 0x5c4   :  { %7277 = vmatmul.mubr.msk.bf16.vlgmr.msra.gmra.mrb[80].mxu1 %vm2566_vm3, %v7688_v59 }
 0x5c5   :  { %4799 = vmatprep.mubr.bf16.mxu1 %v8320_v0 }
 0x637   :  { %v9667_v61 = vpop.f32.mrb[48].mxu1  ;;  %v2751_v62 = vpop.f32.mrb[48].mxu0 }
 0x638   :  { %v2615_v63 = vpop.f32.mrb[49].mxu1  ;;  %v2753_v36 = vpop.f32.mrb[49].mxu0 }
 0x639   :  { %v9669_v4 = vpop.f32.mrb[50].mxu1  ;;  %v2755_v1 = vpop.f32.mrb[50].mxu0 }
 0x63a   :  { %v2663_v2 = vpack.c.bf16 %v9669_v4, %v9667_v61  ;;  %v2619_v37 = vpop.f32.mrb[51].mxu1  ;;  %v2801_v46 = vpack.c.bf16 %v2755_v1, %v2751_v62  ;;  %v2757_v3 = vpop.f32.mrb[51].mxu0  ;;  %v7781_v62 = vld [vmem:[%s10591_s6 + $0xa4] ss:$8 sps:$4 sm:$0xff]   ;;  %v7782_v1 = vld [vmem:[%s10591_s6 + $0xb0] ss:$8 sps:$4 sm:$0xff]  }
 0x63b   :  { %v2664_v6 = vpack.c.bf16 %v2619_v37, %v2615_v63  ;;  %v2802_v33 = vpack.c.bf16 %v2757_v3, %v2753_v36  ;;  %v7779_v63 = vld [vmem:[%s10591_s6 + $0xa0] ss:$8 sps:$4 sm:$0xff]   ;;  %v7784_v36 = vld [vmem:[%s10591_s6 + $0xb4] ss:$8 sps:$4 sm:$0xff]   ;;  %v7787_v37 = vld [vmem:[%s10591_s6 + $0xc4] ss:$8 sps:$4 sm:$0xff]  }
 0x63c   :  { %v7790_v3 = vld [vmem:[%s10591_s6 + $0xd4] ss:$8 sps:$4 sm:$0xff]   ;;  %v7806_v4 = vld [vmem:[%s10591_s6 + $0x130] ss:$8 sps:$4 sm:$0xff]  }
 0x63d   :  { %3081 = vmatprep.mubr.bf16.mxu0 %v2802_v33  ;;  %v7793_v33 = vld [vmem:[%s10591_s6 + $0xe4] ss:$8 sps:$4 sm:$0xff]   ;;  %v7808_v61 = vld [vmem:[%s10591_s6 + $0x134] ss:$8 sps:$4 sm:$0xff]  }
 0x63e   :  { %3082 = vmatmul.mubr.bf16.vlgmr.msra.gmra.mrb[52].mxu0 %v2801_v46  ;;  %v7785_v46 = vld [vmem:[%s10591_s6 + $0xc0] ss:$8 sps:$4 sm:$0xff]  }
 0x63f   :  { %3093 = vmatpush1.bf16.msra.mxu0 %v7737_v8  ;;  %3124 = vmatprep.mubr.bf16.mxu0 %v8320_v0  ;;  %v7791_v8 = vld [vmem:[%s10591_s6 + $0xe0] ss:$8 sps:$4 sm:$0xff]  }
 0x640   :  { %3094 = vmatprep.subr.bf16.mxu0 %v7742_v5  ;;  %v7796_v5 = vld [vmem:[%s10591_s6 + $0xf4] ss:$8 sps:$4 sm:$0xff]  }
 0x643   :  { %v9686_v32 = vpop.f32.mrb[52].mxu1  ;;  %3095 = vmatpush1.bf16.msra.mxu0 %v7740_v9  ;;  %v7794_v9 = vld [vmem:[%s10591_s6 + $0xf0] ss:$8 sps:$4 sm:$0xff]  }
 0x644   :  { %v7238_v14 = vpop.f32.mrb[53].mxu1  ;;  %3096 = vmatprep.subr.bf16.mxu0 %v7745_v13  ;;  %v7799_v13 = vld [vmem:[%s10591_s6 + $0x104] ss:$8 sps:$4 sm:$0xff]  }
 0x645   :  { %v9694_v60 = vpop.f32.mrb[54].mxu1  ;;  %v7802_v14 = vld [vmem:[%s10591_s6 + $0x114] ss:$8 sps:$4 sm:$0xff]  }
 0x646   :  { %v2665_v10 = vpack.c.bf16 %v9694_v60, %v9686_v32  ;;  %v7239_v42 = vpop.f32.mrb[55].mxu1  ;;  %v7815_v32 = vld [vmem:[%s10591_s6 + $0x2a0] ss:$8 sps:$4 sm:$0xff]  }
 0x647   :  { %3097 = vmatpush1.bf16.msra.mxu0 %v7743_v21  ;;  %v7797_v21 = vld [vmem:[%s10591_s6 + $0x100] ss:$8 sps:$4 sm:$0xff]   ;;  %v7805_v42 = vld [vmem:[%s10591_s6 + $0x124] ss:$8 sps:$4 sm:$0xff]  }
 0x648   :  { %3098 = vmatprep.subr.bf16.mxu0 %v7748_v7  ;;  %v7800_v7 = vld [vmem:[%s10591_s6 + $0x110] ss:$8 sps:$4 sm:$0xff]  }
 0x64b   :  { %3099 = vmatpush1.bf16.msra.mxu0 %v7746_v20  ;;  %v7803_v20 = vld [vmem:[%s10591_s6 + $0x120] ss:$8 sps:$4 sm:$0xff]  }
 0x64c   :  { %3338 = vmatprep.subr.bf16.mxu0 %v7751_v26  ;;  %v7809_v26 = vld [vmem:[%s10591_s6 + $0x280] ss:$8 sps:$4 sm:$0xff]  }
 0x64f   :  { %v2794_v29 = vpop.f32.mrb[56].mxu1 }
 0x650   :  { %v7248_v35 = vpop.f32.mrb[57].mxu1 }
 0x651   :  { %v2797_v56 = vpop.f32.mrb[58].mxu1  ;;  %v7812_v35 = vld [vmem:[%s10591_s6 + $0x290] ss:$8 sps:$4 sm:$0xff]  }
 0x652   :  { %v2803_v30 = vpack.c.bf16 %v2797_v56, %v2794_v29  ;;  %v7249_v17 = vpop.f32.mrb[59].mxu1  ;;  %v7814_v29 = vld [vmem:[%s10591_s6 + $0x294] ss:$8 sps:$4 sm:$0xff]   ;;  %v7817_v56 = vld [vmem:[%s10591_s6 + $0x2a4] ss:$8 sps:$4 sm:$0xff]  }
 0x654   :  { %6563 = vmatmul.mubr.msk.bf16.vlgmr.msra.gmra.mrb[52].mxu0 %vm3045_vm5, %v2803_v30  ;;  %v7818_v30 = vld [vmem:[%s10591_s6 + $0x2b0] ss:$8 sps:$4 sm:$0xff]  }
 0x655   :  { %3339 = vmatpush1.bf16.msra.mxu0 %v7749_v12  ;;  %3370 = vmatprep.mubr.bf16.mxu0 %v2664_v6  ;;  %v7788_v6 = vld [vmem:[%s10591_s6 + $0xd0] ss:$8 sps:$4 sm:$0xff]  }
 0x656   :  { %3340 = vmatprep.subr.bf16.mxu0 %v7754_v18  ;;  %v7823_v18 = vld [vmem:[%s10591_s6 + $0x2c4] ss:$8 sps:$4 sm:$0xff]  }
 0x659   :  { %3341 = vmatpush1.bf16.msra.mxu0 %v7752_v31 }
 0x65a   :  { %3342 = vmatprep.subr.bf16.mxu0 %v7757_v38 }
 0x65b   :  { %v9723_v41 = vpop.f32.mrb[60].mxu1 }
 0x65c   :  { %v9725_v23 = vpop.f32.mrb[61].mxu1 }
 0x65d   :  { %3343 = vmatpush1.bf16.msra.mxu0 %v7755_v39  ;;  %v9730_v45 = vpop.f32.mrb[62].mxu1 }
 0x65e   :  { %3344 = vmatprep.subr.bf16.mxu0 %v7760_v40  ;;  %v3519_v34 = vpack.c.bf16 %v9730_v45, %v9723_v41  ;;  %v9737_v48 = vpop.f32.mrb[63].mxu1  ;;  %v7821_v40 = vld [vmem:[%s10591_s6 + $0x2c0] ss:$8 sps:$4 sm:$0xff]   ;;  %v7868_v41 = vld [vmem:[%s10591_s6 + $0x3b4] ss:$8 sps:$4 sm:$0xff]  }
 0x65f   :  { %v3520_v49 = vpack.c.bf16 %v9737_v48, %v9725_v23  ;;  %v7826_v23 = vld [vmem:[%s10591_s6 + $0x2d4] ss:$8 sps:$4 sm:$0xff]   ;;  %v7827_v48 = vld [vmem:[%s10591_s6 + $0x2e0] ss:$8 sps:$4 sm:$0xff]   ;;  %v7866_v45 = vld [vmem:[%s10591_s6 + $0x3b0] ss:$8 sps:$4 sm:$0xff]  }
 0x661   :  { %3345 = vmatpush1.bf16.msra.mxu0 %v7758_v44  ;;  %v7824_v44 = vld [vmem:[%s10591_s6 + $0x2d0] ss:$8 sps:$4 sm:$0xff]  }
 0x662   :  { %3346 = vmatprep.subr.bf16.mxu0 %v7763_v47  ;;  %v7829_v47 = vld [vmem:[%s10591_s6 + $0x2e4] ss:$8 sps:$4 sm:$0xff]  }
 0x665   :  { %3347 = vmatpush1.bf16.msra.mxu0 %v7761_v24  ;;  %v7830_v24 = vld [vmem:[%s10591_s6 + $0x2f0] ss:$8 sps:$4 sm:$0xff]  }
 0x666   :  { %3348 = vmatprep.subr.bf16.mxu0 %v7766_v50 }
 0x667   :  { %v9762_v54 = vpop.f32.mrb[64].mxu1 }
 0x668   :  { %v7258_v57 = vpop.f32.mrb[65].mxu1 }
 0x669   :  { %3349 = vmatpush1.bf16.msra.mxu0 %v7764_v51  ;;  %v9767_v59 = vpop.f32.mrb[66].mxu1  ;;  %v7835_v51 = vld [vmem:[%s10591_s6 + $0x304] ss:$8 sps:$4 sm:$0xff]   ;;  %v7838_v57 = vld [vmem:[%s10591_s6 + $0x314] ss:$8 sps:$4 sm:$0xff]  }
 0x66a   :  { %3350 = vmatprep.subr.bf16.mxu0 %v7769_v52  ;;  %v3521_v19 = vpack.c.bf16 %v9767_v59, %v9762_v54  ;;  %v7259_v16 = vpop.f32.mrb[67].mxu1  ;;  %v7875_v54 = vld [vmem:[%s10591_s6 + $0x3e0] ss:$8 sps:$4 sm:$0xff]  }
 0x66b   :  { %v7836_v16 = vld [vmem:[%s10591_s6 + $0x310] ss:$8 sps:$4 sm:$0xff]  }
 0x66d   :  { %3351 = vmatpush1.bf16.msra.mxu0 %v7767_v43 }
 0x66e   :  { %3352 = vmatprep.subr.bf16.mxu0 %v7772_v53 }
 0x671   :  { %3353 = vmatpush1.bf16.msra.mxu0 %v7770_v25 }
 0x672   :  { %3354 = vmatprep.subr.bf16.mxu0 %v7775_v55  ;;  %v7833_v55 = vld [vmem:[%s10591_s6 + $0x300] ss:$8 sps:$4 sm:$0xff]  }
 0x673   :  { %v9869_v60 = vpop.f32.mrb[68].mxu1 }
 0x674   :  { %v9874_v12 = vpop.f32.mrb[69].mxu1 }
 0x675   :  { %3355 = vmatpush1.bf16.msra.mxu0 %v7773_v58  ;;  %v9879_v17 = vpop.f32.mrb[70].mxu1  ;;  %v7841_v58 = vld [vmem:[%s10591_s6 + $0x324] ss:$8 sps:$4 sm:$0xff]  }
 0x676   :  { %3356 = vmatprep.subr.bf16.mxu0 %v7778_v27  ;;  %v3951_v31 = vpack.c.bf16 %v9879_v17, %v9869_v60  ;;  %v9886_v38 = vpop.f32.mrb[71].mxu1  ;;  %v7839_v27 = vld [vmem:[%s10591_s6 + $0x320] ss:$8 sps:$4 sm:$0xff]   ;;  %v7928_v60 = vld [vmem:[%s10591_s6 + $0x4f4] ss:$8 sps:$4 sm:$0xff]  }
 0x677   :  { %v3952_v39 = vpack.c.bf16 %v9886_v38, %v9874_v12  ;;  %v7886_v12 = vld [vmem:[%s10591_s6 + $0x414] ss:$8 sps:$4 sm:$0xff]   ;;  %v7887_v38 = vld [vmem:[%s10591_s6 + $0x420] ss:$8 sps:$4 sm:$0xff]   ;;  %v7926_v17 = vld [vmem:[%s10591_s6 + $0x4f0] ss:$8 sps:$4 sm:$0xff]  }
 0x679   :  { %3357 = vmatpush1.bf16.msra.mxu0 %v7776_v15  ;;  %v7844_v15 = vld [vmem:[%s10591_s6 + $0x334] ss:$8 sps:$4 sm:$0xff]  }
 0x67a   :  { %3358 = vmatprep.subr.bf16.mxu0 %v7781_v62  ;;  %v7842_v62 = vld [vmem:[%s10591_s6 + $0x330] ss:$8 sps:$4 sm:$0xff]  }
 0x67d   :  { %3359 = vmatpush1.bf16.msra.mxu0 %v7779_v63  ;;  %v7847_v63 = vld [vmem:[%s10591_s6 + $0x344] ss:$8 sps:$4 sm:$0xff]  }
 0x67e   :  { %3360 = vmatprep.subr.bf16.mxu0 %v7784_v36  ;;  %v7845_v36 = vld [vmem:[%s10591_s6 + $0x340] ss:$8 sps:$4 sm:$0xff]  }
 0x67f   :  { %v9911_v50 = vpop.f32.mrb[72].mxu1 }
 0x680   :  { %v7268_v52 = vpop.f32.mrb[73].mxu1 }
 0x681   :  { %3361 = vmatpush1.bf16.msra.mxu0 %v7782_v1  ;;  %v9916_v43 = vpop.f32.mrb[74].mxu1  ;;  %v7850_v1 = vld [vmem:[%s10591_s6 + $0x354] ss:$8 sps:$4 sm:$0xff]  }
 0x682   :  { %3362 = vmatprep.subr.bf16.mxu0 %v7787_v37  ;;  %v3953_v53 = vpack.c.bf16 %v9916_v43, %v9911_v50  ;;  %v7269_v25 = vpop.f32.mrb[75].mxu1  ;;  %v7848_v37 = vld [vmem:[%s10591_s6 + $0x350] ss:$8 sps:$4 sm:$0xff]   ;;  %v7898_v52 = vld [vmem:[%s10591_s6 + $0x454] ss:$8 sps:$4 sm:$0xff]  }
 0x683   :  { %v7896_v25 = vld [vmem:[%s10591_s6 + $0x450] ss:$8 sps:$4 sm:$0xff]   ;;  %v7935_v50 = vld [vmem:[%s10591_s6 + $0x520] ss:$8 sps:$4 sm:$0xff]   ;;  %v7940_v43 = vld [vmem:[%s10591_s6 + $0x534] ss:$8 sps:$4 sm:$0xff]  }
 0x685   :  { %3363 = vmatpush1.bf16.msra.mxu0 %v7785_v46  ;;  %v7853_v46 = vld [vmem:[%s10591_s6 + $0x364] ss:$8 sps:$4 sm:$0xff]  }
 0x686   :  { %3364 = vmatprep.subr.bf16.mxu0 %v7790_v3  ;;  %v7851_v3 = vld [vmem:[%s10591_s6 + $0x360] ss:$8 sps:$4 sm:$0xff]  }
 0x689   :  { %3365 = vmatpush1.bf16.msra.mxu0 %v7788_v6  ;;  %v7856_v6 = vld [vmem:[%s10591_s6 + $0x374] ss:$8 sps:$4 sm:$0xff]  }
 0x68a   :  { %3366 = vmatprep.subr.bf16.mxu0 %v7793_v33  ;;  %v7854_v33 = vld [vmem:[%s10591_s6 + $0x370] ss:$8 sps:$4 sm:$0xff]  }
 0x68b   :  { %v10018_v59 = vpop.f32.mrb[76].mxu1 }
 0x68d   :  { %3367 = vmatpush1.bf16.msra.mxu0 %v7791_v8  ;;  %v7859_v8 = vld [vmem:[%s10591_s6 + $0x384] ss:$8 sps:$4 sm:$0xff]  }
 0x68e   :  { %3368 = vmatprep.subr.bf16.mxu0 %v7796_v5  ;;  %v7857_v5 = vld [vmem:[%s10591_s6 + $0x380] ss:$8 sps:$4 sm:$0xff]  }
 0x691   :  { %3369 = vmatpush1.bf16.msra.mxu0 %v7794_v9  ;;  %v7862_v9 = vld [vmem:[%s10591_s6 + $0x394] ss:$8 sps:$4 sm:$0xff]  }
 0x692   :  { %3381 = vmatprep.subr.bf16.mxu0 %v7799_v13  ;;  %v7860_v13 = vld [vmem:[%s10591_s6 + $0x390] ss:$8 sps:$4 sm:$0xff]  }
 0x694   :  { %3371 = vmatmul.mubr.bf16.vlgmr.msra.gmra.mrb[52].mxu0 %v2663_v2  ;;  %v7811_v2 = vld [vmem:[%s10591_s6 + $0x284] ss:$8 sps:$4 sm:$0xff]  }
 0x695   :  { %3382 = vmatpush1.bf16.msra.mxu0 %v7797_v21  ;;  %3413 = vmatprep.mubr.bf16.mxu0 %v8320_v0  ;;  %v7865_v21 = vld [vmem:[%s10591_s6 + $0x3a4] ss:$8 sps:$4 sm:$0xff]  }
 0x696   :  { %3383 = vmatprep.subr.bf16.mxu0 %v7802_v14  ;;  %v7863_v14 = vld [vmem:[%s10591_s6 + $0x3a0] ss:$8 sps:$4 sm:$0xff]  }
 0x699   :  { %3384 = vmatpush1.bf16.msra.mxu0 %v7800_v7  ;;  %v7869_v7 = vld [vmem:[%s10591_s6 + $0x3c0] ss:$8 sps:$4 sm:$0xff]  }
 0x69a   :  { %3385 = vmatprep.subr.bf16.mxu0 %v7805_v42  ;;  %v7874_v42 = vld [vmem:[%s10591_s6 + $0x3d4] ss:$8 sps:$4 sm:$0xff]  }
 0x69d   :  { %3386 = vmatpush1.bf16.msra.mxu0 %v7803_v20  ;;  %v7872_v20 = vld [vmem:[%s10591_s6 + $0x3d0] ss:$8 sps:$4 sm:$0xff]  }
 0x69e   :  { %3387 = vmatprep.subr.bf16.mxu0 %v7808_v61  ;;  %v7877_v61 = vld [vmem:[%s10591_s6 + $0x3e4] ss:$8 sps:$4 sm:$0xff]  }
 0x6a1   :  { %3388 = vmatpush1.bf16.msra.mxu0 %v7806_v4  ;;  %v10023_v4 = vpop.f32.mrb[77].mxu1 }
 0x6a2   :  { %3766 = vmatprep.subr.bf16.mxu0 %v7811_v2  ;;  %v7878_v2 = vld [vmem:[%s10591_s6 + $0x3f0] ss:$8 sps:$4 sm:$0xff]  }
 0x6a4   :  { %6604 = vmatmul.mubr.msk.bf16.vlgmr.msra.gmra.mrb[52].mxu0 %vm3045_vm5, %v2665_v10  ;;  %v7820_v10 = vld [vmem:[%s10591_s6 + $0x2b4] ss:$8 sps:$4 sm:$0xff]  }
 0x6a5   :  { %3767 = vmatpush1.bf16.msra.mxu0 %v7809_v26  ;;  %3798 = vmatprep.mubr.bf16.mxu0 %v3520_v49  ;;  %v7832_v49 = vld [vmem:[%s10591_s6 + $0x2f4] ss:$8 sps:$4 sm:$0xff]   ;;  %v10028_v26 = vpop.f32.mrb[78].mxu1 }
 0x6a6   :  { %3768 = vmatprep.subr.bf16.mxu0 %v7814_v29  ;;  %v7883_v29 = vld [vmem:[%s10591_s6 + $0x404] ss:$8 sps:$4 sm:$0xff]  }
 0x6a9   :  { %3769 = vmatpush1.bf16.msra.mxu0 %v7812_v35  ;;  %v4383_v35 = vpack.c.bf16 %v10028_v26, %v10018_v59  ;;  %v7988_v59 = vld [vmem:[%s10591_s6 + $0x634] ss:$8 sps:$4 sm:$0xff]   ;;  %v7986_v26 = vld [vmem:[%s10591_s6 + $0x630] ss:$8 sps:$4 sm:$0xff]  }
 0x6aa   :  { %3770 = vmatprep.subr.bf16.mxu0 %v7817_v56  ;;  %v10035_v56 = vpop.f32.mrb[79].mxu1 }
 0x6ad   :  { %3771 = vmatpush1.bf16.msra.mxu0 %v7815_v32  ;;  %v4384_v32 = vpack.c.bf16 %v10035_v56, %v10023_v4  ;;  %v7955_v4 = vld [vmem:[%s10591_s6 + $0x584] ss:$8 sps:$4 sm:$0xff]   ;;  %v7956_v56 = vld [vmem:[%s10591_s6 + $0x590] ss:$8 sps:$4 sm:$0xff]  }
 0x6ae   :  { %3772 = vmatprep.subr.bf16.mxu0 %v7820_v10  ;;  %v7881_v10 = vld [vmem:[%s10591_s6 + $0x400] ss:$8 sps:$4 sm:$0xff]  }
 0x6b1   :  { %3773 = vmatpush1.bf16.msra.mxu0 %v7818_v30  ;;  %v7884_v30 = vld [vmem:[%s10591_s6 + $0x410] ss:$8 sps:$4 sm:$0xff]  }
 0x6b2   :  { %3774 = vmatprep.subr.bf16.mxu0 %v7823_v18  ;;  %v7889_v18 = vld [vmem:[%s10591_s6 + $0x424] ss:$8 sps:$4 sm:$0xff]  }
 0x6b5   :  { %3775 = vmatpush1.bf16.msra.mxu0 %v7821_v40  ;;  %v10057_v40 = vpop.f32.mrb[80].mxu1 }
 0x6b6   :  { %3776 = vmatprep.subr.bf16.mxu0 %v7826_v23  ;;  %v7278_v23 = vpop.f32.mrb[81].mxu1 }
 0x6b7   :  { %v7968_v23 = vld [vmem:[%s10591_s6 + $0x5d0] ss:$8 sps:$4 sm:$0xff]  }
 0x6b9   :  { %3777 = vmatpush1.bf16.msra.mxu0 %v7824_v44  ;;  %v7890_v44 = vld [vmem:[%s10591_s6 + $0x430] ss:$8 sps:$4 sm:$0xff]  }
 0x6ba   :  { %3778 = vmatprep.subr.bf16.mxu0 %v7829_v47  ;;  %v10062_v47 = vpop.f32.mrb[82].mxu1 }
 0x6bd   :  { %3779 = vmatpush1.bf16.msra.mxu0 %v7827_v48  ;;  %v7895_v48 = vld [vmem:[%s10591_s6 + $0x444] ss:$8 sps:$4 sm:$0xff]  }
 0x6be   :  { %3780 = vmatprep.subr.bf16.mxu0 %v7832_v49  ;;  %v4385_v49 = vpack.c.bf16 %v10062_v47, %v10057_v40 }
 0x6c1   :  { %3781 = vmatpush1.bf16.msra.mxu0 %v7830_v24  ;;  %v7279_v24 = vpop.f32.mrb[83].mxu1 }
 0x6c2   :  { %3782 = vmatprep.subr.bf16.mxu0 %v7835_v51  ;;  %v7893_v51 = vld [vmem:[%s10591_s6 + $0x440] ss:$8 sps:$4 sm:$0xff]   ;;  %v7976_v24 = vld [vmem:[%s10591_s6 + $0x5f4] ss:$8 sps:$4 sm:$0xff]  }
 0x6c5   :  { %3783 = vmatpush1.bf16.msra.mxu0 %v7833_v55  ;;  %v7901_v55 = vld [vmem:[%s10591_s6 + $0x464] ss:$8 sps:$4 sm:$0xff]  }
 0x6c6   :  { %3784 = vmatprep.subr.bf16.mxu0 %v7838_v57  ;;  %v7899_v57 = vld [vmem:[%s10591_s6 + $0x460] ss:$8 sps:$4 sm:$0xff]  }
 0x6c9   :  { %3785 = vmatpush1.bf16.msra.mxu0 %v7836_v16  ;;  %v7904_v16 = vld [vmem:[%s10591_s6 + $0x474] ss:$8 sps:$4 sm:$0xff]  }
 0x6ca   :  { %3786 = vmatprep.subr.bf16.mxu0 %v7841_v58  ;;  %v7902_v58 = vld [vmem:[%s10591_s6 + $0x470] ss:$8 sps:$4 sm:$0xff]  }
 0x6cd   :  { %3787 = vmatpush1.bf16.msra.mxu0 %v7839_v27  ;;  %v7907_v27 = vld [vmem:[%s10591_s6 + $0x484] ss:$8 sps:$4 sm:$0xff]  }
 0x6ce   :  { %3788 = vmatprep.subr.bf16.mxu0 %v7844_v15  ;;  %v7905_v15 = vld [vmem:[%s10591_s6 + $0x480] ss:$8 sps:$4 sm:$0xff]  }
 0x6d1   :  { %3789 = vmatpush1.bf16.msra.mxu0 %v7842_v62  ;;  %v7910_v62 = vld [vmem:[%s10591_s6 + $0x494] ss:$8 sps:$4 sm:$0xff]  }
 0x6d2   :  { %3790 = vmatprep.subr.bf16.mxu0 %v7847_v63  ;;  %v7908_v63 = vld [vmem:[%s10591_s6 + $0x490] ss:$8 sps:$4 sm:$0xff]  }
 0x6d5   :  { %3791 = vmatpush1.bf16.msra.mxu0 %v7845_v36  ;;  %v7913_v36 = vld [vmem:[%s10591_s6 + $0x4a4] ss:$8 sps:$4 sm:$0xff]  }
 0x6d6   :  { %3792 = vmatprep.subr.bf16.mxu0 %v7850_v1  ;;  %v7911_v1 = vld [vmem:[%s10591_s6 + $0x4a0] ss:$8 sps:$4 sm:$0xff]  }
 0x6d9   :  { %3793 = vmatpush1.bf16.msra.mxu0 %v7848_v37  ;;  %v7916_v37 = vld [vmem:[%s10591_s6 + $0x4b4] ss:$8 sps:$4 sm:$0xff]  }
 0x6da   :  { %3794 = vmatprep.subr.bf16.mxu0 %v7853_v46  ;;  %v7914_v46 = vld [vmem:[%s10591_s6 + $0x4b0] ss:$8 sps:$4 sm:$0xff]  }
 0x6dd   :  { %3795 = vmatpush1.bf16.msra.mxu0 %v7851_v3  ;;  %v7919_v3 = vld [vmem:[%s10591_s6 + $0x4c4] ss:$8 sps:$4 sm:$0xff]  }
 0x6de   :  { %3796 = vmatprep.subr.bf16.mxu0 %v7856_v6  ;;  %v7917_v6 = vld [vmem:[%s10591_s6 + $0x4c0] ss:$8 sps:$4 sm:$0xff]  }
 0x6e1   :  { %3797 = vmatpush1.bf16.msra.mxu0 %v7854_v33  ;;  %v7922_v33 = vld [vmem:[%s10591_s6 + $0x4d4] ss:$8 sps:$4 sm:$0xff]  }
 0x6e2   :  { %3809 = vmatprep.subr.bf16.mxu0 %v7859_v8  ;;  %v7920_v8 = vld [vmem:[%s10591_s6 + $0x4d0] ss:$8 sps:$4 sm:$0xff]  }
 0x6e4   :  { %3799 = vmatmul.mubr.bf16.vlgmr.msra.gmra.mrb[52].mxu0 %v3519_v34  ;;  %v7871_v34 = vld [vmem:[%s10591_s6 + $0x3c4] ss:$8 sps:$4 sm:$0xff]  }
 0x6e5   :  { %3810 = vmatpush1.bf16.msra.mxu0 %v7857_v5  ;;  %3841 = vmatprep.mubr.bf16.mxu0 %v8320_v0  ;;  %v7925_v5 = vld [vmem:[%s10591_s6 + $0x4e4] ss:$8 sps:$4 sm:$0xff]  }
 0x6e6   :  { %3811 = vmatprep.subr.bf16.mxu0 %v7862_v9  ;;  %v7923_v9 = vld [vmem:[%s10591_s6 + $0x4e0] ss:$8 sps:$4 sm:$0xff]  }
 0x6e9   :  { %3812 = vmatpush1.bf16.msra.mxu0 %v7860_v13  ;;  %v7929_v13 = vld [vmem:[%s10591_s6 + $0x500] ss:$8 sps:$4 sm:$0xff]  }
 0x6ea   :  { %3813 = vmatprep.subr.bf16.mxu0 %v7865_v21  ;;  %v7934_v21 = vld [vmem:[%s10591_s6 + $0x514] ss:$8 sps:$4 sm:$0xff]  }
 0x6ed   :  { %3814 = vmatpush1.bf16.msra.mxu0 %v7863_v14  ;;  %v7932_v14 = vld [vmem:[%s10591_s6 + $0x510] ss:$8 sps:$4 sm:$0xff]  }
 0x6ee   :  { %3815 = vmatprep.subr.bf16.mxu0 %v7868_v41  ;;  %v7937_v41 = vld [vmem:[%s10591_s6 + $0x524] ss:$8 sps:$4 sm:$0xff]  }
 0x6f1   :  { %3816 = vmatpush1.bf16.msra.mxu0 %v7866_v45  ;;  %v7943_v45 = vld [vmem:[%s10591_s6 + $0x544] ss:$8 sps:$4 sm:$0xff]  }
 0x6f2   :  { %4198 = vmatprep.subr.bf16.mxu0 %v7871_v34  ;;  %v7941_v34 = vld [vmem:[%s10591_s6 + $0x540] ss:$8 sps:$4 sm:$0xff]  }
 0x6f4   :  { %6689 = vmatmul.mubr.msk.bf16.vlgmr.msra.gmra.mrb[52].mxu0 %vm3045_vm5, %v3521_v19  ;;  %v7880_v19 = vld [vmem:[%s10591_s6 + $0x3f4] ss:$8 sps:$4 sm:$0xff]  }
 0x6f5   :  { %4199 = vmatpush1.bf16.msra.mxu0 %v7869_v7  ;;  %4230 = vmatprep.mubr.bf16.mxu0 %v3952_v39  ;;  %v7892_v39 = vld [vmem:[%s10591_s6 + $0x434] ss:$8 sps:$4 sm:$0xff]  }
 0x6f6   :  { %4200 = vmatprep.subr.bf16.mxu0 %v7874_v42  ;;  %v7946_v7 = vld [vmem:[%s10591_s6 + $0x554] ss:$8 sps:$4 sm:$0xff]   ;;  %v7944_v42 = vld [vmem:[%s10591_s6 + $0x550] ss:$8 sps:$4 sm:$0xff]  }
 0x6f9   :  { %4201 = vmatpush1.bf16.msra.mxu0 %v7872_v20  ;;  %v7949_v20 = vld [vmem:[%s10591_s6 + $0x564] ss:$8 sps:$4 sm:$0xff]  }
 0x6fa   :  { %4202 = vmatprep.subr.bf16.mxu0 %v7877_v61  ;;  %v7947_v61 = vld [vmem:[%s10591_s6 + $0x560] ss:$8 sps:$4 sm:$0xff]  }
 0x6fd   :  { %4203 = vmatpush1.bf16.msra.mxu0 %v7875_v54  ;;  %v7952_v54 = vld [vmem:[%s10591_s6 + $0x574] ss:$8 sps:$4 sm:$0xff]  }
 0x6fe   :  { %4204 = vmatprep.subr.bf16.mxu0 %v7880_v19  ;;  %v7950_v19 = vld [vmem:[%s10591_s6 + $0x570] ss:$8 sps:$4 sm:$0xff]  }
 0x701   :  { %4205 = vmatpush1.bf16.msra.mxu0 %v7878_v2  ;;  %v7953_v2 = vld [vmem:[%s10591_s6 + $0x580] ss:$8 sps:$4 sm:$0xff]  }
 0x702   :  { %4206 = vmatprep.subr.bf16.mxu0 %v7883_v29  ;;  %v7958_v29 = vld [vmem:[%s10591_s6 + $0x594] ss:$8 sps:$4 sm:$0xff]  }
 0x705   :  { %4207 = vmatpush1.bf16.msra.mxu0 %v7881_v10  ;;  %v7959_v10 = vld [vmem:[%s10591_s6 + $0x5a0] ss:$8 sps:$4 sm:$0xff]  }
 0x706   :  { %4208 = vmatprep.subr.bf16.mxu0 %v7886_v12  ;;  %v7964_v12 = vld [vmem:[%s10591_s6 + $0x5b4] ss:$8 sps:$4 sm:$0xff]  }
 0x709   :  { %4209 = vmatpush1.bf16.msra.mxu0 %v7884_v30  ;;  %v7962_v30 = vld [vmem:[%s10591_s6 + $0x5b0] ss:$8 sps:$4 sm:$0xff]  }
 0x70a   :  { %4210 = vmatprep.subr.bf16.mxu0 %v7889_v18  ;;  %v7967_v18 = vld [vmem:[%s10591_s6 + $0x5c4] ss:$8 sps:$4 sm:$0xff]  }
 0x70d   :  { %4211 = vmatpush1.bf16.msra.mxu0 %v7887_v38  ;;  %v7965_v38 = vld [vmem:[%s10591_s6 + $0x5c0] ss:$8 sps:$4 sm:$0xff]  }
 0x70e   :  { %4212 = vmatprep.subr.bf16.mxu0 %v7892_v39  ;;  %v7970_v39 = vld [vmem:[%s10591_s6 + $0x5d4] ss:$8 sps:$4 sm:$0xff]  }
 0x711   :  { %4213 = vmatpush1.bf16.msra.mxu0 %v7890_v44  ;;  %v7973_v44 = vld [vmem:[%s10591_s6 + $0x5e4] ss:$8 sps:$4 sm:$0xff]  }
 0x712   :  { %4214 = vmatprep.subr.bf16.mxu0 %v7895_v48  ;;  %v7971_v48 = vld [vmem:[%s10591_s6 + $0x5e0] ss:$8 sps:$4 sm:$0xff]  }
 0x715   :  { %4215 = vmatpush1.bf16.msra.mxu0 %v7893_v51  ;;  %v7974_v51 = vld [vmem:[%s10591_s6 + $0x5f0] ss:$8 sps:$4 sm:$0xff]  }
 0x716   :  { %4216 = vmatprep.subr.bf16.mxu0 %v7898_v52  ;;  %v7979_v52 = vld [vmem:[%s10591_s6 + $0x604] ss:$8 sps:$4 sm:$0xff]  }
 0x719   :  { %4217 = vmatpush1.bf16.msra.mxu0 %v7896_v25  ;;  %v7977_v25 = vld [vmem:[%s10591_s6 + $0x600] ss:$8 sps:$4 sm:$0xff]  }
 0x71a   :  { %4218 = vmatprep.subr.bf16.mxu0 %v7901_v55  ;;  %v7982_v55 = vld [vmem:[%s10591_s6 + $0x614] ss:$8 sps:$4 sm:$0xff]  }
 0x71d   :  { %4219 = vmatpush1.bf16.msra.mxu0 %v7899_v57  ;;  %v7980_v57 = vld [vmem:[%s10591_s6 + $0x610] ss:$8 sps:$4 sm:$0xff]  }
 0x71e   :  { %4220 = vmatprep.subr.bf16.mxu0 %v7904_v16  ;;  %v7985_v16 = vld [vmem:[%s10591_s6 + $0x624] ss:$8 sps:$4 sm:$0xff]  }
 0x721   :  { %4221 = vmatpush1.bf16.msra.mxu0 %v7902_v58  ;;  %v7983_v58 = vld [vmem:[%s10591_s6 + $0x620] ss:$8 sps:$4 sm:$0xff]  }
 0x722   :  { %4222 = vmatprep.subr.bf16.mxu0 %v7907_v27  ;;  %v4736_v27 = vld [vmem:[#allocation10] sm:$0x3] }
 0x725   :  { %4223 = vmatpush1.bf16.msra.mxu0 %v7905_v15 }
 0x726   :  { %4224 = vmatprep.subr.bf16.mxu0 %v7910_v62 }
 0x729   :  { %4225 = vmatpush1.bf16.msra.mxu0 %v7908_v63  ;;  %v4741_v63 = vrot.slane %v4736_v27, %v9399_v22 }
 0x72a   :  { %4226 = vmatprep.subr.bf16.mxu0 %v7913_v36 }
 0x72d   :  { %4227 = vmatpush1.bf16.msra.mxu0 %v7911_v1  ;;  %v4745_v1 = vrot.slane %v4736_v27, %v9401_v28  ;;  %v8011_v27 = vld [vmem:[%s10595_s10 + $0x58] sm:$0xff]  }
 0x72e   :  { %4228 = vmatprep.subr.bf16.mxu0 %v7916_v37 }
 0x731   :  { %4229 = vmatpush1.bf16.msra.mxu0 %v7914_v46 }
 0x732   :  { %4241 = vmatprep.subr.bf16.mxu0 %v7919_v3 }
 0x734   :  { %4231 = vmatmul.mubr.bf16.vlgmr.msra.gmra.mrb[52].mxu0 %v3951_v31  ;;  %v7931_v31 = vld [vmem:[%s10591_s6 + $0x504] ss:$8 sps:$4 sm:$0xff]  }
 0x735   :  { %4242 = vmatpush1.bf16.msra.mxu0 %v7917_v6  ;;  %4273 = vmatprep.mubr.bf16.mxu0 %v8320_v0 }
 0x736   :  { %4243 = vmatprep.subr.bf16.mxu0 %v7922_v33 }
 0x739   :  { %4244 = vmatpush1.bf16.msra.mxu0 %v7920_v8 }
 0x73a   :  { %4245 = vmatprep.subr.bf16.mxu0 %v7925_v5 }
 0x73d   :  { %4246 = vmatpush1.bf16.msra.mxu0 %v7923_v9 }
 0x73e   :  { %4247 = vmatprep.subr.bf16.mxu0 %v7928_v60 }
 0x741   :  { %4248 = vmatpush1.bf16.msra.mxu0 %v7926_v17 }
 0x742   :  { %4630 = vmatprep.subr.bf16.mxu0 %v7931_v31 }
 0x744   :  { %6774 = vmatmul.mubr.msk.bf16.vlgmr.msra.gmra.mrb[52].mxu0 %vm3045_vm5, %v3953_v53  ;;  %v7938_v53 = vld [vmem:[%s10591_s6 + $0x530] ss:$8 sps:$4 sm:$0xff]  }
 0x745   :  { %4631 = vmatpush1.bf16.msra.mxu0 %v7929_v13  ;;  %4662 = vmatprep.mubr.bf16.mxu0 %v4384_v32  ;;  %v7961_v32 = vld [vmem:[%s10591_s6 + $0x5a4] ss:$8 sps:$4 sm:$0xff]  }
 0x746   :  { %4632 = vmatprep.subr.bf16.mxu0 %v7934_v21 }
 0x749   :  { %4633 = vmatpush1.bf16.msra.mxu0 %v7932_v14 }
 0x74a   :  { %4634 = vmatprep.subr.bf16.mxu0 %v7937_v41 }
 0x74d   :  { %4635 = vmatpush1.bf16.msra.mxu0 %v7935_v50 }
 0x74e   :  { %4636 = vmatprep.subr.bf16.mxu0 %v7940_v43  ;;  %v4762_v43 = vld [vmem:[%s10594_s9] sm:$0x3] }
 0x751   :  { %4637 = vmatpush1.bf16.msra.mxu0 %v7938_v53  ;;  %v7989_v53 = vld [vmem:[%s10595_s10 + $0xc0] sm:$0xff]  }
 0x752   :  { %4638 = vmatprep.subr.bf16.mxu0 %v7943_v45  ;;  %v6861_v45 = vld [vmem:[%s10594_s9 + $0x2] sm:$0x3] }
 0x755   :  { %4639 = vmatpush1.bf16.msra.mxu0 %v7941_v34  ;;  %v7990_v34 = vld [vmem:[%s10595_s10 + $0x80] sm:$0xff]  }
 0x756   :  { %4640 = vmatprep.subr.bf16.mxu0 %v7946_v7  ;;  %v7991_v7 = vld [vmem:[%s10595_s10 + $0xc8] sm:$0xff]  }
 0x759   :  { %4641 = vmatpush1.bf16.msra.mxu0 %v7944_v42  ;;  %v7992_v42 = vld [vmem:[%s10595_s10 + $0x88] sm:$0xff]  }
 0x75a   :  { %4642 = vmatprep.subr.bf16.mxu0 %v7949_v20  ;;  %v7993_v20 = vld [vmem:[%s10595_s10 + $0xd0] sm:$0xff]  }
 0x75d   :  { %4643 = vmatpush1.bf16.msra.mxu0 %v7947_v61  ;;  %v7994_v61 = vld [vmem:[%s10595_s10 + $0x90] sm:$0xff]  }
 0x75e   :  { %4644 = vmatprep.subr.bf16.mxu0 %v7952_v54  ;;  %v7995_v54 = vld [vmem:[%s10595_s10 + $0xd8] sm:$0xff]  }
 0x761   :  { %4645 = vmatpush1.bf16.msra.mxu0 %v7950_v19  ;;  %v7996_v19 = vld [vmem:[%s10595_s10 + $0x98] sm:$0xff]  }
 0x762   :  { %4646 = vmatprep.subr.bf16.mxu0 %v7955_v4  ;;  %v7997_v4 = vld [vmem:[%s10595_s10 + $0xe0] sm:$0xff]  }
 0x765   :  { %4647 = vmatpush1.bf16.msra.mxu0 %v7953_v2  ;;  %v7998_v2 = vld [vmem:[%s10595_s10 + $0xa0] sm:$0xff]  }
 0x766   :  { %4648 = vmatprep.subr.bf16.mxu0 %v7958_v29  ;;  %v7999_v29 = vld [vmem:[%s10595_s10 + $0xe8] sm:$0xff]  }
 0x769   :  { %4649 = vmatpush1.bf16.msra.mxu0 %v7956_v56  ;;  %v8000_v56 = vld [vmem:[%s10595_s10 + $0xa8] sm:$0xff]  }
 0x76a   :  { %4650 = vmatprep.subr.bf16.mxu0 %v7961_v32  ;;  %v8001_v32 = vld [vmem:[%s10595_s10 + $0xf0] sm:$0xff]  }
 0x76d   :  { %4651 = vmatpush1.bf16.msra.mxu0 %v7959_v10  ;;  %v8002_v10 = vld [vmem:[%s10595_s10 + $0xb0] sm:$0xff]  }
 0x76e   :  { %4652 = vmatprep.subr.bf16.mxu0 %v7964_v12  ;;  %v8003_v12 = vld [vmem:[%s10595_s10 + $0xf8] sm:$0xff]  }
 0x771   :  { %4653 = vmatpush1.bf16.msra.mxu0 %v7962_v30  ;;  %v8004_v30 = vld [vmem:[%s10595_s10 + $0xb8] sm:$0xff]  }
 0x772   :  { %4654 = vmatprep.subr.bf16.mxu0 %v7967_v18  ;;  %v8005_v18 = vld [vmem:[%s10595_s10 + $0x40] sm:$0xff]  }
 0x775   :  { %4655 = vmatpush1.bf16.msra.mxu0 %v7965_v38 }
 0x776   :  { %4656 = vmatprep.subr.bf16.mxu0 %v7970_v39 }
 0x779   :  { %4657 = vmatpush1.bf16.msra.mxu0 %v7968_v23 }
 0x77a   :  { %4658 = vmatprep.subr.bf16.mxu0 %v7973_v44 }
 0x77d   :  { %4659 = vmatpush1.bf16.msra.mxu0 %v7971_v48 }
 0x77e   :  { %4660 = vmatprep.subr.bf16.mxu0 %v7976_v24 }
 0x781   :  { %4661 = vmatpush1.bf16.msra.mxu0 %v7974_v51 }
 0x782   :  { %4673 = vmatprep.subr.bf16.mxu0 %v7979_v52 }
 0x784   :  { %4663 = vmatmul.mubr.bf16.vlgmr.msra.gmra.mrb[52].mxu0 %v4383_v35  ;;  %v4720_v35 = vld [vmem:[#allocation8] sm:$0x3] }
 0x785   :  { %4674 = vmatpush1.bf16.msra.mxu0 %v7977_v25  ;;  %4705 = vmatprep.mubr.bf16.mxu0 %v8320_v0  ;;  %v4725_v15 = vrot.slane %v4720_v35, %v9399_v22  ;;  %v4729_v62 = vrot.slane %v4720_v35, %v9401_v28  ;;  %v8006_v25 = vld [vmem:[%s10595_s10] sm:$0xff]   ;;  %v8010_v35 = vld [vmem:[%s10595_s10 + $0x10] sm:$0xff]  }
 0x786   :  { %4675 = vmatprep.subr.bf16.mxu0 %v7982_v55 }
 0x789   :  { %4676 = vmatpush1.bf16.msra.mxu0 %v7980_v57 }
 0x78a   :  { %4677 = vmatprep.subr.bf16.mxu0 %v7985_v16  ;;  %v8007_v16 = vld [vmem:[%s10595_s10 + $0x48] sm:$0xff]  }
 0x78d   :  { %4678 = vmatpush1.bf16.msra.mxu0 %v7983_v58 }
 0x78e   :  { %4679 = vmatprep.subr.bf16.mxu0 %v7988_v59  ;;  %v8008_v59 = vld [vmem:[%s10595_s10 + $0x8] sm:$0xff]  }
 0x791   :  { %4680 = vmatpush1.bf16.msra.mxu0 %v7986_v26  ;;  %v8009_v26 = vld [vmem:[%s10595_s10 + $0x50] sm:$0xff]  }
 0x794   :  { %6859 = vmatmul.mubr.msk.bf16.vlgmr.msra.gmra.mrb[52].mxu0 %vm3045_vm5, %v4385_v49 }
 0x867   :  { %v4707_v36 = vpop.f32.mrb[52].mxu0 }
 0x868   :  { %v4732_v37 = vmul.f32 %v4725_v15, %v4707_v36  ;;  %v4709_v46 = vpop.f32.mrb[53].mxu0  ;;  %v8015_v36 = vld [vmem:[%s10595_s10 + $0x68] sm:$0xff]  }
 0x869   :  { %v4733_v3 = vmul.f32 %v4729_v62, %v4709_v46  ;;  %v4711_v6 = vpop.f32.mrb[54].mxu0  ;;  %v8018_v46 = vld [vmem:[%s10595_s10 + $0x30] sm:$0xff]  }
 0x86a   :  { %v4748_v33 = vadd.f32 %v4741_v63, %v4732_v37  ;;  %v4734_v8 = vmul.f32 %v4725_v15, %v4711_v6  ;;  %v4713_v40 = vpop.f32.mrb[55].mxu0  ;;  %v8012_v15 = vld [vmem:[%s10595_s10 + $0x18] sm:$0xff]   ;;  %v8017_v37 = vld [vmem:[%s10595_s10 + $0x70] sm:$0xff]  }
 0x86b   :  { %v4749_v47 = vadd.f32 %v4745_v1, %v4733_v3  ;;  %v4735_v49 = vmul.f32 %v4729_v62, %v4713_v40  ;;  %v8013_v62 = vld [vmem:[%s10595_s10 + $0x60] sm:$0xff]   ;;  %v8019_v3 = vld [vmem:[%s10595_s10 + $0x78] sm:$0xff]  }
 0x86c   :  { %v4752_v5 = vmax.f32 %v4748_v33, 0.0  ;;  %v4750_v9 = vadd.f32 %v4741_v63, %v4734_v8  ;;  %v8014_v63 = vld [vmem:[%s10595_s10 + $0x20] sm:$0xff]   ;;  %v8020_v6 = vld [vmem:[%s10595_s10 + $0x38] sm:$0xff]  }
 0x86d   :  { %v4753_v60 = vmax.f32 %v4749_v47, 0.0  ;;  %v4751_v17 = vadd.f32 %v4745_v1, %v4735_v49  ;;  %v8016_v1 = vld [vmem:[%s10595_s10 + $0x28] sm:$0xff]   ;;  %v8021_v8 = vld [vmem:[%s10595_s10 + $0x140] sm:$0xff]  }
 0x86e   :  { %v4754_v31 = vmax.f32 %v4750_v9, 0.0  ;;  %v4756_v21 = vmin.f32 %v4752_v5, 6.0  ;;  %v6927_v40 = vld [vmem:[%s10594_s9 + $0x4] sm:$0x3]  ;;  %v8023_v49 = vld [vmem:[%s10595_s10 + $0x148] sm:$0xff]   ;;  %v8025_v9 = vld [vmem:[%s10595_s10 + $0x150] sm:$0xff]  }
 0x86f   :  { %v4755_v13 = vmax.f32 %v4751_v17, 0.0  ;;  %v4757_v14 = vmin.f32 %v4753_v60, 6.0  ;;  %v8022_v47 = vld [vmem:[%s10595_s10 + $0x100] sm:$0xff]   ;;  %v8024_v5 = vld [vmem:[%s10595_s10 + $0x108] sm:$0xff]   ;;  %v8026_v60 = vld [vmem:[%s10595_s10 + $0x110] sm:$0xff]  }
 0x870   :  { %v4758_v22 = vmin.f32 %v4754_v31, 6.0  ;;  %v8027_v17 = vld [vmem:[%s10595_s10 + $0x158] sm:$0xff]  }
 0x871   :  { %v4759_v41 = vmin.f32 %v4755_v13, 6.0  ;;  %v8028_v31 = vld [vmem:[%s10595_s10 + $0x118] sm:$0xff]   ;;  %v8029_v13 = vld [vmem:[%s10595_s10 + $0x160] sm:$0xff]  }
 0x872   :  { %v10281_v28 = vpack.c.bf16 %v4758_v22, %v4756_v21  ;;  %v8030_v21 = vld [vmem:[%s10595_s10 + $0x120] sm:$0xff]   ;;  %v8031_v22 = vld [vmem:[%s10595_s10 + $0x168] sm:$0xff]  }
 0x873   :  { %v10283_v50 = vpack.c.bf16 %v4759_v41, %v4757_v14  ;;  %v8032_v14 = vld [vmem:[%s10595_s10 + $0x128] sm:$0xff]   ;;  %v8033_v41 = vld [vmem:[%s10595_s10 + $0x170] sm:$0xff]  }
 0x875   :  { %4767 = vmatprep.subr.bf16.mxu1 %v10283_v50 }
 0x876   :  { %4768 = vmatpush1.bf16.msra.mxu1 %v10281_v28 }
 0x877   :  { %4847 = vmatprep.subr.bf16.mxu1 %v10283_v50 }
 0x879   :  { %6860 = vmatmul.mubr.msk.bf16.vlgmr.msra.gmra.mrb[84].mxu1 %vm4763_vm6, %v4762_v43  ;;  %v8034_v43 = vld [vmem:[%s10595_s10 + $0x130] sm:$0xff]  }
 0x87a   :  { %4848 = vmatpush1.bf16.msra.mxu1 %v10281_v28  ;;  %4879 = vmatprep.mubr.bf16.mxu1 %v8320_v0 }
 0x87b   :  { %7110 = vmatprep.subr.bf16.mxu1 %v7989_v53  ;;  %v8035_v53 = vld [vmem:[%s10595_s10 + $0x178] sm:$0xff]  }
 0x881   :  { %6862 = vmatmul.mubr.msk.bf16.vlgmr.msra.gmra.mrb[88].mxu1 %vm4763_vm6, %v6861_v45  ;;  %v8036_v45 = vld [vmem:[%s10595_s10 + $0x138] sm:$0xff]  }
 0x882   :  { %7111 = vmatpush3.bf16.msra.mxu1 %v7990_v34 }
 0x883   :  { %7112 = vmatprep.subr.bf16.mxu1 %v7991_v7 }
 0x886   :  { %7113 = vmatpush3.bf16.msra.mxu1 %v7992_v42 }
 0x887   :  { %7114 = vmatprep.subr.bf16.mxu1 %v7993_v20 }
 0x88a   :  { %7115 = vmatpush3.bf16.msra.mxu1 %v7994_v61 }
 0x88b   :  { %7116 = vmatprep.subr.bf16.mxu1 %v7995_v54 }
 0x88e   :  { %7117 = vmatpush3.bf16.msra.mxu1 %v7996_v19 }
 0x88f   :  { %7118 = vmatprep.subr.bf16.mxu1 %v7997_v4 }
 0x892   :  { %7119 = vmatpush3.bf16.msra.mxu1 %v7998_v2 }
 0x893   :  { %7120 = vmatprep.subr.bf16.mxu1 %v7999_v29 }
 0x896   :  { %7121 = vmatpush3.bf16.msra.mxu1 %v8000_v56 }
 0x897   :  { %7122 = vmatprep.subr.bf16.mxu1 %v8001_v32 }
 0x89a   :  { %7123 = vmatpush3.bf16.msra.mxu1 %v8002_v10 }
 0x89b   :  { %7124 = vmatprep.subr.bf16.mxu1 %v8003_v12 }
 0x89e   :  { %7125 = vmatpush3.bf16.msra.mxu1 %v8004_v30 }
 0x89f   :  { %7132 = vmatprep.subr.bf16.mxu1 %v8005_v18 }
 0x94c   :  { %v4801_v38 = vpop.f32.mrb[84].mxu1 }
 0x94d   :  { %v4803_v39 = vpop.f32.mrb[85].mxu1  ;;  %v4808_v33 = vpack.c.bf16 %v4801_v38, %v4801_v38 }
 0x94e   :  { %v4805_v23 = vpop.f32.mrb[86].mxu1  ;;  %v4809_v58 = vpack.c.bf16 %v4803_v39, %v4803_v39  ;;  %v8037_v39 = vld [vmem:[%s10595_s10 + $0x1c0] sm:$0xff]  }
 0x94f   :  { %v4806_v44 = vpop.f32.mrb[87].mxu1  ;;  %v6977_v23 = vld [vmem:[%s10594_s9 + $0x6] sm:$0x3] }
 0x950   :  { %v8038_v44 = vld [vmem:[%s10595_s10 + $0x180] sm:$0xff]  }
 0x954   :  { %v4881_v48 = vpop.f32.mrb[88].mxu1 }
 0x955   :  { %v4883_v24 = vpop.f32.mrb[89].mxu1  ;;  %v4888_v55 = vpack.c.bf16 %v4881_v48, %v4881_v48  ;;  %v8039_v48 = vld [vmem:[%s10595_s10 + $0x1c8] sm:$0xff]  }
 0x956   :  { %v4889_v51 = vpack.c.bf16 %v4883_v24, %v4883_v24  ;;  %v4885_v52 = vpop.f32.mrb[90].mxu1  ;;  %v8040_v24 = vld [vmem:[%s10595_s10 + $0x188] sm:$0xff]  }
 0x957   :  { %v4886_v57 = vpop.f32.mrb[91].mxu1  ;;  %v8042_v52 = vld [vmem:[%s10595_s10 + $0x190] sm:$0xff]  }
 0x958   :  { %5051 = vmatprep.mubr.bf16.mxu1 %v4889_v51  ;;  %v8041_v51 = vld [vmem:[%s10595_s10 + $0x1d0] sm:$0xff]   ;;  %v8045_v57 = vld [vmem:[%s10595_s10 + $0x1e0] sm:$0xff]  }
 0x959   :  { %5052 = vmatmul.mubr.bf16.vlgmr.msra.gmra.mrb[92].mxu1 %v4888_v55  ;;  %v8044_v55 = vld [vmem:[%s10595_s10 + $0x198] sm:$0xff]  }
 0x95a   :  { %7133 = vmatpush3.bf16.msra.mxu1 %v8006_v25  ;;  %5187 = vmatprep.mubr.bf16.mxu1 %v4809_v58  ;;  %v8043_v25 = vld [vmem:[%s10595_s10 + $0x1d8] sm:$0xff]   ;;  %v8047_v58 = vld [vmem:[%s10595_s10 + $0x1e8] sm:$0xff]  }
 0x95b   :  { %7134 = vmatprep.subr.bf16.mxu1 %v8007_v16  ;;  %v8046_v16 = vld [vmem:[%s10595_s10 + $0x1a0] sm:$0xff]  }
 0x95e   :  { %7135 = vmatpush3.bf16.msra.mxu1 %v8008_v59  ;;  %v8048_v59 = vld [vmem:[%s10595_s10 + $0x1a8] sm:$0xff]  }
 0x95f   :  { %7136 = vmatprep.subr.bf16.mxu1 %v8009_v26  ;;  %v8049_v26 = vld [vmem:[%s10595_s10 + $0x1f0] sm:$0xff]  }
 0x962   :  { %7137 = vmatpush3.bf16.msra.mxu1 %v8010_v35  ;;  %v8050_v35 = vld [vmem:[%s10595_s10 + $0x1b0] sm:$0xff]  }
 0x963   :  { %7138 = vmatprep.subr.bf16.mxu1 %v8011_v27  ;;  %v8051_v27 = vld [vmem:[%s10595_s10 + $0x1f8] sm:$0xff]  }
 0x966   :  { %7139 = vmatpush3.bf16.msra.mxu1 %v8012_v15  ;;  %v8052_v15 = vld [vmem:[%s10595_s10 + $0x1b8] sm:$0xff]  }
 0x967   :  { %7140 = vmatprep.subr.bf16.mxu1 %v8013_v62 }
 0x96a   :  { %7141 = vmatpush3.bf16.msra.mxu1 %v8014_v63 }
 0x96b   :  { %7142 = vmatprep.subr.bf16.mxu1 %v8015_v36 }
 0x96e   :  { %7143 = vmatpush3.bf16.msra.mxu1 %v8016_v1 }
 0x96f   :  { %7144 = vmatprep.subr.bf16.mxu1 %v8017_v37 }
 0x972   :  { %7145 = vmatpush3.bf16.msra.mxu1 %v8018_v46 }
 0x973   :  { %7146 = vmatprep.subr.bf16.mxu1 %v8019_v3 }
 0x976   :  { %7147 = vmatpush3.bf16.msra.mxu1 %v8020_v6 }
 0x977   :  { %5200 = vmatprep.subr.bf16.mxu1 %v10283_v50 }
 0x979   :  { %5188 = vmatmul.mubr.bf16.vlgmr.msra.gmra.mrb[96].mxu1 %v4808_v33 }
 0x97a   :  { %5201 = vmatpush1.bf16.msra.mxu1 %v10281_v28  ;;  %5232 = vmatprep.mubr.bf16.mxu1 %v8320_v0 }
 0x97b   :  { %7154 = vmatprep.subr.bf16.mxu1 %v8021_v8 }
 0x981   :  { %6928 = vmatmul.mubr.msk.bf16.vlgmr.msra.gmra.mrb[100].mxu1 %vm4763_vm6, %v6927_v40 }
 0x982   :  { %7155 = vmatpush3.bf16.msra.mxu1 %v8022_v47 }
 0x983   :  { %7156 = vmatprep.subr.bf16.mxu1 %v8023_v49  ;;  %v8053_v49 = vld [vmem:[%s10595_s10 + $0x240] sm:$0xff]  }
 0x986   :  { %7157 = vmatpush3.bf16.msra.mxu1 %v8024_v5  ;;  %v8054_v5 = vld [vmem:[%s10595_s10 + $0x200] sm:$0xff]  }
 0x987   :  { %7158 = vmatprep.subr.bf16.mxu1 %v8025_v9  ;;  %v8055_v9 = vld [vmem:[%s10595_s10 + $0x248] sm:$0xff]  }
 0x98a   :  { %7159 = vmatpush3.bf16.msra.mxu1 %v8026_v60  ;;  %v8058_v60 = vld [vmem:[%s10595_s10 + $0x210] sm:$0xff]  }
 0x98b   :  { %7160 = vmatprep.subr.bf16.mxu1 %v8027_v17  ;;  %v8059_v17 = vld [vmem:[%s10595_s10 + $0x258] sm:$0xff]  }
 0x98e   :  { %7161 = vmatpush3.bf16.msra.mxu1 %v8028_v31  ;;  %v8060_v31 = vld [vmem:[%s10595_s10 + $0x218] sm:$0xff]  }
 0x98f   :  { %7162 = vmatprep.subr.bf16.mxu1 %v8029_v13  ;;  %v8061_v13 = vld [vmem:[%s10595_s10 + $0x260] sm:$0xff]  }
 0x992   :  { %7163 = vmatpush3.bf16.msra.mxu1 %v8030_v21  ;;  %v8062_v21 = vld [vmem:[%s10595_s10 + $0x220] sm:$0xff]  }
 0x993   :  { %7164 = vmatprep.subr.bf16.mxu1 %v8031_v22  ;;  %v8063_v22 = vld [vmem:[%s10595_s10 + $0x268] sm:$0xff]  }
 0x996   :  { %7165 = vmatpush3.bf16.msra.mxu1 %v8032_v14  ;;  %v8064_v14 = vld [vmem:[%s10595_s10 + $0x228] sm:$0xff]  }
 0x997   :  { %7166 = vmatprep.subr.bf16.mxu1 %v8033_v41  ;;  %v8065_v41 = vld [vmem:[%s10595_s10 + $0x270] sm:$0xff]  }
 0x99a   :  { %7167 = vmatpush3.bf16.msra.mxu1 %v8034_v43  ;;  %v8066_v43 = vld [vmem:[%s10595_s10 + $0x230] sm:$0xff]  }
 0x99b   :  { %7168 = vmatprep.subr.bf16.mxu1 %v8035_v53  ;;  %v8067_v53 = vld [vmem:[%s10595_s10 + $0x278] sm:$0xff]  }
 0x99e   :  { %7169 = vmatpush3.bf16.msra.mxu1 %v8036_v45  ;;  %v8068_v45 = vld [vmem:[%s10595_s10 + $0x238] sm:$0xff]  }
 0x99f   :  { %5418 = vmatprep.subr.bf16.mxu1 %v10283_v50 }
 0xa2c   :  { %v7126_v34 = vpop.f32.mrb[92].mxu1 }
 0xa2d   :  { %v7127_v7 = vpop.f32.mrb[93].mxu1 }
 0xa2e   :  { %v7128_v42 = vadd.f32 %v7127_v7, %v7126_v34  ;;  %v7129_v20 = vpop.f32.mrb[94].mxu1 }
 0xa2f   :  { %v7130_v61 = vpop.f32.mrb[95].mxu1 }
 0xa4c   :  { %v7148_v54 = vpop.f32.mrb[96].mxu1 }
 0xa4d   :  { %v7149_v19 = vpop.f32.mrb[97].mxu1 }
 0xa4e   :  { %v7150_v4 = vadd.f32 %v7149_v19, %v7148_v54  ;;  %v7151_v2 = vpop.f32.mrb[98].mxu1 }
 0xa4f   :  { %v7152_v29 = vpop.f32.mrb[99].mxu1 }
 0xa50   :  { %v5190_v56 = vadd.f32 %v7150_v4, %v7128_v42 }
 0xa54   :  { %v5234_v32 = vpop.f32.mrb[100].mxu1 }
 0xa55   :  { %v5236_v10 = vpop.f32.mrb[101].mxu1  ;;  %v5241_v18 = vpack.c.bf16 %v5234_v32, %v5234_v32 }
 0xa56   :  { %v5242_v12 = vpack.c.bf16 %v5236_v10, %v5236_v10  ;;  %v5238_v30 = vpop.f32.mrb[102].mxu1  ;;  %v8069_v10 = vld [vmem:[#allocation14 + $0x20] sm:$0xff]  }
 0xa57   :  { %v5239_v38 = vpop.f32.mrb[103].mxu1  ;;  %v8071_v30 = vld [vmem:[#allocation14 + $0x30] sm:$0xff]  }
 0xa58   :  { %5404 = vmatprep.mubr.bf16.mxu1 %v5242_v12  ;;  %v8070_v12 = vld [vmem:[#allocation14 + $0x28] sm:$0xff]  }
 0xa59   :  { %5405 = vmatmul.mubr.bf16.vlgmr.msra.gmra.mrb[104].mxu1 %v5241_v18  ;;  %v8072_v18 = vld [vmem:[#allocation14 + $0x38] sm:$0xff]  }
 0xa5a   :  { %5419 = vmatpush1.bf16.msra.mxu1 %v10281_v28  ;;  %5450 = vmatprep.mubr.bf16.mxu1 %v8320_v0 }
 0xa5b   :  { %7176 = vmatprep.subr.bf16.mxu1 %v8037_v39 }
 0xa61   :  { %6978 = vmatmul.mubr.msk.bf16.vlgmr.msra.gmra.mrb[108].mxu1 %vm4763_vm6, %v6977_v23 }
 0xa62   :  { %7177 = vmatpush3.bf16.msra.mxu1 %v8038_v44 }
 0xa63   :  { %7178 = vmatprep.subr.bf16.mxu1 %v8039_v48  ;;  %v7077_v48 = vld [vmem:[#allocation11] ss:$0 sm:$0xff] }
 0xa66   :  { %7179 = vmatpush3.bf16.msra.mxu1 %v8040_v24 }
 0xa67   :  { %7180 = vmatprep.subr.bf16.mxu1 %v8041_v51 }
 0xa6a   :  { %7181 = vmatpush3.bf16.msra.mxu1 %v8042_v52  ;;  %v7078_v52 = vld [vmem:[#allocation13] ss:$0 sm:$0xff] }
 0xa6b   :  { %7182 = vmatprep.subr.bf16.mxu1 %v8043_v25 }
 0xa6e   :  { %7183 = vmatpush3.bf16.msra.mxu1 %v8044_v55 }
 0xa6f   :  { %7184 = vmatprep.subr.bf16.mxu1 %v8045_v57 }
 0xa72   :  { %7185 = vmatpush3.bf16.msra.mxu1 %v8046_v16 }
 0xa73   :  { %7186 = vmatprep.subr.bf16.mxu1 %v8047_v58 }
 0xa76   :  { %7187 = vmatpush3.bf16.msra.mxu1 %v8048_v59  ;;  %v8073_v59 = vld [vmem:[#allocation14] sm:$0xff]  }
 0xa77   :  { %7188 = vmatprep.subr.bf16.mxu1 %v8049_v26 }
 0xa7a   :  { %7189 = vmatpush3.bf16.msra.mxu1 %v8050_v35  ;;  %v8074_v35 = vld [vmem:[#allocation14 + $0x8] sm:$0xff]  }
 0xa7b   :  { %7190 = vmatprep.subr.bf16.mxu1 %v8051_v27  ;;  %v8075_v27 = vld [vmem:[#allocation14 + $0x10] sm:$0xff]  }
 0xa7e   :  { %7191 = vmatpush3.bf16.msra.mxu1 %v8052_v15  ;;  %v8076_v15 = vld [vmem:[#allocation14 + $0x18] sm:$0xff]  }
 0xa7f   :  { %5636 = vmatprep.subr.bf16.mxu1 %v10283_v50  ;;  %v7027_v50 = vld [vmem:[%s10594_s9 + $0x8] sm:$0x3] }
 0xb2c   :  { %v7170_v62 = vpop.f32.mrb[104].mxu1 }
 0xb2d   :  { %v7171_v63 = vpop.f32.mrb[105].mxu1 }
 0xb2e   :  { %v7172_v36 = vadd.f32 %v7171_v63, %v7170_v62  ;;  %v7173_v1 = vpop.f32.mrb[106].mxu1 }
 0xb2f   :  { %v7174_v37 = vpop.f32.mrb[107].mxu1 }
 0xb30   :  { %v5412_v46 = vadd.f32 %v7172_v36, %v5190_v56 }
 0xb34   :  { %v5452_v3 = vpop.f32.mrb[108].mxu1 }
 0xb35   :  { %v5454_v6 = vpop.f32.mrb[109].mxu1  ;;  %v5459_v40 = vpack.c.bf16 %v5452_v3, %v5452_v3 }
 0xb36   :  { %v5460_v33 = vpack.c.bf16 %v5454_v6, %v5454_v6  ;;  %v5456_v8 = vpop.f32.mrb[110].mxu1 }
 0xb37   :  { %v5457_v47 = vpop.f32.mrb[111].mxu1 }
 0xb38   :  { %5622 = vmatprep.mubr.bf16.mxu1 %v5460_v33 }
 0xb39   :  { %5623 = vmatmul.mubr.bf16.vlgmr.msra.gmra.mrb[112].mxu1 %v5459_v40 }
 0xb3a   :  { %5637 = vmatpush1.bf16.msra.mxu1 %v10281_v28  ;;  %5668 = vmatprep.mubr.bf16.mxu1 %v8320_v0  ;;  %v8056_v0 = vld [vmem:[%s10595_s10 + $0x208] sm:$0xff]   ;;  %v8057_v28 = vld [vmem:[%s10595_s10 + $0x250] sm:$0xff]   ;;  %s8323_s10 = smov [#allocation17]  }
 0xb3b   :  { %7198 = vmatprep.subr.bf16.mxu1 %v8053_v49  ;;  %s6036_s22 = sshll.u32 %s8323_s10, 4  ;;  %s6037_s22 = int_to_ptr.vmem [resolvable:$true] %s6036_s22 }
 0xb3c   :  { %s8275_s4 = scalar_lea.vmem %s6037_s22, 32  ;;  %p8280_p3 = scmp.lt.s32.totalorder %s6037_s22, %s6037_s22 }
 0xb3d   :  { %p8276_p2 = scmp.ne.s32.totalorder %s6037_s22, %s8275_s4  ;;  %p8281_p4 = scmp.lt.s32.totalorder %s8275_s4, %s8275_s4 }
 0xb3f   :  { %p8282_p5 = por %p8281_p4, %p8280_p3 }
 0xb41   :  { %7028 = vmatmul.mubr.msk.bf16.vlgmr.msra.gmra.mrb[116].mxu1 %vm4763_vm6, %v7027_v50  ;;  %p8283_p6 = pnand %p8282_p5, %p8276_p2 }
 0xb42   :  { %7199 = vmatpush3.bf16.msra.mxu1 %v8054_v5 }
 0xb43   :  { %7200 = vmatprep.subr.bf16.mxu1 %v8055_v9 }
 0xb46   :  { %7201 = vmatpush3.bf16.msra.mxu1 %v8056_v0 }
 0xb47   :  { %7202 = vmatprep.subr.bf16.mxu1 %v8057_v28 }
 0xb4a   :  { %7203 = vmatpush3.bf16.msra.mxu1 %v8058_v60 }
 0xb4b   :  { %7204 = vmatprep.subr.bf16.mxu1 %v8059_v17 }
 0xb4e   :  { %7205 = vmatpush3.bf16.msra.mxu1 %v8060_v31 }
 0xb4f   :  { %7206 = vmatprep.subr.bf16.mxu1 %v8061_v13 }
 0xb52   :  { %7207 = vmatpush3.bf16.msra.mxu1 %v8062_v21 }
 0xb53   :  { %7208 = vmatprep.subr.bf16.mxu1 %v8063_v22 }
 0xb56   :  { %7209 = vmatpush3.bf16.msra.mxu1 %v8064_v14 }
 0xb57   :  { %7210 = vmatprep.subr.bf16.mxu1 %v8065_v41 }
 0xb5a   :  { %7211 = vmatpush3.bf16.msra.mxu1 %v8066_v43 }
 0xb5b   :  { %7212 = vmatprep.subr.bf16.mxu1 %v8067_v53 }
 0xb5e   :  { %7213 = vmatpush3.bf16.msra.mxu1 %v8068_v45 }
 0xb5f   :  { %7280 = vmatprep.subr.bf16.mxu1 %v8321_v11 }
 0xc0c   :  { %v7192_v34 = vpop.f32.mrb[112].mxu1 }
 0xc0d   :  { %v7193_v7 = vpop.f32.mrb[113].mxu1 }
 0xc0e   :  { %v7194_v42 = vadd.f32 %v7193_v7, %v7192_v34  ;;  %v7195_v20 = vpop.f32.mrb[114].mxu1 }
 0xc0f   :  { %v7196_v61 = vpop.f32.mrb[115].mxu1 }
 0xc10   :  { %v5630_v54 = vadd.f32 %v7194_v42, %v5412_v46  ;;  %v7089_v46 = vld [vmem:[#allocation16] ss:$0 sm:$0xff] }
 0xc14   :  { %v5670_v19 = vpop.f32.mrb[116].mxu1 }
 0xc15   :  { %v5672_v4 = vpop.f32.mrb[117].mxu1  ;;  %v5677_v56 = vpack.c.bf16 %v5670_v19, %v5670_v19 }
 0xc16   :  { %v5678_v2 = vpack.c.bf16 %v5672_v4, %v5672_v4  ;;  %v5674_v29 = vpop.f32.mrb[118].mxu1 }
 0xc17   :  { %v5675_v32 = vpop.f32.mrb[119].mxu1 }
 0xc18   :  { %5840 = vmatprep.mubr.bf16.mxu1 %v5678_v2 }
 0xc19   :  { %5841 = vmatmul.mubr.bf16.vlgmr.msra.gmra.mrb[120].mxu1 %v5677_v56 }
 0xc1a   :  { %7288 = vmatprep.mubr.msk.bf16.mxu1 %vm8322_vm4, %v8321_v11  ;;  %7281 = vmatpush3.bf16.msra.mxu1 %v8069_v10 }
 0xc1b   :  { %7282 = vmatprep.subr.bf16.mxu1 %v8321_v11 }
 0xc1e   :  { %7283 = vmatpush3.bf16.msra.mxu1 %v8070_v12 }
 0xc1f   :  { %7284 = vmatprep.subr.bf16.mxu1 %v8321_v11 }
 0xc22   :  { %7285 = vmatpush3.bf16.msra.mxu1 %v8071_v30 }
 0xc23   :  { %7286 = vmatprep.subr.bf16.mxu1 %v8321_v11 }
 0xc26   :  { %7287 = vmatpush3.bf16.msra.mxu1 %v8072_v18 }
 0xc27   :  { %7292 = vmatprep.subr.bf16.mxu1 %v8321_v11 }
 0xcec   :  { %v7214_v38 = vpop.f32.mrb[120].mxu1 }
 0xced   :  { %v7215_v39 = vpop.f32.mrb[121].mxu1 }
 0xcee   :  { %v7216_v23 = vadd.f32 %v7215_v39, %v7214_v38  ;;  %v7217_v44 = vpop.f32.mrb[122].mxu1 }
 0xcef   :  { %v7218_v24 = vpop.f32.mrb[123].mxu1 }
 0xcf0   :  { %v5848_v51 = vadd.f32 %v7216_v23, %v5630_v54 }
 0xcf2   :  { %v5856_v25 = vmul.f32 %v7077_v48, %v5848_v51 }
 0xcf4   :  { %v5864_v55 = vadd.f32 %v7078_v52, %v5856_v25 }
 0xcf6   :  { %v5865_v57 = vmax.f32 %v5864_v55, 0.0 }
 0xcf8   :  { %v5866_v16 = vmin.f32 %v5865_v57, 6.0 }
 0xcfa   :  { %v5867_v58 = vpack.c.bf16 %v5866_v16, %v5866_v16 }
 0xcfc   :  { %v5886_v26 = vrot.slane %v5867_v58, 1 }
 0xcfe   :  { %7289 = vmatmul.mubr.msk.bf16.vlgmr.msra.gmra.mrb[124].mxu1 %vm3045_vm5, %v5886_v26 }
 0xcff   :  { %7293 = vmatpush3.bf16.msra.mxu1 %v8073_v59  ;;  %7300 = vmatprep.mubr.msk.bf16.mxu1 %vm8322_vm4, %v8321_v11 }
 0xd00   :  { %7294 = vmatprep.subr.bf16.mxu1 %v8321_v11 }
 0xd03   :  { %7295 = vmatpush3.bf16.msra.mxu1 %v8074_v35 }
 0xd04   :  { %7296 = vmatprep.subr.bf16.mxu1 %v8321_v11 }
 0xd07   :  { %7297 = vmatpush3.bf16.msra.mxu1 %v8075_v27 }
 0xd08   :  { %7298 = vmatprep.subr.bf16.mxu1 %v8321_v11 }
 0xd0b   :  { %7299 = vmatpush3.bf16.msra.mxu1 %v8076_v15 }
 0xd0e   :  { %7301 = vmatmul.mubr.msk.bf16.vlgmr.msra.gmra.mrb[128].mxu1 %vm3045_vm5, %v5867_v58 }
 0xdd1   :  { %v5948_v62 = vpop.f32.mrb[124].mxu1 }
 0xdd2   :  { %v7290_v63 = vpop.f32.mrb[125].mxu1 }
 0xdd3   :  { %v5951_v36 = vpop.f32.mrb[126].mxu1 }
 0xdd4   :  { %v7291_v1 = vpop.f32.mrb[127].mxu1 }
 0xde1   :  { %v6015_v37 = vpop.f32.mrb[128].mxu1 }
 0xde2   :  { %v6016_v3 = vadd.f32 %v6015_v37, %v5948_v62  ;;  %v7302_v6 = vpop.f32.mrb[129].mxu1 }
 0xde3   :  { %v6018_v33 = vpop.f32.mrb[130].mxu1 }
 0xde4   :  { %v6028_v8 = vadd.f32 %v7089_v46, %v6016_v3  ;;  %v7303_v40 = vpop.f32.mrb[131].mxu1 }
 0xde6   :  { %6029 = vst [vmem:[#allocation17] sm:$0x3] %v6028_v8 }
 0xde7   :  { %8286 = shalt.err (!%p8283_p6)
}
 0xde8   :  { %s8287_s26 = scalar_lea.hbm %s10600_s15, 32 }
 0xde9   :  { %p8288_p7 = scmp.ne.s32.totalorder %s10600_s15, %s8287_s26  ;;  %p8291_p8 = scmp.lt.u32.totalorder %s8287_s26, %s10600_s15 }
 0xdeb   :  { %p8293_p9 = pnand %p8291_p8, %p8288_p7 }
 0xded   :  { %8296 = shalt.err (!%p8293_p9)
}
 0xdee   :  { %6039 = dma.vmem_to_hbm [thread:$0]  %s6037_s22, 32, %s10600_s15, [#allocation4]  }
 0xdef   :  { %8307 = dma.done.wait [#allocation4], 32  }
 0xdf0   :  { %8308 = vsyncadd [#allocation4], 4294967264 }
 0xdf1   :  { %6043 = vsyncpa [#allocation3], 1 }
 0xdf2   :  { %6044 = vsyncpa [#allocation6], 1 }
 0xdf3   :  { %6045 = vsyncpa [#allocation9], 1 }
 0xdf4   :  { %6046 = vsyncpa [#allocation12], 1 }
 0xdf5   :  { %6047 = vsyncpa [#allocation15], 1 }
 0xdf6   :  { %6048 = vsyncpa [#allocation4], 1 }

</bundles_post_ra>
